<compile_context>
chip_gen: v7x
topology: tpu7x:2x2x1
jax: 0.10.0
libtpu: 0.0.40
codegen_flags: <defaults>
</compile_context>

<pallas_src>
import jax
import jax.numpy as jnp
from jax.experimental import pallas as pl
from jax.experimental.pallas import tpu as pltpu

LANE = 128
_VMEM = pl.BlockSpec(memory_space=pltpu.MemorySpace.VMEM)
_VMEM_LIMIT = 32 * 1024 * 1024   # comfortably below v7x's 64 MiB physical VMEM


def _round_up(x, m):
    return ((x + m - 1) // m) * m


def _row_tiling(m):
    """Pick a row tile (multiple of 8, <= 256) and the padded row count."""
    if m >= 256:
        tm = 256
    else:
        tm = _round_up(m, 8)
    return _round_up(m, tm), tm


# ------------------------- fused conv / linear matmul ------------------------ #

def fused_conv_matmul(taps, w_taps, bias, *, scale=None, shift=None,
                      residual=None, relu=False, out_dtype=jnp.bfloat16):
    """out = [(sum_t taps[t] @ w_taps[t]) + bias] [* scale + shift] [relu] [+ residual].

    taps:   (T, M, K)  bf16 im2col tap slabs (K = in-channels padded to 128 lanes)
    w_taps: (T, K, N)  bf16 per-tap weights  (N = out-channels padded to 128 lanes)
    bias / scale / shift: (N,) f32 ; residual: (M, N)
    Grid = (M//tm, T): rows "parallel", taps are the "arbitrary" reduction axis
    accumulated in an f32 VMEM scratch; epilogue applied once at the last tap.
    """
    taps = taps.astype(jnp.bfloat16)
    w_taps = w_taps.astype(jnp.bfloat16)
    T, M, K = taps.shape
    N = w_taps.shape[-1]
    has_bn = scale is not None
    has_res = residual is not None

    Mp, tm = _row_tiling(M)
    if Mp != M:
        taps = jnp.pad(taps, ((0, 0), (0, Mp - M), (0, 0)))
        if has_res:
            residual = jnp.pad(residual, ((0, Mp - M), (0, 0)))

    def kernel(*refs):
        x_ref, w_ref, b_ref = refs[0], refs[1], refs[2]
        idx = 3
        if has_bn:
            sc_ref, sh_ref = refs[idx], refs[idx + 1]
            idx += 2
        if has_res:
            r_ref = refs[idx]
            idx += 1
        o_ref, acc_ref = refs[idx], refs[idx + 1]

        t = pl.program_id(1)

        @pl.when(t == 0)
        def _init():
            acc_ref[...] = jnp.zeros_like(acc_ref)

        acc_ref[...] += jnp.dot(x_ref[0], w_ref[0],
                                preferred_element_type=jnp.float32)

        @pl.when(t == pl.num_programs(1) - 1)
        def _finalize():
            z = acc_ref[...] + b_ref[...]
            if has_bn:
                z = z * sc_ref[...] + sh_ref[...]
            if relu:
                z = jnp.maximum(z, 0.0)
            if has_res:
                z = z + r_ref[...].astype(jnp.float32)
            o_ref[...] = z.astype(o_ref.dtype)

    in_specs = [
        pl.BlockSpec((1, tm, K), lambda i, t: (t, i, 0)),
        pl.BlockSpec((1, K, N), lambda i, t: (t, 0, 0)),
        pl.BlockSpec((1, N), lambda i, t: (0, 0)),
    ]
    inputs = [taps, w_taps, bias.reshape(1, N).astype(jnp.float32)]
    if has_bn:
        in_specs += [pl.BlockSpec((1, N), lambda i, t: (0, 0)),
                     pl.BlockSpec((1, N), lambda i, t: (0, 0))]
        inputs += [scale.reshape(1, N).astype(jnp.float32),
                   shift.reshape(1, N).astype(jnp.float32)]
    if has_res:
        in_specs.append(pl.BlockSpec((tm, N), lambda i, t: (i, 0)))
        inputs.append(residual)

    out = pl.pallas_call(
        kernel,
        out_shape=jax.ShapeDtypeStruct((Mp, N), out_dtype),
        grid_spec=pltpu.PrefetchScalarGridSpec(
            num_scalar_prefetch=0,
            grid=(Mp // tm, T),
            in_specs=in_specs,
            out_specs=pl.BlockSpec((tm, N), lambda i, t: (i, 0)),
            scratch_shapes=[pltpu.VMEM((tm, N), jnp.float32)]),
        compiler_params=pltpu.CompilerParams(
            dimension_semantics=("parallel", "arbitrary"),
            vmem_limit_bytes=_VMEM_LIMIT),
    )(*inputs)
    return out[:M] if Mp != M else out


# ---------------------- fused BN + ReLU (block-entry only) -------------------- #
# Kept standalone because the shortcut branch must read the *raw* input x.

def _bn_relu_kernel(x_ref, sc_ref, sh_ref, o_ref):
    z = x_ref[...].astype(jnp.float32) * sc_ref[...] + sh_ref[...]
    o_ref[...] = jnp.maximum(z, 0.0).astype(o_ref.dtype)


def bn_relu_2d(x2d, scale, shift, out_dtype=jnp.bfloat16):
    M, C = x2d.shape
    Mp, tm = _row_tiling(M)
    if Mp != M:
        x2d = jnp.pad(x2d, ((0, Mp - M), (0, 0)))
    out = pl.pallas_call(
        _bn_relu_kernel,
        out_shape=jax.ShapeDtypeStruct((Mp, C), out_dtype),
        grid_spec=pltpu.PrefetchScalarGridSpec(
            num_scalar_prefetch=0,
            grid=(Mp // tm,),
            in_specs=[pl.BlockSpec((tm, C), lambda i: (i, 0)),
                      pl.BlockSpec((1, C), lambda i: (0, 0)),
                      pl.BlockSpec((1, C), lambda i: (0, 0))],
            out_specs=pl.BlockSpec((tm, C), lambda i: (i, 0))),
        compiler_params=pltpu.CompilerParams(
            dimension_semantics=("parallel",),
            vmem_limit_bytes=_VMEM_LIMIT),
    )(x2d, scale.reshape(1, C).astype(jnp.float32),
      shift.reshape(1, C).astype(jnp.float32))
    return out[:M] if Mp != M else out


# ----------- fused tail: BN -> ReLU -> avgpool(1,1) -> flatten -> linear ----------- #

def _tail_kernel(x_ref, sc_ref, sh_ref, w_ref, b_ref, o_ref):
    h = jnp.maximum(x_ref[...].astype(jnp.float32) * sc_ref[...][None]
                    + sh_ref[...][None], 0.0)               # (N, HW, C)
    pooled = jnp.mean(h, axis=1)                            # (N, C) == AdaptiveAvgPool2d((1,1))
    o_ref[...] = (jnp.dot(pooled.astype(jnp.bfloat16), w_ref[...],
                          preferred_element_type=jnp.float32)
                  + b_ref[...])


def tail_fused(x3, scale, shift, w, b):
    Nb, HW, Cp = x3.shape
    Np = w.shape[-1]
    return pl.pallas_call(
        _tail_kernel,
        out_shape=jax.ShapeDtypeStruct((Nb, Np), jnp.float32),
        in_specs=[_VMEM] * 5,
        out_specs=_VMEM,
        compiler_params=pltpu.CompilerParams(vmem_limit_bytes=_VMEM_LIMIT),
    )(x3.astype(jnp.bfloat16),
      scale.reshape(1, Cp).astype(jnp.float32),
      shift.reshape(1, Cp).astype(jnp.float32),
      w.astype(jnp.bfloat16),
      b.reshape(1, Np).astype(jnp.float32))


# --------------------------------- im2col glue --------------------------------- #

def build_taps_3x3(x, stride):
    """Tap slabs for a 3x3 / padding=1 conv.  x: (N,H,W,Cp) -> (9, N*Ho*Wo, Cp)."""
    # TODO(synk): gather the 9 taps inside the kernel (offset index_map / manual DMA) to
    # avoid materializing a 9x activation tensor; the tap grid axis still overlaps their
    # DMA with the matmul.
    N, H, W, C = x.shape
    Ho = (H - 1) // stride + 1
    Wo = (W - 1) // stride + 1
    xp = jnp.pad(x, ((0, 0), (1, 1), (1, 1), (0, 0)))
    taps = []
    for kh in range(3):
        for kw in range(3):
            sl = xp[:, kh:kh + stride * (Ho - 1) + 1:stride,
                    kw:kw + stride * (Wo - 1) + 1:stride, :]
            taps.append(sl.reshape(N * Ho * Wo, C))
    return jnp.stack(taps, axis=0)


# ----------------------------- parameter creation ----------------------------- #

def _conv_params(key, cin, cout, k):
    kw_, kb = jax.random.split(key)
    fan_in = cin * k * k
    w = jax.random.normal(kw_, (k, k, cin, cout), jnp.float32) / jnp.sqrt(fan_in)
    b = 0.01 * jax.random.normal(kb, (cout,), jnp.float32)
    return {"w": w, "b": b}


def _bn_params(key, c):
    k1, k2, k3, k4 = jax.random.split(key, 4)
    return {
        "gamma": 1.0 + 0.1 * jax.random.normal(k1, (c,), jnp.float32),
        "beta": 0.1 * jax.random.normal(k2, (c,), jnp.float32),
        "mean": 0.1 * jax.random.normal(k3, (c,), jnp.float32),
        "var": jnp.abs(jax.random.normal(k4, (c,), jnp.float32)) + 0.5,
    }


def init_wideresnet_params(key, depth=10, widen_factor=1, num_classes=100):
    l = int((depth - 4) / 6)
    k = widen_factor
    keys = iter(jax.random.split(key, 512))
    params = {"init_conv": _conv_params(next(keys), 3, 16, 3)}
    in_c = 16

    def make_layer(out_c, num_blocks, stride):
        nonlocal in_c
        blocks = []
        for s in [stride] + [1] * (num_blocks - 1):
            blk = {
                "bn1": _bn_params(next(keys), in_c),
                "conv1": _conv_params(next(keys), in_c, out_c, 3),
                "bn2": _bn_params(next(keys), out_c),
                "conv2": _conv_params(next(keys), out_c, out_c, 3),
                "stride": s,
            }
            if in_c != out_c or s != 1:
                blk["shortcut"] = _conv_params(next(keys), in_c, out_c, 1)
            blocks.append(blk)
            in_c = out_c
        return blocks

    params["conv2"] = make_layer(16 * k, l, 1)
    params["conv3"] = make_layer(32 * k, l, 2)
    params["conv4"] = make_layer(64 * k, l, 2)
    params["bn"] = _bn_params(next(keys), 64 * k)
    kl1, kl2 = jax.random.split(next(keys))
    params["linear"] = {
        "w": jax.random.normal(kl1, (64 * k, num_classes), jnp.float32) / jnp.sqrt(64 * k),
        "b": 0.01 * jax.random.normal(kl2, (num_classes,), jnp.float32),
    }
    return params


# ---------------- parameter packing (pad channels to 128 lanes, bf16 weights) ---------------- #

def _pack_conv(p, cinp, coutp):
    w = p["w"]                                   # (k, k, cin, cout) HWIO
    k, _, cin, cout = w.shape
    wp = jnp.zeros((k, k, cinp, coutp), jnp.float32).at[:, :, :cin, :cout].set(w)
    bp = jnp.zeros((coutp,), jnp.float32).at[:cout].set(p["b"])
    return wp.reshape(k * k, cinp, coutp).astype(jnp.bfloat16), bp


def _pack_bn(bn, cp, eps=1e-5):
    scale = bn["gamma"] / jnp.sqrt(bn["var"] + eps)
    shift = bn["beta"] - bn["mean"] * scale
    c = scale.shape[0]
    return (jnp.zeros((cp,), jnp.float32).at[:c].set(scale),
            jnp.zeros((cp,), jnp.float32).at[:c].set(shift))


def pack_params(params, eps=1e-5):
    def rup(c):
        return _round_up(c, LANE)

    packed = {}
    w0 = params["init_conv"]["w"]
    packed["init_w"], packed["init_b"] = _pack_conv(
        params["init_conv"], rup(w0.shape[2]), rup(w0.shape[3]))

    blocks = []
    for blk in params["conv2"] + params["conv3"] + params["conv4"]:
        cin = blk["conv1"]["w"].shape[2]
        cout = blk["conv1"]["w"].shape[3]
        cinp, coutp = rup(cin), rup(cout)
        b = {"stride": int(blk["stride"])}
        b["bn1_scale"], b["bn1_shift"] = _pack_bn(blk["bn1"], cinp, eps)
        b["w1"], b["b1"] = _pack_conv(blk["conv1"], cinp, coutp)
        b["bn2_scale"], b["bn2_shift"] = _pack_bn(blk["bn2"], coutp, eps)
        b["w2"], b["b2"] = _pack_conv(blk["conv2"], coutp, coutp)
        if "shortcut" in blk:
            b["ws"], b["bs"] = _pack_conv(blk["shortcut"], cinp, coutp)
        blocks.append(b)
    packed["blocks"] = blocks

    cp = rup(params["bn"]["gamma"].shape[0])
    packed["bn_scale"], packed["bn_shift"] = _pack_bn(params["bn"], cp, eps)
    lw, lb = params["linear"]["w"], params["linear"]["b"]
    ncp = rup(lw.shape[1])
    packed["lin_w"] = (jnp.zeros((cp, ncp), jnp.float32)
                       .at[:lw.shape[0], :lw.shape[1]].set(lw).astype(jnp.bfloat16))
    packed["lin_b"] = jnp.zeros((ncp,), jnp.float32).at[:lb.shape[0]].set(lb)
    packed["num_classes"] = int(lw.shape[1])
    return packed


# ------------------------------------ forward ------------------------------------ #

def wide_basic_forward(x, blk):
    """x: (N, H, W, Cinp) bf16 NHWC, channels zero-padded to a multiple of 128."""
    s = blk["stride"]
    N, H, W, Cp = x.shape
    Coutp = blk["w1"].shape[-1]
    Ho = (H - 1) // s + 1
    Wo = (W - 1) // s + 1

    # residual branch: BN1+ReLU -> conv1(s)[epilogue: bias, BN2, ReLU] -> Dropout(id) -> conv2(1)
    h1 = bn_relu_2d(x.reshape(-1, Cp), blk["bn1_scale"], blk["bn1_shift"]).reshape(N, H, W, Cp)
    taps1 = build_taps_3x3(h1, s)
    h2 = fused_conv_matmul(taps1, blk["w1"], blk["b1"],
                           scale=blk["bn2_scale"], shift=blk["bn2_shift"], relu=True)
    # TODO(synk): Dropout(p=0.5) is the identity in eval mode; training-mode masking not implemented.
    h2 = h2.reshape(N, Ho, Wo, Coutp)

    # shortcut branch (operates on the RAW input x)
    if "ws" in blk:
        xs = x[:, ::s, ::s, :].reshape(1, N * Ho * Wo, Cp)
        sc = fused_conv_matmul(xs, blk["ws"], blk["bs"])          # 1x1 conv, bias epilogue
    else:
        sc = x.reshape(-1, Cp)                                    # identity

    # conv2 with the residual add fused into its epilogue
    taps2 = build_taps_3x3(h2, 1)
    out = fused_conv_matmul(taps2, blk["w2"], blk["b2"], residual=sc)
    return out.reshape(N, Ho, Wo, Coutp)


def wideresnet_forward(packed, x_nchw):
    x = jnp.transpose(x_nchw, (0, 2, 3, 1)).astype(jnp.bfloat16)   # NCHW -> NHWC
    N, H, W, C = x.shape
    cinp = packed["init_w"].shape[1]
    if cinp != C:
        x = jnp.pad(x, ((0, 0), (0, 0), (0, 0), (0, cinp - C)))
    coutp = packed["init_w"].shape[-1]
    taps = build_taps_3x3(x, 1)
    x = fused_conv_matmul(taps, packed["init_w"], packed["init_b"]).reshape(N, H, W, coutp)

    for blk in packed["blocks"]:
        x = wide_basic_forward(x, blk)

    N, H, W, Cp = x.shape
    logits = tail_fused(x.reshape(N, H * W, Cp),
                        packed["bn_scale"], packed["bn_shift"],
                        packed["lin_w"], packed["lin_b"])
    return logits[:, :packed["num_classes"]]


# -------------------------------------- main -------------------------------------- #

if __name__ == "__main__":
    key = jax.random.PRNGKey(0)
    kx, kp = jax.random.split(key)
    # depth=10 -> 1 WideBasic block per stage, widen_factor=1, num_classes=100
    # (same 16/16/32/64 channel plan as the PyTorch module, small spatial for speed).
    params = init_wideresnet_params(kp, depth=10, widen_factor=1, num_classes=100)
    packed = pack_params(params)

    x = jax.random.normal(kx, (2, 3, 16, 16), jnp.float32)   # NCHW, like PyTorch

    fwd = jax.jit(lambda inp: wideresnet_forward(packed, inp))
    logits = fwd(x)
    jax.block_until_ready(logits)
    assert logits.shape == (2, 100) and logits.dtype == jnp.float32
    print("KERNEL_OK")
</pallas_src>

<mosaic_0001>
module attributes {stable_mosaic.version = 11 : i64} {
  func.func @kernel(%arg0: i32, %arg1: i32, %arg2: memref<1x256x128xbf16, #tpu.memory_space<vmem>>, %arg3: memref<1x128x128xbf16, #tpu.memory_space<vmem>>, %arg4: memref<1x128xf32, #tpu.memory_space<vmem>>, %arg5: memref<256x128xbf16, #tpu.memory_space<vmem>>, %arg6: memref<256x128xf32, #tpu.memory_space<vmem>>) attributes {dimension_semantics = [#tpu.dimension_semantics<parallel>, #tpu.dimension_semantics<arbitrary>], iteration_bounds = array<i64: 2, 9>, scalar_prefetch = 0 : i64, scratch_operands = 1 : i64, tpu.core_type = #tpu.core_type<tc>, window_params = [{transform_indices = @transform_0, window_bounds = array<i64: 1, 256, 128>}, {transform_indices = @transform_1, window_bounds = array<i64: 1, 128, 128>}, {pipeline_mode = #tpu.pipeline_mode<synchronous>, transform_indices = @transform_2, window_bounds = array<i64: 1, 128>}, {transform_indices = @transform_3, window_bounds = array<i64: 256, 128>}]} {
    %c0_i32 = arith.constant 0 : i32
    %0 = arith.cmpi eq, %arg1, %c0_i32 : i32
    %1 = arith.extui %0 : i1 to i32
    %c0_i32_0 = arith.constant 0 : i32
    %2 = arith.cmpi ne, %1, %c0_i32_0 : i32
    scf.if %2 {
      %cst_11 = arith.constant 0.000000e+00 : f32
      %14 = vector.broadcast %cst_11 : f32 to vector<256x128xf32>
      %c0_12 = arith.constant 0 : index
      %c0_13 = arith.constant 0 : index
      %15 = vector.load %arg6[%c0_12, %c0_13] : memref<256x128xf32, #tpu.memory_space<vmem>>, vector<256x128xf32>
      tpu.vector_store %arg6[%c0_12, %c0_13], %14 {strides = array<i32>} : memref<256x128xf32, #tpu.memory_space<vmem>>, vector<256x128xf32>,
    } else {
    }
    %c0 = arith.constant 0 : index
    %c0_1 = arith.constant 0 : index
    %3 = vector.load %arg6[%c0, %c0_1] : memref<256x128xf32, #tpu.memory_space<vmem>>, vector<256x128xf32>
    %c0_2 = arith.constant 0 : index
    %c0_3 = arith.constant 0 : index
    %c0_4 = arith.constant 0 : index
    %4 = vector.load %arg2[%c0_2, %c0_3, %c0_4] : memref<1x256x128xbf16, #tpu.memory_space<vmem>>, vector<1x256x128xbf16>
    %5 = vector.shape_cast %4 : vector<1x256x128xbf16> to vector<256x128xbf16>
    %c0_5 = arith.constant 0 : index
    %c0_6 = arith.constant 0 : index
    %c0_7 = arith.constant 0 : index
    %6 = vector.load %arg3[%c0_5, %c0_6, %c0_7] : memref<1x128x128xbf16, #tpu.memory_space<vmem>>, vector<1x128x128xbf16>
    %7 = vector.shape_cast %6 : vector<1x128x128xbf16> to vector<128x128xbf16>
    %cst = arith.constant dense<0.000000e+00> : vector<256x128xf32>
    %8 = tpu.matmul %5, %7, %cst {dimension_numbers = #tpu.dot_dimension_numbers<[1], [0], [0], [1], [0, 0, 1, 1], [], []>} : vector<256x128xbf16>, vector<128x128xbf16>, vector<256x128xf32> -> vector<256x128xf32>
    %9 = arith.addf %3, %8 : vector<256x128xf32>
    %c0_8 = arith.constant 0 : index
    %c0_9 = arith.constant 0 : index
    %10 = vector.load %arg6[%c0_8, %c0_9] : memref<256x128xf32, #tpu.memory_space<vmem>>, vector<256x128xf32>
    tpu.vector_store %arg6[%c0_8, %c0_9], %9 {strides = array<i32>} : memref<256x128xf32, #tpu.memory_space<vmem>>, vector<256x128xf32>,
    %c8_i32 = arith.constant 8 : i32
    %11 = arith.cmpi eq, %arg1, %c8_i32 : i32
    %12 = arith.extui %11 : i1 to i32
    %c0_i32_10 = arith.constant 0 : i32
    %13 = arith.cmpi ne, %12, %c0_i32_10 : i32
    scf.if %13 {
      %c0_11 = arith.constant 0 : index
      %c0_12 = arith.constant 0 : index
      %14 = vector.load %arg6[%c0_11, %c0_12] : memref<256x128xf32, #tpu.memory_space<vmem>>, vector<256x128xf32>
      %c0_13 = arith.constant 0 : index
      %c0_14 = arith.constant 0 : index
      %15 = vector.load %arg4[%c0_13, %c0_14] : memref<1x128xf32, #tpu.memory_space<vmem>>, vector<1x128xf32>
      %16 = vector.broadcast %15 : vector<1x128xf32> to vector<256x128xf32>
      %17 = arith.addf %14, %16 : vector<256x128xf32>
      %18 = arith.truncf %17 : vector<256x128xf32> to vector<256x128xbf16>
      %c0_15 = arith.constant 0 : index
      %c0_16 = arith.constant 0 : index
      %19 = vector.load %arg5[%c0_15, %c0_16] : memref<256x128xbf16, #tpu.memory_space<vmem>>, vector<256x128xbf16>
      tpu.vector_store %arg5[%c0_15, %c0_16], %18 {strides = array<i32>} : memref<256x128xbf16, #tpu.memory_space<vmem>>, vector<256x128xbf16>,
    } else {
    }
    return
  }
  func.func @transform_0(%arg0: i32, %arg1: i32) -> (i32, i32, i32) {
    %c0_i32 = arith.constant 0 : i32
    %c0_i32_0 = arith.constant 0 : i32
    return %arg1, %arg0, %c0_i32 : i32, i32, i32
  }
  func.func @transform_1(%arg0: i32, %arg1: i32) -> (i32, i32, i32) {
    %c0_i32 = arith.constant 0 : i32
    %c0_i32_0 = arith.constant 0 : i32
    %c0_i32_1 = arith.constant 0 : i32
    return %arg1, %c0_i32, %c0_i32_0 : i32, i32, i32
  }
  func.func @transform_2(%arg0: i32, %arg1: i32) -> (i32, i32) {
    %c0_i32 = arith.constant 0 : i32
    %c0_i32_0 = arith.constant 0 : i32
    %c0_i32_1 = arith.constant 0 : i32
    return %c0_i32, %c0_i32_0 : i32, i32
  }
  func.func @transform_3(%arg0: i32, %arg1: i32) -> (i32, i32) {
    %c0_i32 = arith.constant 0 : i32
    %c0_i32_0 = arith.constant 0 : i32
    return %arg0, %c0_i32 : i32, i32
  }
}

module attributes {stable_mosaic.version = 11 : i64} {
  func.func @_bn_relu_kernel(%arg0: i32, %arg1: memref<256x128xbf16, #tpu.memory_space<vmem>>, %arg2: memref<1x128xf32, #tpu.memory_space<vmem>>, %arg3: memref<1x128xf32, #tpu.memory_space<vmem>>, %arg4: memref<256x128xbf16, #tpu.memory_space<vmem>>) attributes {dimension_semantics = [#tpu.dimension_semantics<parallel>], iteration_bounds = array<i64: 2>, scalar_prefetch = 0 : i64, scratch_operands = 0 : i64, tpu.core_type = #tpu.core_type<tc>, window_params = [{transform_indices = @transform_0, window_bounds = array<i64: 256, 128>}, {pipeline_mode = #tpu.pipeline_mode<synchronous>, transform_indices = @transform_1, window_bounds = array<i64: 1, 128>}, {pipeline_mode = #tpu.pipeline_mode<synchronous>, transform_indices = @transform_2, window_bounds = array<i64: 1, 128>}, {transform_indices = @transform_3, window_bounds = array<i64: 256, 128>}]} {
    %c0 = arith.constant 0 : index
    %c0_0 = arith.constant 0 : index
    %0 = vector.load %arg1[%c0, %c0_0] : memref<256x128xbf16, #tpu.memory_space<vmem>>, vector<256x128xbf16>
    %1 = arith.extf %0 : vector<256x128xbf16> to vector<256x128xf32>
    %c0_1 = arith.constant 0 : index
    %c0_2 = arith.constant 0 : index
    %2 = vector.load %arg2[%c0_1, %c0_2] : memref<1x128xf32, #tpu.memory_space<vmem>>, vector<1x128xf32>
    %3 = vector.broadcast %2 : vector<1x128xf32> to vector<256x128xf32>
    %4 = arith.mulf %1, %3 : vector<256x128xf32>
    %c0_3 = arith.constant 0 : index
    %c0_4 = arith.constant 0 : index
    %5 = vector.load %arg3[%c0_3, %c0_4] : memref<1x128xf32, #tpu.memory_space<vmem>>, vector<1x128xf32>
    %6 = vector.broadcast %5 : vector<1x128xf32> to vector<256x128xf32>
    %7 = arith.addf %4, %6 : vector<256x128xf32>
    %cst = arith.constant 0.000000e+00 : f32
    %8 = vector.broadcast %cst : f32 to vector<256x128xf32>
    %9 = arith.maximumf %7, %8 : vector<256x128xf32>
    %10 = arith.truncf %9 : vector<256x128xf32> to vector<256x128xbf16>
    %c0_5 = arith.constant 0 : index
    %c0_6 = arith.constant 0 : index
    %11 = vector.load %arg4[%c0_5, %c0_6] : memref<256x128xbf16, #tpu.memory_space<vmem>>, vector<256x128xbf16>
    tpu.vector_store %arg4[%c0_5, %c0_6], %10 {strides = array<i32>} : memref<256x128xbf16, #tpu.memory_space<vmem>>, vector<256x128xbf16>,
    return
  }
  func.func @transform_0(%arg0: i32) -> (i32, i32) {
    %c0_i32 = arith.constant 0 : i32
    %c0_i32_0 = arith.constant 0 : i32
    return %arg0, %c0_i32 : i32, i32
  }
  func.func @transform_1(%arg0: i32) -> (i32, i32) {
    %c0_i32 = arith.constant 0 : i32
    %c0_i32_0 = arith.constant 0 : i32
    %c0_i32_1 = arith.constant 0 : i32
    return %c0_i32, %c0_i32_0 : i32, i32
  }
  func.func @transform_2(%arg0: i32) -> (i32, i32) {
    %c0_i32 = arith.constant 0 : i32
    %c0_i32_0 = arith.constant 0 : i32
    %c0_i32_1 = arith.constant 0 : i32
    return %c0_i32, %c0_i32_0 : i32, i32
  }
  func.func @transform_3(%arg0: i32) -> (i32, i32) {
    %c0_i32 = arith.constant 0 : i32
    %c0_i32_0 = arith.constant 0 : i32
    return %arg0, %c0_i32 : i32, i32
  }
}

module attributes {stable_mosaic.version = 11 : i64} {
  func.func @kernel(%arg0: i32, %arg1: i32, %arg2: memref<1x256x128xbf16, #tpu.memory_space<vmem>>, %arg3: memref<1x128x128xbf16, #tpu.memory_space<vmem>>, %arg4: memref<1x128xf32, #tpu.memory_space<vmem>>, %arg5: memref<1x128xf32, #tpu.memory_space<vmem>>, %arg6: memref<1x128xf32, #tpu.memory_space<vmem>>, %arg7: memref<256x128xbf16, #tpu.memory_space<vmem>>, %arg8: memref<256x128xf32, #tpu.memory_space<vmem>>) attributes {dimension_semantics = [#tpu.dimension_semantics<parallel>, #tpu.dimension_semantics<arbitrary>], iteration_bounds = array<i64: 2, 9>, scalar_prefetch = 0 : i64, scratch_operands = 1 : i64, tpu.core_type = #tpu.core_type<tc>, window_params = [{transform_indices = @transform_0, window_bounds = array<i64: 1, 256, 128>}, {transform_indices = @transform_1, window_bounds = array<i64: 1, 128, 128>}, {pipeline_mode = #tpu.pipeline_mode<synchronous>, transform_indices = @transform_2, window_bounds = array<i64: 1, 128>}, {pipeline_mode = #tpu.pipeline_mode<synchronous>, transform_indices = @transform_3, window_bounds = array<i64: 1, 128>}, {pipeline_mode = #tpu.pipeline_mode<synchronous>, transform_indices = @transform_4, window_bounds = array<i64: 1, 128>}, {transform_indices = @transform_5, window_bounds = array<i64: 256, 128>}]} {
    %c0_i32 = arith.constant 0 : i32
    %0 = arith.cmpi eq, %arg1, %c0_i32 : i32
    %1 = arith.extui %0 : i1 to i32
    %c0_i32_0 = arith.constant 0 : i32
    %2 = arith.cmpi ne, %1, %c0_i32_0 : i32
    scf.if %2 {
      %cst_11 = arith.constant 0.000000e+00 : f32
      %14 = vector.broadcast %cst_11 : f32 to vector<256x128xf32>
      %c0_12 = arith.constant 0 : index
      %c0_13 = arith.constant 0 : index
      %15 = vector.load %arg8[%c0_12, %c0_13] : memref<256x128xf32, #tpu.memory_space<vmem>>, vector<256x128xf32>
      tpu.vector_store %arg8[%c0_12, %c0_13], %14 {strides = array<i32>} : memref<256x128xf32, #tpu.memory_space<vmem>>, vector<256x128xf32>,
    } else {
    }
    %c0 = arith.constant 0 : index
    %c0_1 = arith.constant 0 : index
    %3 = vector.load %arg8[%c0, %c0_1] : memref<256x128xf32, #tpu.memory_space<vmem>>, vector<256x128xf32>
    %c0_2 = arith.constant 0 : index
    %c0_3 = arith.constant 0 : index
    %c0_4 = arith.constant 0 : index
    %4 = vector.load %arg2[%c0_2, %c0_3, %c0_4] : memref<1x256x128xbf16, #tpu.memory_space<vmem>>, vector<1x256x128xbf16>
    %5 = vector.shape_cast %4 : vector<1x256x128xbf16> to vector<256x128xbf16>
    %c0_5 = arith.constant 0 : index
    %c0_6 = arith.constant 0 : index
    %c0_7 = arith.constant 0 : index
    %6 = vector.load %arg3[%c0_5, %c0_6, %c0_7] : memref<1x128x128xbf16, #tpu.memory_space<vmem>>, vector<1x128x128xbf16>
    %7 = vector.shape_cast %6 : vector<1x128x128xbf16> to vector<128x128xbf16>
    %cst = arith.constant dense<0.000000e+00> : vector<256x128xf32>
    %8 = tpu.matmul %5, %7, %cst {dimension_numbers = #tpu.dot_dimension_numbers<[1], [0], [0], [1], [0, 0, 1, 1], [], []>} : vector<256x128xbf16>, vector<128x128xbf16>, vector<256x128xf32> -> vector<256x128xf32>
    %9 = arith.addf %3, %8 : vector<256x128xf32>
    %c0_8 = arith.constant 0 : index
    %c0_9 = arith.constant 0 : index
    %10 = vector.load %arg8[%c0_8, %c0_9] : memref<256x128xf32, #tpu.memory_space<vmem>>, vector<256x128xf32>
    tpu.vector_store %arg8[%c0_8, %c0_9], %9 {strides = array<i32>} : memref<256x128xf32, #tpu.memory_space<vmem>>, vector<256x128xf32>,
    %c8_i32 = arith.constant 8 : i32
    %11 = arith.cmpi eq, %arg1, %c8_i32 : i32
    %12 = arith.extui %11 : i1 to i32
    %c0_i32_10 = arith.constant 0 : i32
    %13 = arith.cmpi ne, %12, %c0_i32_10 : i32
    scf.if %13 {
      %c0_11 = arith.constant 0 : index
      %c0_12 = arith.constant 0 : index
      %14 = vector.load %arg8[%c0_11, %c0_12] : memref<256x128xf32, #tpu.memory_space<vmem>>, vector<256x128xf32>
      %c0_13 = arith.constant 0 : index
      %c0_14 = arith.constant 0 : index
      %15 = vector.load %arg4[%c0_13, %c0_14] : memref<1x128xf32, #tpu.memory_space<vmem>>, vector<1x128xf32>
      %16 = vector.broadcast %15 : vector<1x128xf32> to vector<256x128xf32>
      %17 = arith.addf %14, %16 : vector<256x128xf32>
      %c0_15 = arith.constant 0 : index
      %c0_16 = arith.constant 0 : index
      %18 = vector.load %arg5[%c0_15, %c0_16] : memref<1x128xf32, #tpu.memory_space<vmem>>, vector<1x128xf32>
      %19 = vector.broadcast %18 : vector<1x128xf32> to vector<256x128xf32>
      %20 = arith.mulf %17, %19 : vector<256x128xf32>
      %c0_17 = arith.constant 0 : index
      %c0_18 = arith.constant 0 : index
      %21 = vector.load %arg6[%c0_17, %c0_18] : memref<1x128xf32, #tpu.memory_space<vmem>>, vector<1x128xf32>
      %22 = vector.broadcast %21 : vector<1x128xf32> to vector<256x128xf32>
      %23 = arith.addf %20, %22 : vector<256x128xf32>
      %cst_19 = arith.constant 0.000000e+00 : f32
      %24 = vector.broadcast %cst_19 : f32 to vector<256x128xf32>
      %25 = arith.maximumf %23, %24 : vector<256x128xf32>
      %26 = arith.truncf %25 : vector<256x128xf32> to vector<256x128xbf16>
      %c0_20 = arith.constant 0 : index
      %c0_21 = arith.constant 0 : index
      %27 = vector.load %arg7[%c0_20, %c0_21] : memref<256x128xbf16, #tpu.memory_space<vmem>>, vector<256x128xbf16>
      tpu.vector_store %arg7[%c0_20, %c0_21], %26 {strides = array<i32>} : memref<256x128xbf16, #tpu.memory_space<vmem>>, vector<256x128xbf16>,
    } else {
    }
    return
  }
  func.func @transform_0(%arg0: i32, %arg1: i32) -> (i32, i32, i32) {
    %c0_i32 = arith.constant 0 : i32
    %c0_i32_0 = arith.constant 0 : i32
    return %arg1, %arg0, %c0_i32 : i32, i32, i32
  }
  func.func @transform_1(%arg0: i32, %arg1: i32) -> (i32, i32, i32) {
    %c0_i32 = arith.constant 0 : i32
    %c0_i32_0 = arith.constant 0 : i32
    %c0_i32_1 = arith.constant 0 : i32
    return %arg1, %c0_i32, %c0_i32_0 : i32, i32, i32
  }
  func.func @transform_2(%arg0: i32, %arg1: i32) -> (i32, i32) {
    %c0_i32 = arith.constant 0 : i32
    %c0_i32_0 = arith.constant 0 : i32
    %c0_i32_1 = arith.constant 0 : i32
    return %c0_i32, %c0_i32_0 : i32, i32
  }
  func.func @transform_3(%arg0: i32, %arg1: i32) -> (i32, i32) {
    %c0_i32 = arith.constant 0 : i32
    %c0_i32_0 = arith.constant 0 : i32
    %c0_i32_1 = arith.constant 0 : i32
    return %c0_i32, %c0_i32_0 : i32, i32
  }
  func.func @transform_4(%arg0: i32, %arg1: i32) -> (i32, i32) {
    %c0_i32 = arith.constant 0 : i32
    %c0_i32_0 = arith.constant 0 : i32
    %c0_i32_1 = arith.constant 0 : i32
    return %c0_i32, %c0_i32_0 : i32, i32
  }
  func.func @transform_5(%arg0: i32, %arg1: i32) -> (i32, i32) {
    %c0_i32 = arith.constant 0 : i32
    %c0_i32_0 = arith.constant 0 : i32
    return %arg0, %c0_i32 : i32, i32
  }
}

module attributes {stable_mosaic.version = 11 : i64} {
  func.func @kernel(%arg0: i32, %arg1: i32, %arg2: memref<1x256x128xbf16, #tpu.memory_space<vmem>>, %arg3: memref<1x128x128xbf16, #tpu.memory_space<vmem>>, %arg4: memref<1x128xf32, #tpu.memory_space<vmem>>, %arg5: memref<256x128xbf16, #tpu.memory_space<vmem>>, %arg6: memref<256x128xbf16, #tpu.memory_space<vmem>>, %arg7: memref<256x128xf32, #tpu.memory_space<vmem>>) attributes {dimension_semantics = [#tpu.dimension_semantics<parallel>, #tpu.dimension_semantics<arbitrary>], iteration_bounds = array<i64: 2, 9>, scalar_prefetch = 0 : i64, scratch_operands = 1 : i64, tpu.core_type = #tpu.core_type<tc>, window_params = [{transform_indices = @transform_0, window_bounds = array<i64: 1, 256, 128>}, {transform_indices = @transform_1, window_bounds = array<i64: 1, 128, 128>}, {pipeline_mode = #tpu.pipeline_mode<synchronous>, transform_indices = @transform_2, window_bounds = array<i64: 1, 128>}, {transform_indices = @transform_3, window_bounds = array<i64: 256, 128>}, {transform_indices = @transform_4, window_bounds = array<i64: 256, 128>}]} {
    %c0_i32 = arith.constant 0 : i32
    %0 = arith.cmpi eq, %arg1, %c0_i32 : i32
    %1 = arith.extui %0 : i1 to i32
    %c0_i32_0 = arith.constant 0 : i32
    %2 = arith.cmpi ne, %1, %c0_i32_0 : i32
    scf.if %2 {
      %cst_11 = arith.constant 0.000000e+00 : f32
      %14 = vector.broadcast %cst_11 : f32 to vector<256x128xf32>
      %c0_12 = arith.constant 0 : index
      %c0_13 = arith.constant 0 : index
      %15 = vector.load %arg7[%c0_12, %c0_13] : memref<256x128xf32, #tpu.memory_space<vmem>>, vector<256x128xf32>
      tpu.vector_store %arg7[%c0_12, %c0_13], %14 {strides = array<i32>} : memref<256x128xf32, #tpu.memory_space<vmem>>, vector<256x128xf32>,
    } else {
    }
    %c0 = arith.constant 0 : index
    %c0_1 = arith.constant 0 : index
    %3 = vector.load %arg7[%c0, %c0_1] : memref<256x128xf32, #tpu.memory_space<vmem>>, vector<256x128xf32>
    %c0_2 = arith.constant 0 : index
    %c0_3 = arith.constant 0 : index
    %c0_4 = arith.constant 0 : index
    %4 = vector.load %arg2[%c0_2, %c0_3, %c0_4] : memref<1x256x128xbf16, #tpu.memory_space<vmem>>, vector<1x256x128xbf16>
    %5 = vector.shape_cast %4 : vector<1x256x128xbf16> to vector<256x128xbf16>
    %c0_5 = arith.constant 0 : index
    %c0_6 = arith.constant 0 : index
    %c0_7 = arith.constant 0 : index
    %6 = vector.load %arg3[%c0_5, %c0_6, %c0_7] : memref<1x128x128xbf16, #tpu.memory_space<vmem>>, vector<1x128x128xbf16>
    %7 = vector.shape_cast %6 : vector<1x128x128xbf16> to vector<128x128xbf16>
    %cst = arith.constant dense<0.000000e+00> : vector<256x128xf32>
    %8 = tpu.matmul %5, %7, %cst {dimension_numbers = #tpu.dot_dimension_numbers<[1], [0], [0], [1], [0, 0, 1, 1], [], []>} : vector<256x128xbf16>, vector<128x128xbf16>, vector<256x128xf32> -> vector<256x128xf32>
    %9 = arith.addf %3, %8 : vector<256x128xf32>
    %c0_8 = arith.constant 0 : index
    %c0_9 = arith.constant 0 : index
    %10 = vector.load %arg7[%c0_8, %c0_9] : memref<256x128xf32, #tpu.memory_space<vmem>>, vector<256x128xf32>
    tpu.vector_store %arg7[%c0_8, %c0_9], %9 {strides = array<i32>} : memref<256x128xf32, #tpu.memory_space<vmem>>, vector<256x128xf32>,
    %c8_i32 = arith.constant 8 : i32
    %11 = arith.cmpi eq, %arg1, %c8_i32 : i32
    %12 = arith.extui %11 : i1 to i32
    %c0_i32_10 = arith.constant 0 : i32
    %13 = arith.cmpi ne, %12, %c0_i32_10 : i32
    scf.if %13 {
      %c0_11 = arith.constant 0 : index
      %c0_12 = arith.constant 0 : index
      %14 = vector.load %arg7[%c0_11, %c0_12] : memref<256x128xf32, #tpu.memory_space<vmem>>, vector<256x128xf32>
      %c0_13 = arith.constant 0 : index
      %c0_14 = arith.constant 0 : index
      %15 = vector.load %arg4[%c0_13, %c0_14] : memref<1x128xf32, #tpu.memory_space<vmem>>, vector<1x128xf32>
      %16 = vector.broadcast %15 : vector<1x128xf32> to vector<256x128xf32>
      %17 = arith.addf %14, %16 : vector<256x128xf32>
      %c0_15 = arith.constant 0 : index
      %c0_16 = arith.constant 0 : index
      %18 = vector.load %arg5[%c0_15, %c0_16] : memref<256x128xbf16, #tpu.memory_space<vmem>>, vector<256x128xbf16>
      %19 = arith.extf %18 : vector<256x128xbf16> to vector<256x128xf32>
      %20 = arith.addf %17, %19 : vector<256x128xf32>
      %21 = arith.truncf %20 : vector<256x128xf32> to vector<256x128xbf16>
      %c0_17 = arith.constant 0 : index
      %c0_18 = arith.constant 0 : index
      %22 = vector.load %arg6[%c0_17, %c0_18] : memref<256x128xbf16, #tpu.memory_space<vmem>>, vector<256x128xbf16>
      tpu.vector_store %arg6[%c0_17, %c0_18], %21 {strides = array<i32>} : memref<256x128xbf16, #tpu.memory_space<vmem>>, vector<256x128xbf16>,
    } else {
    }
    return
  }
  func.func @transform_0(%arg0: i32, %arg1: i32) -> (i32, i32, i32) {
    %c0_i32 = arith.constant 0 : i32
    %c0_i32_0 = arith.constant 0 : i32
    return %arg1, %arg0, %c0_i32 : i32, i32, i32
  }
  func.func @transform_1(%arg0: i32, %arg1: i32) -> (i32, i32, i32) {
    %c0_i32 = arith.constant 0 : i32
    %c0_i32_0 = arith.constant 0 : i32
    %c0_i32_1 = arith.constant 0 : i32
    return %arg1, %c0_i32, %c0_i32_0 : i32, i32, i32
  }
  func.func @transform_2(%arg0: i32, %arg1: i32) -> (i32, i32) {
    %c0_i32 = arith.constant 0 : i32
    %c0_i32_0 = arith.constant 0 : i32
    %c0_i32_1 = arith.constant 0 : i32
    return %c0_i32, %c0_i32_0 : i32, i32
  }
  func.func @transform_3(%arg0: i32, %arg1: i32) -> (i32, i32) {
    %c0_i32 = arith.constant 0 : i32
    %c0_i32_0 = arith.constant 0 : i32
    return %arg0, %c0_i32 : i32, i32
  }
  func.func @transform_4(%arg0: i32, %arg1: i32) -> (i32, i32) {
    %c0_i32 = arith.constant 0 : i32
    %c0_i32_0 = arith.constant 0 : i32
    return %arg0, %c0_i32 : i32, i32
  }
}

module attributes {stable_mosaic.version = 11 : i64} {
  func.func @kernel(%arg0: i32, %arg1: i32, %arg2: memref<1x128x128xbf16, #tpu.memory_space<vmem>>, %arg3: memref<1x128x128xbf16, #tpu.memory_space<vmem>>, %arg4: memref<1x128xf32, #tpu.memory_space<vmem>>, %arg5: memref<128x128xbf16, #tpu.memory_space<vmem>>, %arg6: memref<128x128xf32, #tpu.memory_space<vmem>>) attributes {dimension_semantics = [#tpu.dimension_semantics<parallel>, #tpu.dimension_semantics<arbitrary>], iteration_bounds = array<i64: 1, 1>, scalar_prefetch = 0 : i64, scratch_operands = 1 : i64, tpu.core_type = #tpu.core_type<tc>, window_params = [{transform_indices = @transform_0, window_bounds = array<i64: 1, 128, 128>}, {transform_indices = @transform_1, window_bounds = array<i64: 1, 128, 128>}, {pipeline_mode = #tpu.pipeline_mode<synchronous>, transform_indices = @transform_2, window_bounds = array<i64: 1, 128>}, {transform_indices = @transform_3, window_bounds = array<i64: 128, 128>}]} {
    %c0_i32 = arith.constant 0 : i32
    %0 = arith.cmpi eq, %arg1, %c0_i32 : i32
    %1 = arith.extui %0 : i1 to i32
    %c0_i32_0 = arith.constant 0 : i32
    %2 = arith.cmpi ne, %1, %c0_i32_0 : i32
    scf.if %2 {
      %cst_12 = arith.constant 0.000000e+00 : f32
      %14 = vector.broadcast %cst_12 : f32 to vector<128x128xf32>
      %c0_13 = arith.constant 0 : index
      %c0_14 = arith.constant 0 : index
      %15 = vector.load %arg6[%c0_13, %c0_14] : memref<128x128xf32, #tpu.memory_space<vmem>>, vector<128x128xf32>
      tpu.vector_store %arg6[%c0_13, %c0_14], %14 {strides = array<i32>} : memref<128x128xf32, #tpu.memory_space<vmem>>, vector<128x128xf32>,
    } else {
    }
    %c0 = arith.constant 0 : index
    %c0_1 = arith.constant 0 : index
    %3 = vector.load %arg6[%c0, %c0_1] : memref<128x128xf32, #tpu.memory_space<vmem>>, vector<128x128xf32>
    %c0_2 = arith.constant 0 : index
    %c0_3 = arith.constant 0 : index
    %c0_4 = arith.constant 0 : index
    %4 = vector.load %arg2[%c0_2, %c0_3, %c0_4] : memref<1x128x128xbf16, #tpu.memory_space<vmem>>, vector<1x128x128xbf16>
    %5 = vector.shape_cast %4 : vector<1x128x128xbf16> to vector<128x128xbf16>
    %c0_5 = arith.constant 0 : index
    %c0_6 = arith.constant 0 : index
    %c0_7 = arith.constant 0 : index
    %6 = vector.load %arg3[%c0_5, %c0_6, %c0_7] : memref<1x128x128xbf16, #tpu.memory_space<vmem>>, vector<1x128x128xbf16>
    %7 = vector.shape_cast %6 : vector<1x128x128xbf16> to vector<128x128xbf16>
    %cst = arith.constant dense<0.000000e+00> : vector<128x128xf32>
    %8 = tpu.matmul %5, %7, %cst {dimension_numbers = #tpu.dot_dimension_numbers<[1], [0], [0], [1], [0, 0, 1, 1], [], []>} : vector<128x128xbf16>, vector<128x128xbf16>, vector<128x128xf32> -> vector<128x128xf32>
    %9 = arith.addf %3, %8 : vector<128x128xf32>
    %c0_8 = arith.constant 0 : index
    %c0_9 = arith.constant 0 : index
    %10 = vector.load %arg6[%c0_8, %c0_9] : memref<128x128xf32, #tpu.memory_space<vmem>>, vector<128x128xf32>
    tpu.vector_store %arg6[%c0_8, %c0_9], %9 {strides = array<i32>} : memref<128x128xf32, #tpu.memory_space<vmem>>, vector<128x128xf32>,
    %c0_i32_10 = arith.constant 0 : i32
    %11 = arith.cmpi eq, %arg1, %c0_i32_10 : i32
    %12 = arith.extui %11 : i1 to i32
    %c0_i32_11 = arith.constant 0 : i32
    %13 = arith.cmpi ne, %12, %c0_i32_11 : i32
    scf.if %13 {
      %c0_12 = arith.constant 0 : index
      %c0_13 = arith.constant 0 : index
      %14 = vector.load %arg6[%c0_12, %c0_13] : memref<128x128xf32, #tpu.memory_space<vmem>>, vector<128x128xf32>
      %c0_14 = arith.constant 0 : index
      %c0_15 = arith.constant 0 : index
      %15 = vector.load %arg4[%c0_14, %c0_15] : memref<1x128xf32, #tpu.memory_space<vmem>>, vector<1x128xf32>
      %16 = vector.broadcast %15 : vector<1x128xf32> to vector<128x128xf32>
      %17 = arith.addf %14, %16 : vector<128x128xf32>
      %18 = arith.truncf %17 : vector<128x128xf32> to vector<128x128xbf16>
      %c0_16 = arith.constant 0 : index
      %c0_17 = arith.constant 0 : index
      %19 = vector.load %arg5[%c0_16, %c0_17] : memref<128x128xbf16, #tpu.memory_space<vmem>>, vector<128x128xbf16>
      tpu.vector_store %arg5[%c0_16, %c0_17], %18 {strides = array<i32>} : memref<128x128xbf16, #tpu.memory_space<vmem>>, vector<128x128xbf16>,
    } else {
    }
    return
  }
  func.func @transform_0(%arg0: i32, %arg1: i32) -> (i32, i32, i32) {
    %c0_i32 = arith.constant 0 : i32
    %c0_i32_0 = arith.constant 0 : i32
    return %arg1, %arg0, %c0_i32 : i32, i32, i32
  }
  func.func @transform_1(%arg0: i32, %arg1: i32) -> (i32, i32, i32) {
    %c0_i32 = arith.constant 0 : i32
    %c0_i32_0 = arith.constant 0 : i32
    %c0_i32_1 = arith.constant 0 : i32
    return %arg1, %c0_i32, %c0_i32_0 : i32, i32, i32
  }
  func.func @transform_2(%arg0: i32, %arg1: i32) -> (i32, i32) {
    %c0_i32 = arith.constant 0 : i32
    %c0_i32_0 = arith.constant 0 : i32
    %c0_i32_1 = arith.constant 0 : i32
    return %c0_i32, %c0_i32_0 : i32, i32
  }
  func.func @transform_3(%arg0: i32, %arg1: i32) -> (i32, i32) {
    %c0_i32 = arith.constant 0 : i32
    %c0_i32_0 = arith.constant 0 : i32
    return %arg0, %c0_i32 : i32, i32
  }
}

module attributes {stable_mosaic.version = 11 : i64} {
  func.func @kernel(%arg0: i32, %arg1: i32, %arg2: memref<1x128x128xbf16, #tpu.memory_space<vmem>>, %arg3: memref<1x128x128xbf16, #tpu.memory_space<vmem>>, %arg4: memref<1x128xf32, #tpu.memory_space<vmem>>, %arg5: memref<1x128xf32, #tpu.memory_space<vmem>>, %arg6: memref<1x128xf32, #tpu.memory_space<vmem>>, %arg7: memref<128x128xbf16, #tpu.memory_space<vmem>>, %arg8: memref<128x128xf32, #tpu.memory_space<vmem>>) attributes {dimension_semantics = [#tpu.dimension_semantics<parallel>, #tpu.dimension_semantics<arbitrary>], iteration_bounds = array<i64: 1, 9>, scalar_prefetch = 0 : i64, scratch_operands = 1 : i64, tpu.core_type = #tpu.core_type<tc>, window_params = [{transform_indices = @transform_0, window_bounds = array<i64: 1, 128, 128>}, {transform_indices = @transform_1, window_bounds = array<i64: 1, 128, 128>}, {pipeline_mode = #tpu.pipeline_mode<synchronous>, transform_indices = @transform_2, window_bounds = array<i64: 1, 128>}, {pipeline_mode = #tpu.pipeline_mode<synchronous>, transform_indices = @transform_3, window_bounds = array<i64: 1, 128>}, {pipeline_mode = #tpu.pipeline_mode<synchronous>, transform_indices = @transform_4, window_bounds = array<i64: 1, 128>}, {transform_indices = @transform_5, window_bounds = array<i64: 128, 128>}]} {
    %c0_i32 = arith.constant 0 : i32
    %0 = arith.cmpi eq, %arg1, %c0_i32 : i32
    %1 = arith.extui %0 : i1 to i32
    %c0_i32_0 = arith.constant 0 : i32
    %2 = arith.cmpi ne, %1, %c0_i32_0 : i32
    scf.if %2 {
      %cst_11 = arith.constant 0.000000e+00 : f32
      %14 = vector.broadcast %cst_11 : f32 to vector<128x128xf32>
      %c0_12 = arith.constant 0 : index
      %c0_13 = arith.constant 0 : index
      %15 = vector.load %arg8[%c0_12, %c0_13] : memref<128x128xf32, #tpu.memory_space<vmem>>, vector<128x128xf32>
      tpu.vector_store %arg8[%c0_12, %c0_13], %14 {strides = array<i32>} : memref<128x128xf32, #tpu.memory_space<vmem>>, vector<128x128xf32>,
    } else {
    }
    %c0 = arith.constant 0 : index
    %c0_1 = arith.constant 0 : index
    %3 = vector.load %arg8[%c0, %c0_1] : memref<128x128xf32, #tpu.memory_space<vmem>>, vector<128x128xf32>
    %c0_2 = arith.constant 0 : index
    %c0_3 = arith.constant 0 : index
    %c0_4 = arith.constant 0 : index
    %4 = vector.load %arg2[%c0_2, %c0_3, %c0_4] : memref<1x128x128xbf16, #tpu.memory_space<vmem>>, vector<1x128x128xbf16>
    %5 = vector.shape_cast %4 : vector<1x128x128xbf16> to vector<128x128xbf16>
    %c0_5 = arith.constant 0 : index
    %c0_6 = arith.constant 0 : index
    %c0_7 = arith.constant 0 : index
    %6 = vector.load %arg3[%c0_5, %c0_6, %c0_7] : memref<1x128x128xbf16, #tpu.memory_space<vmem>>, vector<1x128x128xbf16>
    %7 = vector.shape_cast %6 : vector<1x128x128xbf16> to vector<128x128xbf16>
    %cst = arith.constant dense<0.000000e+00> : vector<128x128xf32>
    %8 = tpu.matmul %5, %7, %cst {dimension_numbers = #tpu.dot_dimension_numbers<[1], [0], [0], [1], [0, 0, 1, 1], [], []>} : vector<128x128xbf16>, vector<128x128xbf16>, vector<128x128xf32> -> vector<128x128xf32>
    %9 = arith.addf %3, %8 : vector<128x128xf32>
    %c0_8 = arith.constant 0 : index
    %c0_9 = arith.constant 0 : index
    %10 = vector.load %arg8[%c0_8, %c0_9] : memref<128x128xf32, #tpu.memory_space<vmem>>, vector<128x128xf32>
    tpu.vector_store %arg8[%c0_8, %c0_9], %9 {strides = array<i32>} : memref<128x128xf32, #tpu.memory_space<vmem>>, vector<128x128xf32>,
    %c8_i32 = arith.constant 8 : i32
    %11 = arith.cmpi eq, %arg1, %c8_i32 : i32
    %12 = arith.extui %11 : i1 to i32
    %c0_i32_10 = arith.constant 0 : i32
    %13 = arith.cmpi ne, %12, %c0_i32_10 : i32
    scf.if %13 {
      %c0_11 = arith.constant 0 : index
      %c0_12 = arith.constant 0 : index
      %14 = vector.load %arg8[%c0_11, %c0_12] : memref<128x128xf32, #tpu.memory_space<vmem>>, vector<128x128xf32>
      %c0_13 = arith.constant 0 : index
      %c0_14 = arith.constant 0 : index
      %15 = vector.load %arg4[%c0_13, %c0_14] : memref<1x128xf32, #tpu.memory_space<vmem>>, vector<1x128xf32>
      %16 = vector.broadcast %15 : vector<1x128xf32> to vector<128x128xf32>
      %17 = arith.addf %14, %16 : vector<128x128xf32>
      %c0_15 = arith.constant 0 : index
      %c0_16 = arith.constant 0 : index
      %18 = vector.load %arg5[%c0_15, %c0_16] : memref<1x128xf32, #tpu.memory_space<vmem>>, vector<1x128xf32>
      %19 = vector.broadcast %18 : vector<1x128xf32> to vector<128x128xf32>
      %20 = arith.mulf %17, %19 : vector<128x128xf32>
      %c0_17 = arith.constant 0 : index
      %c0_18 = arith.constant 0 : index
      %21 = vector.load %arg6[%c0_17, %c0_18] : memref<1x128xf32, #tpu.memory_space<vmem>>, vector<1x128xf32>
      %22 = vector.broadcast %21 : vector<1x128xf32> to vector<128x128xf32>
      %23 = arith.addf %20, %22 : vector<128x128xf32>
      %cst_19 = arith.constant 0.000000e+00 : f32
      %24 = vector.broadcast %cst_19 : f32 to vector<128x128xf32>
      %25 = arith.maximumf %23, %24 : vector<128x128xf32>
      %26 = arith.truncf %25 : vector<128x128xf32> to vector<128x128xbf16>
      %c0_20 = arith.constant 0 : index
      %c0_21 = arith.constant 0 : index
      %27 = vector.load %arg7[%c0_20, %c0_21] : memref<128x128xbf16, #tpu.memory_space<vmem>>, vector<128x128xbf16>
      tpu.vector_store %arg7[%c0_20, %c0_21], %26 {strides = array<i32>} : memref<128x128xbf16, #tpu.memory_space<vmem>>, vector<128x128xbf16>,
    } else {
    }
    return
  }
  func.func @transform_0(%arg0: i32, %arg1: i32) -> (i32, i32, i32) {
    %c0_i32 = arith.constant 0 : i32
    %c0_i32_0 = arith.constant 0 : i32
    return %arg1, %arg0, %c0_i32 : i32, i32, i32
  }
  func.func @transform_1(%arg0: i32, %arg1: i32) -> (i32, i32, i32) {
    %c0_i32 = arith.constant 0 : i32
    %c0_i32_0 = arith.constant 0 : i32
    %c0_i32_1 = arith.constant 0 : i32
    return %arg1, %c0_i32, %c0_i32_0 : i32, i32, i32
  }
  func.func @transform_2(%arg0: i32, %arg1: i32) -> (i32, i32) {
    %c0_i32 = arith.constant 0 : i32
    %c0_i32_0 = arith.constant 0 : i32
    %c0_i32_1 = arith.constant 0 : i32
    return %c0_i32, %c0_i32_0 : i32, i32
  }
  func.func @transform_3(%arg0: i32, %arg1: i32) -> (i32, i32) {
    %c0_i32 = arith.constant 0 : i32
    %c0_i32_0 = arith.constant 0 : i32
    %c0_i32_1 = arith.constant 0 : i32
    return %c0_i32, %c0_i32_0 : i32, i32
  }
  func.func @transform_4(%arg0: i32, %arg1: i32) -> (i32, i32) {
    %c0_i32 = arith.constant 0 : i32
    %c0_i32_0 = arith.constant 0 : i32
    %c0_i32_1 = arith.constant 0 : i32
    return %c0_i32, %c0_i32_0 : i32, i32
  }
  func.func @transform_5(%arg0: i32, %arg1: i32) -> (i32, i32) {
    %c0_i32 = arith.constant 0 : i32
    %c0_i32_0 = arith.constant 0 : i32
    return %arg0, %c0_i32 : i32, i32
  }
}

module attributes {stable_mosaic.version = 11 : i64} {
  func.func @kernel(%arg0: i32, %arg1: i32, %arg2: memref<1x128x128xbf16, #tpu.memory_space<vmem>>, %arg3: memref<1x128x128xbf16, #tpu.memory_space<vmem>>, %arg4: memref<1x128xf32, #tpu.memory_space<vmem>>, %arg5: memref<128x128xbf16, #tpu.memory_space<vmem>>, %arg6: memref<128x128xbf16, #tpu.memory_space<vmem>>, %arg7: memref<128x128xf32, #tpu.memory_space<vmem>>) attributes {dimension_semantics = [#tpu.dimension_semantics<parallel>, #tpu.dimension_semantics<arbitrary>], iteration_bounds = array<i64: 1, 9>, scalar_prefetch = 0 : i64, scratch_operands = 1 : i64, tpu.core_type = #tpu.core_type<tc>, window_params = [{transform_indices = @transform_0, window_bounds = array<i64: 1, 128, 128>}, {transform_indices = @transform_1, window_bounds = array<i64: 1, 128, 128>}, {pipeline_mode = #tpu.pipeline_mode<synchronous>, transform_indices = @transform_2, window_bounds = array<i64: 1, 128>}, {transform_indices = @transform_3, window_bounds = array<i64: 128, 128>}, {transform_indices = @transform_4, window_bounds = array<i64: 128, 128>}]} {
    %c0_i32 = arith.constant 0 : i32
    %0 = arith.cmpi eq, %arg1, %c0_i32 : i32
    %1 = arith.extui %0 : i1 to i32
    %c0_i32_0 = arith.constant 0 : i32
    %2 = arith.cmpi ne, %1, %c0_i32_0 : i32
    scf.if %2 {
      %cst_11 = arith.constant 0.000000e+00 : f32
      %14 = vector.broadcast %cst_11 : f32 to vector<128x128xf32>
      %c0_12 = arith.constant 0 : index
      %c0_13 = arith.constant 0 : index
      %15 = vector.load %arg7[%c0_12, %c0_13] : memref<128x128xf32, #tpu.memory_space<vmem>>, vector<128x128xf32>
      tpu.vector_store %arg7[%c0_12, %c0_13], %14 {strides = array<i32>} : memref<128x128xf32, #tpu.memory_space<vmem>>, vector<128x128xf32>,
    } else {
    }
    %c0 = arith.constant 0 : index
    %c0_1 = arith.constant 0 : index
    %3 = vector.load %arg7[%c0, %c0_1] : memref<128x128xf32, #tpu.memory_space<vmem>>, vector<128x128xf32>
    %c0_2 = arith.constant 0 : index
    %c0_3 = arith.constant 0 : index
    %c0_4 = arith.constant 0 : index
    %4 = vector.load %arg2[%c0_2, %c0_3, %c0_4] : memref<1x128x128xbf16, #tpu.memory_space<vmem>>, vector<1x128x128xbf16>
    %5 = vector.shape_cast %4 : vector<1x128x128xbf16> to vector<128x128xbf16>
    %c0_5 = arith.constant 0 : index
    %c0_6 = arith.constant 0 : index
    %c0_7 = arith.constant 0 : index
    %6 = vector.load %arg3[%c0_5, %c0_6, %c0_7] : memref<1x128x128xbf16, #tpu.memory_space<vmem>>, vector<1x128x128xbf16>
    %7 = vector.shape_cast %6 : vector<1x128x128xbf16> to vector<128x128xbf16>
    %cst = arith.constant dense<0.000000e+00> : vector<128x128xf32>
    %8 = tpu.matmul %5, %7, %cst {dimension_numbers = #tpu.dot_dimension_numbers<[1], [0], [0], [1], [0, 0, 1, 1], [], []>} : vector<128x128xbf16>, vector<128x128xbf16>, vector<128x128xf32> -> vector<128x128xf32>
    %9 = arith.addf %3, %8 : vector<128x128xf32>
    %c0_8 = arith.constant 0 : index
    %c0_9 = arith.constant 0 : index
    %10 = vector.load %arg7[%c0_8, %c0_9] : memref<128x128xf32, #tpu.memory_space<vmem>>, vector<128x128xf32>
    tpu.vector_store %arg7[%c0_8, %c0_9], %9 {strides = array<i32>} : memref<128x128xf32, #tpu.memory_space<vmem>>, vector<128x128xf32>,
    %c8_i32 = arith.constant 8 : i32
    %11 = arith.cmpi eq, %arg1, %c8_i32 : i32
    %12 = arith.extui %11 : i1 to i32
    %c0_i32_10 = arith.constant 0 : i32
    %13 = arith.cmpi ne, %12, %c0_i32_10 : i32
    scf.if %13 {
      %c0_11 = arith.constant 0 : index
      %c0_12 = arith.constant 0 : index
      %14 = vector.load %arg7[%c0_11, %c0_12] : memref<128x128xf32, #tpu.memory_space<vmem>>, vector<128x128xf32>
      %c0_13 = arith.constant 0 : index
      %c0_14 = arith.constant 0 : index
      %15 = vector.load %arg4[%c0_13, %c0_14] : memref<1x128xf32, #tpu.memory_space<vmem>>, vector<1x128xf32>
      %16 = vector.broadcast %15 : vector<1x128xf32> to vector<128x128xf32>
      %17 = arith.addf %14, %16 : vector<128x128xf32>
      %c0_15 = arith.constant 0 : index
      %c0_16 = arith.constant 0 : index
      %18 = vector.load %arg5[%c0_15, %c0_16] : memref<128x128xbf16, #tpu.memory_space<vmem>>, vector<128x128xbf16>
      %19 = arith.extf %18 : vector<128x128xbf16> to vector<128x128xf32>
      %20 = arith.addf %17, %19 : vector<128x128xf32>
      %21 = arith.truncf %20 : vector<128x128xf32> to vector<128x128xbf16>
      %c0_17 = arith.constant 0 : index
      %c0_18 = arith.constant 0 : index
      %22 = vector.load %arg6[%c0_17, %c0_18] : memref<128x128xbf16, #tpu.memory_space<vmem>>, vector<128x128xbf16>
      tpu.vector_store %arg6[%c0_17, %c0_18], %21 {strides = array<i32>} : memref<128x128xbf16, #tpu.memory_space<vmem>>, vector<128x128xbf16>,
    } else {
    }
    return
  }
  func.func @transform_0(%arg0: i32, %arg1: i32) -> (i32, i32, i32) {
    %c0_i32 = arith.constant 0 : i32
    %c0_i32_0 = arith.constant 0 : i32
    return %arg1, %arg0, %c0_i32 : i32, i32, i32
  }
  func.func @transform_1(%arg0: i32, %arg1: i32) -> (i32, i32, i32) {
    %c0_i32 = arith.constant 0 : i32
    %c0_i32_0 = arith.constant 0 : i32
    %c0_i32_1 = arith.constant 0 : i32
    return %arg1, %c0_i32, %c0_i32_0 : i32, i32, i32
  }
  func.func @transform_2(%arg0: i32, %arg1: i32) -> (i32, i32) {
    %c0_i32 = arith.constant 0 : i32
    %c0_i32_0 = arith.constant 0 : i32
    %c0_i32_1 = arith.constant 0 : i32
    return %c0_i32, %c0_i32_0 : i32, i32
  }
  func.func @transform_3(%arg0: i32, %arg1: i32) -> (i32, i32) {
    %c0_i32 = arith.constant 0 : i32
    %c0_i32_0 = arith.constant 0 : i32
    return %arg0, %c0_i32 : i32, i32
  }
  func.func @transform_4(%arg0: i32, %arg1: i32) -> (i32, i32) {
    %c0_i32 = arith.constant 0 : i32
    %c0_i32_0 = arith.constant 0 : i32
    return %arg0, %c0_i32 : i32, i32
  }
}

module attributes {stable_mosaic.version = 11 : i64} {
  func.func @kernel(%arg0: i32, %arg1: i32, %arg2: memref<1x32x128xbf16, #tpu.memory_space<vmem>>, %arg3: memref<1x128x128xbf16, #tpu.memory_space<vmem>>, %arg4: memref<1x128xf32, #tpu.memory_space<vmem>>, %arg5: memref<32x128xbf16, #tpu.memory_space<vmem>>, %arg6: memref<32x128xf32, #tpu.memory_space<vmem>>) attributes {dimension_semantics = [#tpu.dimension_semantics<parallel>, #tpu.dimension_semantics<arbitrary>], iteration_bounds = array<i64: 1, 1>, scalar_prefetch = 0 : i64, scratch_operands = 1 : i64, tpu.core_type = #tpu.core_type<tc>, window_params = [{transform_indices = @transform_0, window_bounds = array<i64: 1, 32, 128>}, {transform_indices = @transform_1, window_bounds = array<i64: 1, 128, 128>}, {pipeline_mode = #tpu.pipeline_mode<synchronous>, transform_indices = @transform_2, window_bounds = array<i64: 1, 128>}, {transform_indices = @transform_3, window_bounds = array<i64: 32, 128>}]} {
    %c0_i32 = arith.constant 0 : i32
    %0 = arith.cmpi eq, %arg1, %c0_i32 : i32
    %1 = arith.extui %0 : i1 to i32
    %c0_i32_0 = arith.constant 0 : i32
    %2 = arith.cmpi ne, %1, %c0_i32_0 : i32
    scf.if %2 {
      %cst_12 = arith.constant 0.000000e+00 : f32
      %14 = vector.broadcast %cst_12 : f32 to vector<32x128xf32>
      %c0_13 = arith.constant 0 : index
      %c0_14 = arith.constant 0 : index
      %15 = vector.load %arg6[%c0_13, %c0_14] : memref<32x128xf32, #tpu.memory_space<vmem>>, vector<32x128xf32>
      tpu.vector_store %arg6[%c0_13, %c0_14], %14 {strides = array<i32>} : memref<32x128xf32, #tpu.memory_space<vmem>>, vector<32x128xf32>,
    } else {
    }
    %c0 = arith.constant 0 : index
    %c0_1 = arith.constant 0 : index
    %3 = vector.load %arg6[%c0, %c0_1] : memref<32x128xf32, #tpu.memory_space<vmem>>, vector<32x128xf32>
    %c0_2 = arith.constant 0 : index
    %c0_3 = arith.constant 0 : index
    %c0_4 = arith.constant 0 : index
    %4 = vector.load %arg2[%c0_2, %c0_3, %c0_4] : memref<1x32x128xbf16, #tpu.memory_space<vmem>>, vector<1x32x128xbf16>
    %5 = vector.shape_cast %4 : vector<1x32x128xbf16> to vector<32x128xbf16>
    %c0_5 = arith.constant 0 : index
    %c0_6 = arith.constant 0 : index
    %c0_7 = arith.constant 0 : index
    %6 = vector.load %arg3[%c0_5, %c0_6, %c0_7] : memref<1x128x128xbf16, #tpu.memory_space<vmem>>, vector<1x128x128xbf16>
    %7 = vector.shape_cast %6 : vector<1x128x128xbf16> to vector<128x128xbf16>
    %cst = arith.constant dense<0.000000e+00> : vector<32x128xf32>
    %8 = tpu.matmul %5, %7, %cst {dimension_numbers = #tpu.dot_dimension_numbers<[1], [0], [0], [1], [0, 0, 1, 1], [], []>} : vector<32x128xbf16>, vector<128x128xbf16>, vector<32x128xf32> -> vector<32x128xf32>
    %9 = arith.addf %3, %8 : vector<32x128xf32>
    %c0_8 = arith.constant 0 : index
    %c0_9 = arith.constant 0 : index
    %10 = vector.load %arg6[%c0_8, %c0_9] : memref<32x128xf32, #tpu.memory_space<vmem>>, vector<32x128xf32>
    tpu.vector_store %arg6[%c0_8, %c0_9], %9 {strides = array<i32>} : memref<32x128xf32, #tpu.memory_space<vmem>>, vector<32x128xf32>,
    %c0_i32_10 = arith.constant 0 : i32
    %11 = arith.cmpi eq, %arg1, %c0_i32_10 : i32
    %12 = arith.extui %11 : i1 to i32
    %c0_i32_11 = arith.constant 0 : i32
    %13 = arith.cmpi ne, %12, %c0_i32_11 : i32
    scf.if %13 {
      %c0_12 = arith.constant 0 : index
      %c0_13 = arith.constant 0 : index
      %14 = vector.load %arg6[%c0_12, %c0_13] : memref<32x128xf32, #tpu.memory_space<vmem>>, vector<32x128xf32>
      %c0_14 = arith.constant 0 : index
      %c0_15 = arith.constant 0 : index
      %15 = vector.load %arg4[%c0_14, %c0_15] : memref<1x128xf32, #tpu.memory_space<vmem>>, vector<1x128xf32>
      %16 = vector.broadcast %15 : vector<1x128xf32> to vector<32x128xf32>
      %17 = arith.addf %14, %16 : vector<32x128xf32>
      %18 = arith.truncf %17 : vector<32x128xf32> to vector<32x128xbf16>
      %c0_16 = arith.constant 0 : index
      %c0_17 = arith.constant 0 : index
      %19 = vector.load %arg5[%c0_16, %c0_17] : memref<32x128xbf16, #tpu.memory_space<vmem>>, vector<32x128xbf16>
      tpu.vector_store %arg5[%c0_16, %c0_17], %18 {strides = array<i32>} : memref<32x128xbf16, #tpu.memory_space<vmem>>, vector<32x128xbf16>,
    } else {
    }
    return
  }
  func.func @transform_0(%arg0: i32, %arg1: i32) -> (i32, i32, i32) {
    %c0_i32 = arith.constant 0 : i32
    %c0_i32_0 = arith.constant 0 : i32
    return %arg1, %arg0, %c0_i32 : i32, i32, i32
  }
  func.func @transform_1(%arg0: i32, %arg1: i32) -> (i32, i32, i32) {
    %c0_i32 = arith.constant 0 : i32
    %c0_i32_0 = arith.constant 0 : i32
    %c0_i32_1 = arith.constant 0 : i32
    return %arg1, %c0_i32, %c0_i32_0 : i32, i32, i32
  }
  func.func @transform_2(%arg0: i32, %arg1: i32) -> (i32, i32) {
    %c0_i32 = arith.constant 0 : i32
    %c0_i32_0 = arith.constant 0 : i32
    %c0_i32_1 = arith.constant 0 : i32
    return %c0_i32, %c0_i32_0 : i32, i32
  }
  func.func @transform_3(%arg0: i32, %arg1: i32) -> (i32, i32) {
    %c0_i32 = arith.constant 0 : i32
    %c0_i32_0 = arith.constant 0 : i32
    return %arg0, %c0_i32 : i32, i32
  }
}

module attributes {stable_mosaic.version = 11 : i64} {
  func.func @_bn_relu_kernel(%arg0: i32, %arg1: memref<128x128xbf16, #tpu.memory_space<vmem>>, %arg2: memref<1x128xf32, #tpu.memory_space<vmem>>, %arg3: memref<1x128xf32, #tpu.memory_space<vmem>>, %arg4: memref<128x128xbf16, #tpu.memory_space<vmem>>) attributes {dimension_semantics = [#tpu.dimension_semantics<parallel>], iteration_bounds = array<i64: 1>, scalar_prefetch = 0 : i64, scratch_operands = 0 : i64, tpu.core_type = #tpu.core_type<tc>, window_params = [{transform_indices = @transform_0, window_bounds = array<i64: 128, 128>}, {pipeline_mode = #tpu.pipeline_mode<synchronous>, transform_indices = @transform_1, window_bounds = array<i64: 1, 128>}, {pipeline_mode = #tpu.pipeline_mode<synchronous>, transform_indices = @transform_2, window_bounds = array<i64: 1, 128>}, {transform_indices = @transform_3, window_bounds = array<i64: 128, 128>}]} {
    %c0 = arith.constant 0 : index
    %c0_0 = arith.constant 0 : index
    %0 = vector.load %arg1[%c0, %c0_0] : memref<128x128xbf16, #tpu.memory_space<vmem>>, vector<128x128xbf16>
    %1 = arith.extf %0 : vector<128x128xbf16> to vector<128x128xf32>
    %c0_1 = arith.constant 0 : index
    %c0_2 = arith.constant 0 : index
    %2 = vector.load %arg2[%c0_1, %c0_2] : memref<1x128xf32, #tpu.memory_space<vmem>>, vector<1x128xf32>
    %3 = vector.broadcast %2 : vector<1x128xf32> to vector<128x128xf32>
    %4 = arith.mulf %1, %3 : vector<128x128xf32>
    %c0_3 = arith.constant 0 : index
    %c0_4 = arith.constant 0 : index
    %5 = vector.load %arg3[%c0_3, %c0_4] : memref<1x128xf32, #tpu.memory_space<vmem>>, vector<1x128xf32>
    %6 = vector.broadcast %5 : vector<1x128xf32> to vector<128x128xf32>
    %7 = arith.addf %4, %6 : vector<128x128xf32>
    %cst = arith.constant 0.000000e+00 : f32
    %8 = vector.broadcast %cst : f32 to vector<128x128xf32>
    %9 = arith.maximumf %7, %8 : vector<128x128xf32>
    %10 = arith.truncf %9 : vector<128x128xf32> to vector<128x128xbf16>
    %c0_5 = arith.constant 0 : index
    %c0_6 = arith.constant 0 : index
    %11 = vector.load %arg4[%c0_5, %c0_6] : memref<128x128xbf16, #tpu.memory_space<vmem>>, vector<128x128xbf16>
    tpu.vector_store %arg4[%c0_5, %c0_6], %10 {strides = array<i32>} : memref<128x128xbf16, #tpu.memory_space<vmem>>, vector<128x128xbf16>,
    return
  }
  func.func @transform_0(%arg0: i32) -> (i32, i32) {
    %c0_i32 = arith.constant 0 : i32
    %c0_i32_0 = arith.constant 0 : i32
    return %arg0, %c0_i32 : i32, i32
  }
  func.func @transform_1(%arg0: i32) -> (i32, i32) {
    %c0_i32 = arith.constant 0 : i32
    %c0_i32_0 = arith.constant 0 : i32
    %c0_i32_1 = arith.constant 0 : i32
    return %c0_i32, %c0_i32_0 : i32, i32
  }
  func.func @transform_2(%arg0: i32) -> (i32, i32) {
    %c0_i32 = arith.constant 0 : i32
    %c0_i32_0 = arith.constant 0 : i32
    %c0_i32_1 = arith.constant 0 : i32
    return %c0_i32, %c0_i32_0 : i32, i32
  }
  func.func @transform_3(%arg0: i32) -> (i32, i32) {
    %c0_i32 = arith.constant 0 : i32
    %c0_i32_0 = arith.constant 0 : i32
    return %arg0, %c0_i32 : i32, i32
  }
}

module attributes {stable_mosaic.version = 11 : i64} {
  func.func @kernel(%arg0: i32, %arg1: i32, %arg2: memref<1x32x128xbf16, #tpu.memory_space<vmem>>, %arg3: memref<1x128x128xbf16, #tpu.memory_space<vmem>>, %arg4: memref<1x128xf32, #tpu.memory_space<vmem>>, %arg5: memref<1x128xf32, #tpu.memory_space<vmem>>, %arg6: memref<1x128xf32, #tpu.memory_space<vmem>>, %arg7: memref<32x128xbf16, #tpu.memory_space<vmem>>, %arg8: memref<32x128xf32, #tpu.memory_space<vmem>>) attributes {dimension_semantics = [#tpu.dimension_semantics<parallel>, #tpu.dimension_semantics<arbitrary>], iteration_bounds = array<i64: 1, 9>, scalar_prefetch = 0 : i64, scratch_operands = 1 : i64, tpu.core_type = #tpu.core_type<tc>, window_params = [{transform_indices = @transform_0, window_bounds = array<i64: 1, 32, 128>}, {transform_indices = @transform_1, window_bounds = array<i64: 1, 128, 128>}, {pipeline_mode = #tpu.pipeline_mode<synchronous>, transform_indices = @transform_2, window_bounds = array<i64: 1, 128>}, {pipeline_mode = #tpu.pipeline_mode<synchronous>, transform_indices = @transform_3, window_bounds = array<i64: 1, 128>}, {pipeline_mode = #tpu.pipeline_mode<synchronous>, transform_indices = @transform_4, window_bounds = array<i64: 1, 128>}, {transform_indices = @transform_5, window_bounds = array<i64: 32, 128>}]} {
    %c0_i32 = arith.constant 0 : i32
    %0 = arith.cmpi eq, %arg1, %c0_i32 : i32
    %1 = arith.extui %0 : i1 to i32
    %c0_i32_0 = arith.constant 0 : i32
    %2 = arith.cmpi ne, %1, %c0_i32_0 : i32
    scf.if %2 {
      %cst_11 = arith.constant 0.000000e+00 : f32
      %14 = vector.broadcast %cst_11 : f32 to vector<32x128xf32>
      %c0_12 = arith.constant 0 : index
      %c0_13 = arith.constant 0 : index
      %15 = vector.load %arg8[%c0_12, %c0_13] : memref<32x128xf32, #tpu.memory_space<vmem>>, vector<32x128xf32>
      tpu.vector_store %arg8[%c0_12, %c0_13], %14 {strides = array<i32>} : memref<32x128xf32, #tpu.memory_space<vmem>>, vector<32x128xf32>,
    } else {
    }
    %c0 = arith.constant 0 : index
    %c0_1 = arith.constant 0 : index
    %3 = vector.load %arg8[%c0, %c0_1] : memref<32x128xf32, #tpu.memory_space<vmem>>, vector<32x128xf32>
    %c0_2 = arith.constant 0 : index
    %c0_3 = arith.constant 0 : index
    %c0_4 = arith.constant 0 : index
    %4 = vector.load %arg2[%c0_2, %c0_3, %c0_4] : memref<1x32x128xbf16, #tpu.memory_space<vmem>>, vector<1x32x128xbf16>
    %5 = vector.shape_cast %4 : vector<1x32x128xbf16> to vector<32x128xbf16>
    %c0_5 = arith.constant 0 : index
    %c0_6 = arith.constant 0 : index
    %c0_7 = arith.constant 0 : index
    %6 = vector.load %arg3[%c0_5, %c0_6, %c0_7] : memref<1x128x128xbf16, #tpu.memory_space<vmem>>, vector<1x128x128xbf16>
    %7 = vector.shape_cast %6 : vector<1x128x128xbf16> to vector<128x128xbf16>
    %cst = arith.constant dense<0.000000e+00> : vector<32x128xf32>
    %8 = tpu.matmul %5, %7, %cst {dimension_numbers = #tpu.dot_dimension_numbers<[1], [0], [0], [1], [0, 0, 1, 1], [], []>} : vector<32x128xbf16>, vector<128x128xbf16>, vector<32x128xf32> -> vector<32x128xf32>
    %9 = arith.addf %3, %8 : vector<32x128xf32>
    %c0_8 = arith.constant 0 : index
    %c0_9 = arith.constant 0 : index
    %10 = vector.load %arg8[%c0_8, %c0_9] : memref<32x128xf32, #tpu.memory_space<vmem>>, vector<32x128xf32>
    tpu.vector_store %arg8[%c0_8, %c0_9], %9 {strides = array<i32>} : memref<32x128xf32, #tpu.memory_space<vmem>>, vector<32x128xf32>,
    %c8_i32 = arith.constant 8 : i32
    %11 = arith.cmpi eq, %arg1, %c8_i32 : i32
    %12 = arith.extui %11 : i1 to i32
    %c0_i32_10 = arith.constant 0 : i32
    %13 = arith.cmpi ne, %12, %c0_i32_10 : i32
    scf.if %13 {
      %c0_11 = arith.constant 0 : index
      %c0_12 = arith.constant 0 : index
      %14 = vector.load %arg8[%c0_11, %c0_12] : memref<32x128xf32, #tpu.memory_space<vmem>>, vector<32x128xf32>
      %c0_13 = arith.constant 0 : index
      %c0_14 = arith.constant 0 : index
      %15 = vector.load %arg4[%c0_13, %c0_14] : memref<1x128xf32, #tpu.memory_space<vmem>>, vector<1x128xf32>
      %16 = vector.broadcast %15 : vector<1x128xf32> to vector<32x128xf32>
      %17 = arith.addf %14, %16 : vector<32x128xf32>
      %c0_15 = arith.constant 0 : index
      %c0_16 = arith.constant 0 : index
      %18 = vector.load %arg5[%c0_15, %c0_16] : memref<1x128xf32, #tpu.memory_space<vmem>>, vector<1x128xf32>
      %19 = vector.broadcast %18 : vector<1x128xf32> to vector<32x128xf32>
      %20 = arith.mulf %17, %19 : vector<32x128xf32>
      %c0_17 = arith.constant 0 : index
      %c0_18 = arith.constant 0 : index
      %21 = vector.load %arg6[%c0_17, %c0_18] : memref<1x128xf32, #tpu.memory_space<vmem>>, vector<1x128xf32>
      %22 = vector.broadcast %21 : vector<1x128xf32> to vector<32x128xf32>
      %23 = arith.addf %20, %22 : vector<32x128xf32>
      %cst_19 = arith.constant 0.000000e+00 : f32
      %24 = vector.broadcast %cst_19 : f32 to vector<32x128xf32>
      %25 = arith.maximumf %23, %24 : vector<32x128xf32>
      %26 = arith.truncf %25 : vector<32x128xf32> to vector<32x128xbf16>
      %c0_20 = arith.constant 0 : index
      %c0_21 = arith.constant 0 : index
      %27 = vector.load %arg7[%c0_20, %c0_21] : memref<32x128xbf16, #tpu.memory_space<vmem>>, vector<32x128xbf16>
      tpu.vector_store %arg7[%c0_20, %c0_21], %26 {strides = array<i32>} : memref<32x128xbf16, #tpu.memory_space<vmem>>, vector<32x128xbf16>,
    } else {
    }
    return
  }
  func.func @transform_0(%arg0: i32, %arg1: i32) -> (i32, i32, i32) {
    %c0_i32 = arith.constant 0 : i32
    %c0_i32_0 = arith.constant 0 : i32
    return %arg1, %arg0, %c0_i32 : i32, i32, i32
  }
  func.func @transform_1(%arg0: i32, %arg1: i32) -> (i32, i32, i32) {
    %c0_i32 = arith.constant 0 : i32
    %c0_i32_0 = arith.constant 0 : i32
    %c0_i32_1 = arith.constant 0 : i32
    return %arg1, %c0_i32, %c0_i32_0 : i32, i32, i32
  }
  func.func @transform_2(%arg0: i32, %arg1: i32) -> (i32, i32) {
    %c0_i32 = arith.constant 0 : i32
    %c0_i32_0 = arith.constant 0 : i32
    %c0_i32_1 = arith.constant 0 : i32
    return %c0_i32, %c0_i32_0 : i32, i32
  }
  func.func @transform_3(%arg0: i32, %arg1: i32) -> (i32, i32) {
    %c0_i32 = arith.constant 0 : i32
    %c0_i32_0 = arith.constant 0 : i32
    %c0_i32_1 = arith.constant 0 : i32
    return %c0_i32, %c0_i32_0 : i32, i32
  }
  func.func @transform_4(%arg0: i32, %arg1: i32) -> (i32, i32) {
    %c0_i32 = arith.constant 0 : i32
    %c0_i32_0 = arith.constant 0 : i32
    %c0_i32_1 = arith.constant 0 : i32
    return %c0_i32, %c0_i32_0 : i32, i32
  }
  func.func @transform_5(%arg0: i32, %arg1: i32) -> (i32, i32) {
    %c0_i32 = arith.constant 0 : i32
    %c0_i32_0 = arith.constant 0 : i32
    return %arg0, %c0_i32 : i32, i32
  }
}

module attributes {stable_mosaic.version = 11 : i64} {
  func.func @kernel(%arg0: i32, %arg1: i32, %arg2: memref<1x32x128xbf16, #tpu.memory_space<vmem>>, %arg3: memref<1x128x128xbf16, #tpu.memory_space<vmem>>, %arg4: memref<1x128xf32, #tpu.memory_space<vmem>>, %arg5: memref<32x128xbf16, #tpu.memory_space<vmem>>, %arg6: memref<32x128xbf16, #tpu.memory_space<vmem>>, %arg7: memref<32x128xf32, #tpu.memory_space<vmem>>) attributes {dimension_semantics = [#tpu.dimension_semantics<parallel>, #tpu.dimension_semantics<arbitrary>], iteration_bounds = array<i64: 1, 9>, scalar_prefetch = 0 : i64, scratch_operands = 1 : i64, tpu.core_type = #tpu.core_type<tc>, window_params = [{transform_indices = @transform_0, window_bounds = array<i64: 1, 32, 128>}, {transform_indices = @transform_1, window_bounds = array<i64: 1, 128, 128>}, {pipeline_mode = #tpu.pipeline_mode<synchronous>, transform_indices = @transform_2, window_bounds = array<i64: 1, 128>}, {transform_indices = @transform_3, window_bounds = array<i64: 32, 128>}, {transform_indices = @transform_4, window_bounds = array<i64: 32, 128>}]} {
    %c0_i32 = arith.constant 0 : i32
    %0 = arith.cmpi eq, %arg1, %c0_i32 : i32
    %1 = arith.extui %0 : i1 to i32
    %c0_i32_0 = arith.constant 0 : i32
    %2 = arith.cmpi ne, %1, %c0_i32_0 : i32
    scf.if %2 {
      %cst_11 = arith.constant 0.000000e+00 : f32
      %14 = vector.broadcast %cst_11 : f32 to vector<32x128xf32>
      %c0_12 = arith.constant 0 : index
      %c0_13 = arith.constant 0 : index
      %15 = vector.load %arg7[%c0_12, %c0_13] : memref<32x128xf32, #tpu.memory_space<vmem>>, vector<32x128xf32>
      tpu.vector_store %arg7[%c0_12, %c0_13], %14 {strides = array<i32>} : memref<32x128xf32, #tpu.memory_space<vmem>>, vector<32x128xf32>,
    } else {
    }
    %c0 = arith.constant 0 : index
    %c0_1 = arith.constant 0 : index
    %3 = vector.load %arg7[%c0, %c0_1] : memref<32x128xf32, #tpu.memory_space<vmem>>, vector<32x128xf32>
    %c0_2 = arith.constant 0 : index
    %c0_3 = arith.constant 0 : index
    %c0_4 = arith.constant 0 : index
    %4 = vector.load %arg2[%c0_2, %c0_3, %c0_4] : memref<1x32x128xbf16, #tpu.memory_space<vmem>>, vector<1x32x128xbf16>
    %5 = vector.shape_cast %4 : vector<1x32x128xbf16> to vector<32x128xbf16>
    %c0_5 = arith.constant 0 : index
    %c0_6 = arith.constant 0 : index
    %c0_7 = arith.constant 0 : index
    %6 = vector.load %arg3[%c0_5, %c0_6, %c0_7] : memref<1x128x128xbf16, #tpu.memory_space<vmem>>, vector<1x128x128xbf16>
    %7 = vector.shape_cast %6 : vector<1x128x128xbf16> to vector<128x128xbf16>
    %cst = arith.constant dense<0.000000e+00> : vector<32x128xf32>
    %8 = tpu.matmul %5, %7, %cst {dimension_numbers = #tpu.dot_dimension_numbers<[1], [0], [0], [1], [0, 0, 1, 1], [], []>} : vector<32x128xbf16>, vector<128x128xbf16>, vector<32x128xf32> -> vector<32x128xf32>
    %9 = arith.addf %3, %8 : vector<32x128xf32>
    %c0_8 = arith.constant 0 : index
    %c0_9 = arith.constant 0 : index
    %10 = vector.load %arg7[%c0_8, %c0_9] : memref<32x128xf32, #tpu.memory_space<vmem>>, vector<32x128xf32>
    tpu.vector_store %arg7[%c0_8, %c0_9], %9 {strides = array<i32>} : memref<32x128xf32, #tpu.memory_space<vmem>>, vector<32x128xf32>,
    %c8_i32 = arith.constant 8 : i32
    %11 = arith.cmpi eq, %arg1, %c8_i32 : i32
    %12 = arith.extui %11 : i1 to i32
    %c0_i32_10 = arith.constant 0 : i32
    %13 = arith.cmpi ne, %12, %c0_i32_10 : i32
    scf.if %13 {
      %c0_11 = arith.constant 0 : index
      %c0_12 = arith.constant 0 : index
      %14 = vector.load %arg7[%c0_11, %c0_12] : memref<32x128xf32, #tpu.memory_space<vmem>>, vector<32x128xf32>
      %c0_13 = arith.constant 0 : index
      %c0_14 = arith.constant 0 : index
      %15 = vector.load %arg4[%c0_13, %c0_14] : memref<1x128xf32, #tpu.memory_space<vmem>>, vector<1x128xf32>
      %16 = vector.broadcast %15 : vector<1x128xf32> to vector<32x128xf32>
      %17 = arith.addf %14, %16 : vector<32x128xf32>
      %c0_15 = arith.constant 0 : index
      %c0_16 = arith.constant 0 : index
      %18 = vector.load %arg5[%c0_15, %c0_16] : memref<32x128xbf16, #tpu.memory_space<vmem>>, vector<32x128xbf16>
      %19 = arith.extf %18 : vector<32x128xbf16> to vector<32x128xf32>
      %20 = arith.addf %17, %19 : vector<32x128xf32>
      %21 = arith.truncf %20 : vector<32x128xf32> to vector<32x128xbf16>
      %c0_17 = arith.constant 0 : index
      %c0_18 = arith.constant 0 : index
      %22 = vector.load %arg6[%c0_17, %c0_18] : memref<32x128xbf16, #tpu.memory_space<vmem>>, vector<32x128xbf16>
      tpu.vector_store %arg6[%c0_17, %c0_18], %21 {strides = array<i32>} : memref<32x128xbf16, #tpu.memory_space<vmem>>, vector<32x128xbf16>,
    } else {
    }
    return
  }
  func.func @transform_0(%arg0: i32, %arg1: i32) -> (i32, i32, i32) {
    %c0_i32 = arith.constant 0 : i32
    %c0_i32_0 = arith.constant 0 : i32
    return %arg1, %arg0, %c0_i32 : i32, i32, i32
  }
  func.func @transform_1(%arg0: i32, %arg1: i32) -> (i32, i32, i32) {
    %c0_i32 = arith.constant 0 : i32
    %c0_i32_0 = arith.constant 0 : i32
    %c0_i32_1 = arith.constant 0 : i32
    return %arg1, %c0_i32, %c0_i32_0 : i32, i32, i32
  }
  func.func @transform_2(%arg0: i32, %arg1: i32) -> (i32, i32) {
    %c0_i32 = arith.constant 0 : i32
    %c0_i32_0 = arith.constant 0 : i32
    %c0_i32_1 = arith.constant 0 : i32
    return %c0_i32, %c0_i32_0 : i32, i32
  }
  func.func @transform_3(%arg0: i32, %arg1: i32) -> (i32, i32) {
    %c0_i32 = arith.constant 0 : i32
    %c0_i32_0 = arith.constant 0 : i32
    return %arg0, %c0_i32 : i32, i32
  }
  func.func @transform_4(%arg0: i32, %arg1: i32) -> (i32, i32) {
    %c0_i32 = arith.constant 0 : i32
    %c0_i32_0 = arith.constant 0 : i32
    return %arg0, %c0_i32 : i32, i32
  }
}

module attributes {stable_mosaic.version = 11 : i64} {
  func.func @_tail_kernel(%arg0: memref<2x16x128xbf16, #tpu.memory_space<vmem>>, %arg1: memref<1x128xf32, #tpu.memory_space<vmem>>, %arg2: memref<1x128xf32, #tpu.memory_space<vmem>>, %arg3: memref<128x128xbf16, #tpu.memory_space<vmem>>, %arg4: memref<1x128xf32, #tpu.memory_space<vmem>>, %arg5: memref<2x128xf32, #tpu.memory_space<vmem>>) attributes {dimension_semantics = [], scalar_prefetch = 0 : i64, scratch_operands = 0 : i64, tpu.core_type = #tpu.core_type<tc>} {
    %c0 = arith.constant 0 : index
    %c0_0 = arith.constant 0 : index
    %c0_1 = arith.constant 0 : index
    %0 = vector.load %arg0[%c0, %c0_0, %c0_1] : memref<2x16x128xbf16, #tpu.memory_space<vmem>>, vector<2x16x128xbf16>
    %1 = arith.extf %0 : vector<2x16x128xbf16> to vector<2x16x128xf32>
    %c0_2 = arith.constant 0 : index
    %c0_3 = arith.constant 0 : index
    %2 = vector.load %arg1[%c0_2, %c0_3] : memref<1x128xf32, #tpu.memory_space<vmem>>, vector<1x128xf32>
    %3 = vector.shape_cast %2 : vector<1x128xf32> to vector<1x1x128xf32>
    %4 = vector.broadcast %3 : vector<1x1x128xf32> to vector<2x16x128xf32>
    %5 = arith.mulf %1, %4 : vector<2x16x128xf32>
    %c0_4 = arith.constant 0 : index
    %c0_5 = arith.constant 0 : index
    %6 = vector.load %arg2[%c0_4, %c0_5] : memref<1x128xf32, #tpu.memory_space<vmem>>, vector<1x128xf32>
    %7 = vector.shape_cast %6 : vector<1x128xf32> to vector<1x1x128xf32>
    %8 = vector.broadcast %7 : vector<1x1x128xf32> to vector<2x16x128xf32>
    %9 = arith.addf %5, %8 : vector<2x16x128xf32>
    %cst = arith.constant 0.000000e+00 : f32
    %10 = vector.broadcast %cst : f32 to vector<2x16x128xf32>
    %11 = arith.maximumf %9, %10 : vector<2x16x128xf32>
    %cst_6 = arith.constant dense<0.000000e+00> : vector<2x128xf32>
    %12 = vector.multi_reduction <add>, %11, %cst_6 [1] : vector<2x16x128xf32> to vector<2x128xf32>
    %cst_7 = arith.constant 1.600000e+01 : f32
    %13 = vector.broadcast %cst_7 : f32 to vector<2x128xf32>
    %14 = arith.divf %12, %13 : vector<2x128xf32>
    %15 = arith.truncf %14 : vector<2x128xf32> to vector<2x128xbf16>
    %c0_8 = arith.constant 0 : index
    %c0_9 = arith.constant 0 : index
    %16 = vector.load %arg3[%c0_8, %c0_9] : memref<128x128xbf16, #tpu.memory_space<vmem>>, vector<128x128xbf16>
    %cst_10 = arith.constant dense<0.000000e+00> : vector<2x128xf32>
    %17 = tpu.matmul %15, %16, %cst_10 {dimension_numbers = #tpu.dot_dimension_numbers<[1], [0], [0], [1], [0, 0, 1, 1], [], []>} : vector<2x128xbf16>, vector<128x128xbf16>, vector<2x128xf32> -> vector<2x128xf32>
    %c0_11 = arith.constant 0 : index
    %c0_12 = arith.constant 0 : index
    %18 = vector.load %arg4[%c0_11, %c0_12] : memref<1x128xf32, #tpu.memory_space<vmem>>, vector<1x128xf32>
    %19 = vector.broadcast %18 : vector<1x128xf32> to vector<2x128xf32>
    %20 = arith.addf %17, %19 : vector<2x128xf32>
    %c0_13 = arith.constant 0 : index
    %c0_14 = arith.constant 0 : index
    %21 = vector.load %arg5[%c0_13, %c0_14] : memref<2x128xf32, #tpu.memory_space<vmem>>, vector<2x128xf32>
    tpu.vector_store %arg5[%c0_13, %c0_14], %20 {strides = array<i32>} : memref<2x128xf32, #tpu.memory_space<vmem>>, vector<2x128xf32>,
    return
  }
}

</mosaic_0001>

<bundles_post_ra>
// kernel: _lambda_.14
= control target key start
LH: loop header
LB: loop body
LE: loop exit
PB: predicated region body
PF: predicated region fallthrough
CT: control target
= control target key end

     0   :  { %s851_s12 = smov 0   ;;  %s985_s0 = inlined_call_operand.vmem [shape: bf16[512,128], index: 0, kind: input, shape index: {}]   ;;  %s986_s1 = inlined_call_operand.vmem [shape: f32[1,128], index: 1, kind: input, shape index: {}]   ;;  %s987_s2 = inlined_call_operand.vmem [shape: f32[1,128], index: 2, kind: input, shape index: {}]   ;;  %s988_s3 = inlined_call_operand.vmem [shape: bf16[512,128], index: 3, kind: output, shape index: {}]  }
   0x1 LB: > { %s564_s13 = sadd.s32 4294967295, %s829_s12   ;;  %p568_p0 = scmp.ge.s32.totalorder %s829_s12, 1  ;;  %s829_s12 = sphi %s851_s12, %s13_s12  }
   0x2   : > { %p138_p1 = scmp.lt.s32.totalorder %s829_s12, 3 }
   0x4   : > { %p139_p2 = pnand %p568_p0, %p138_p1 }
   0x5   : > { %s569_s14 = sshll.u32 (!%p139_p2), %s564_s13, 5  ;;  %v872_v0 = vld [vmem:[%s986_s1] ss:$0 sm:$0xff] (!%p139_p2) }
   0x6   : > { %142 = sbr.rel (%p139_p2) target bundleno = 59 (0x3b), region = 32  ;;  %p163_p3 = scmp.lt.s32.totalorder (!%p139_p2), %s569_s14, 63  ;;  %v881_v9 = vld [vmem:[%s987_s2] ss:$0 sm:$0xff] (!%p139_p2) }
   0xd   : > { %s990_s14 = smov (!%p163_p3, %s569_s14), 63 }
   0xe   : > { %s570_s15 = sshll.u32 %s990_s14, 2 }
   0xf   : > { %s867_s18 = scalar_lea.vmem %s985_s0, %s570_s15  ;;  %s906_s25 = scalar_lea.vmem %s988_s3, %s570_s15 }
  0x10   : > { %v642_v1 = vld [vmem:[%s867_s18] sm:$0xff]   ;;  %v785_v2 = vld [vmem:[%s867_s18 + $0x8] sm:$0xff]   ;;  %v786_v3 = vld [vmem:[%s867_s18 + $0x10] sm:$0xff]  }
  0x11   : > { %v643_v4 = vunpack.c.l.bf16 %v642_v1  ;;  %v644_v5 = vunpack.c.h.bf16 %v642_v1  ;;  %v647_v6 = vunpack.c.l.bf16 %v785_v2  ;;  %v648_v7 = vunpack.c.h.bf16 %v785_v2  ;;  %v787_v8 = vld [vmem:[%s867_s18 + $0x18] sm:$0xff]   ;;  %v788_v30 = vld [vmem:[%s867_s18 + $0x20] sm:$0xff]   ;;  %v789_v35 = vld [vmem:[%s867_s18 + $0x28] sm:$0xff]  }
  0x12   : > { %v651_v10 = vunpack.c.l.bf16 %v786_v3  ;;  %v652_v11 = vunpack.c.h.bf16 %v786_v3  ;;  %v655_v12 = vunpack.c.l.bf16 %v787_v8  ;;  %v656_v13 = vunpack.c.h.bf16 %v787_v8  ;;  %v790_v40 = vld [vmem:[%s867_s18 + $0x30] sm:$0xff]   ;;  %v791_v45 = vld [vmem:[%s867_s18 + $0x38] sm:$0xff]   ;;  %v792_v3 = vld [vmem:[%s867_s18 + $0x40] sm:$0xff]  }
  0x13   : > { %v245_v14 = vmul.f32 %v643_v4, %v872_v0  ;;  %v246_v15 = vmul.f32 %v644_v5, %v872_v0  ;;  %v247_v16 = vmul.f32 %v647_v6, %v872_v0  ;;  %v248_v17 = vmul.f32 %v648_v7, %v872_v0 }
  0x14   : > { %v249_v18 = vmul.f32 %v651_v10, %v872_v0  ;;  %v250_v19 = vmul.f32 %v652_v11, %v872_v0  ;;  %v251_v20 = vmul.f32 %v655_v12, %v872_v0  ;;  %v252_v21 = vmul.f32 %v656_v13, %v872_v0  ;;  %v793_v13 = vld [vmem:[%s867_s18 + $0x48] sm:$0xff]  }
  0x15   : > { %v284_v22 = vadd.f32 %v881_v9, %v245_v14  ;;  %v285_v23 = vadd.f32 %v881_v9, %v246_v15  ;;  %v286_v24 = vadd.f32 %v881_v9, %v247_v16  ;;  %v287_v25 = vadd.f32 %v881_v9, %v248_v17 }
  0x16   : > { %v288_v26 = vadd.f32 %v881_v9, %v249_v18  ;;  %v289_v27 = vadd.f32 %v881_v9, %v250_v19  ;;  %v290_v28 = vadd.f32 %v881_v9, %v251_v20  ;;  %v291_v29 = vadd.f32 %v881_v9, %v252_v21  ;;  %v794_v18 = vld [vmem:[%s867_s18 + $0x50] sm:$0xff]  }
  0x17   : > { %v316_v31 = vmax.f32 %v284_v22, 0.0  ;;  %v317_v32 = vmax.f32 %v285_v23, 0.0  ;;  %v318_v33 = vmax.f32 %v286_v24, 0.0  ;;  %v319_v34 = vmax.f32 %v287_v25, 0.0  ;;  %v795_v23 = vld [vmem:[%s867_s18 + $0x58] sm:$0xff]  }
  0x18   : > { %v320_v36 = vmax.f32 %v288_v26, 0.0  ;;  %v321_v37 = vmax.f32 %v289_v27, 0.0  ;;  %v322_v38 = vmax.f32 %v290_v28, 0.0  ;;  %v323_v39 = vmax.f32 %v291_v29, 0.0 }
  0x19   : > { %v708_v41 = vpack.c.bf16 %v317_v32, %v316_v31  ;;  %v713_v42 = vpack.c.bf16 %v319_v34, %v318_v33  ;;  %v659_v43 = vunpack.c.l.bf16 %v788_v30  ;;  %v660_v44 = vunpack.c.h.bf16 %v788_v30 }
  0x1a   : > { %v718_v46 = vpack.c.bf16 %v321_v37, %v320_v36  ;;  %v723_v47 = vpack.c.bf16 %v323_v39, %v322_v38  ;;  %v663_v48 = vunpack.c.l.bf16 %v789_v35  ;;  %v664_v49 = vunpack.c.h.bf16 %v789_v35 }
  0x1b   : > { %709 = vst [vmem:[%s906_s25] sm:$0xff] %v708_v41   ;;  %800 = vst [vmem:[%s906_s25 + $0x8] sm:$0xff] %v713_v42   ;;  %v253_v50 = vmul.f32 %v659_v43, %v872_v0  ;;  %v254_v51 = vmul.f32 %v660_v44, %v872_v0  ;;  %v667_v52 = vunpack.c.l.bf16 %v790_v40  ;;  %v668_v53 = vunpack.c.h.bf16 %v790_v40  ;;  %v796_v40 = vld [vmem:[%s867_s18 + $0x60] sm:$0xff]  }
  0x1c   : > { %801 = vst [vmem:[%s906_s25 + $0x10] sm:$0xff] %v718_v46   ;;  %802 = vst [vmem:[%s906_s25 + $0x18] sm:$0xff] %v723_v47   ;;  %v255_v54 = vmul.f32 %v663_v48, %v872_v0  ;;  %v256_v55 = vmul.f32 %v664_v49, %v872_v0  ;;  %v671_v56 = vunpack.c.l.bf16 %v791_v45  ;;  %v672_v57 = vunpack.c.h.bf16 %v791_v45 }
  0x1d   : > { %v292_v58 = vadd.f32 %v881_v9, %v253_v50  ;;  %v293_v59 = vadd.f32 %v881_v9, %v254_v51  ;;  %v257_v60 = vmul.f32 %v667_v52, %v872_v0  ;;  %v258_v61 = vmul.f32 %v668_v53, %v872_v0  ;;  %v797_v53 = vld [vmem:[%s867_s18 + $0x68] sm:$0xff]  }
  0x1e   : > { %v294_v62 = vadd.f32 %v881_v9, %v255_v54  ;;  %v295_v63 = vadd.f32 %v881_v9, %v256_v55  ;;  %v259_v1 = vmul.f32 %v671_v56, %v872_v0  ;;  %v260_v2 = vmul.f32 %v672_v57, %v872_v0 }
  0x1f   : > { %v324_v4 = vmax.f32 %v292_v58, 0.0  ;;  %v325_v5 = vmax.f32 %v293_v59, 0.0  ;;  %v296_v6 = vadd.f32 %v881_v9, %v257_v60  ;;  %v297_v7 = vadd.f32 %v881_v9, %v258_v61  ;;  %v798_v58 = vld [vmem:[%s867_s18 + $0x70] sm:$0xff]  }
  0x20   : > { %v326_v8 = vmax.f32 %v294_v62, 0.0  ;;  %v327_v10 = vmax.f32 %v295_v63, 0.0  ;;  %v298_v11 = vadd.f32 %v881_v9, %v259_v1  ;;  %v299_v12 = vadd.f32 %v881_v9, %v260_v2  ;;  %v799_v63 = vld [vmem:[%s867_s18 + $0x78] sm:$0xff]  }
  0x21   : > { %v728_v14 = vpack.c.bf16 %v325_v5, %v324_v4  ;;  %v328_v15 = vmax.f32 %v296_v6, 0.0  ;;  %v329_v16 = vmax.f32 %v297_v7, 0.0  ;;  %v675_v17 = vunpack.c.l.bf16 %v792_v3 }
  0x22   : > { %v733_v19 = vpack.c.bf16 %v327_v10, %v326_v8  ;;  %v330_v20 = vmax.f32 %v298_v11, 0.0  ;;  %v331_v21 = vmax.f32 %v299_v12, 0.0  ;;  %v676_v22 = vunpack.c.h.bf16 %v792_v3 }
  0x23   : > { %803 = vst [vmem:[%s906_s25 + $0x20] sm:$0xff] %v728_v14   ;;  %v738_v24 = vpack.c.bf16 %v329_v16, %v328_v15  ;;  %v261_v25 = vmul.f32 %v675_v17, %v872_v0  ;;  %v679_v26 = vunpack.c.l.bf16 %v793_v13  ;;  %v680_v27 = vunpack.c.h.bf16 %v793_v13 }
  0x24   : > { %804 = vst [vmem:[%s906_s25 + $0x28] sm:$0xff] %v733_v19   ;;  %v743_v28 = vpack.c.bf16 %v331_v21, %v330_v20  ;;  %v262_v29 = vmul.f32 %v676_v22, %v872_v0  ;;  %v683_v30 = vunpack.c.l.bf16 %v794_v18  ;;  %v684_v31 = vunpack.c.h.bf16 %v794_v18 }
  0x25   : > { %805 = vst [vmem:[%s906_s25 + $0x30] sm:$0xff] %v738_v24   ;;  %v300_v32 = vadd.f32 %v881_v9, %v261_v25  ;;  %v263_v33 = vmul.f32 %v679_v26, %v872_v0  ;;  %v264_v34 = vmul.f32 %v680_v27, %v872_v0  ;;  %v687_v35 = vunpack.c.l.bf16 %v795_v23 }
  0x26   : > { %806 = vst [vmem:[%s906_s25 + $0x38] sm:$0xff] %v743_v28   ;;  %v301_v36 = vadd.f32 %v881_v9, %v262_v29  ;;  %v265_v37 = vmul.f32 %v683_v30, %v872_v0  ;;  %v266_v38 = vmul.f32 %v684_v31, %v872_v0  ;;  %v688_v39 = vunpack.c.h.bf16 %v795_v23 }
  0x27   : > { %v332_v41 = vmax.f32 %v300_v32, 0.0  ;;  %v302_v42 = vadd.f32 %v881_v9, %v263_v33  ;;  %v303_v43 = vadd.f32 %v881_v9, %v264_v34  ;;  %v267_v44 = vmul.f32 %v687_v35, %v872_v0 }
  0x28   : > { %v333_v45 = vmax.f32 %v301_v36, 0.0  ;;  %v304_v46 = vadd.f32 %v881_v9, %v265_v37  ;;  %v305_v47 = vadd.f32 %v881_v9, %v266_v38  ;;  %v268_v48 = vmul.f32 %v688_v39, %v872_v0 }
  0x29   : > { %v334_v49 = vmax.f32 %v302_v42, 0.0  ;;  %v335_v50 = vmax.f32 %v303_v43, 0.0  ;;  %v306_v51 = vadd.f32 %v881_v9, %v267_v44  ;;  %v691_v52 = vunpack.c.l.bf16 %v796_v40 }
  0x2a   : > { %v748_v54 = vpack.c.bf16 %v333_v45, %v332_v41  ;;  %v336_v55 = vmax.f32 %v304_v46, 0.0  ;;  %v337_v56 = vmax.f32 %v305_v47, 0.0  ;;  %v307_v57 = vadd.f32 %v881_v9, %v268_v48 }
  0x2b   : > { %v753_v59 = vpack.c.bf16 %v335_v50, %v334_v49  ;;  %v338_v60 = vmax.f32 %v306_v51, 0.0  ;;  %v692_v61 = vunpack.c.h.bf16 %v796_v40  ;;  %v269_v62 = vmul.f32 %v691_v52, %v872_v0 }
  0x2c   : > { %807 = vst [vmem:[%s906_s25 + $0x40] sm:$0xff] %v748_v54   ;;  %v758_v1 = vpack.c.bf16 %v337_v56, %v336_v55  ;;  %v339_v2 = vmax.f32 %v307_v57, 0.0  ;;  %v695_v3 = vunpack.c.l.bf16 %v797_v53  ;;  %v696_v4 = vunpack.c.h.bf16 %v797_v53 }
  0x2d   : > { %808 = vst [vmem:[%s906_s25 + $0x48] sm:$0xff] %v753_v59   ;;  %v270_v5 = vmul.f32 %v692_v61, %v872_v0  ;;  %v308_v6 = vadd.f32 %v881_v9, %v269_v62  ;;  %v699_v7 = vunpack.c.l.bf16 %v798_v58  ;;  %v700_v8 = vunpack.c.h.bf16 %v798_v58 }
  0x2e   : > { %809 = vst [vmem:[%s906_s25 + $0x50] sm:$0xff] %v758_v1   ;;  %v763_v10 = vpack.c.bf16 %v339_v2, %v338_v60  ;;  %v271_v11 = vmul.f32 %v695_v3, %v872_v0  ;;  %v272_v12 = vmul.f32 %v696_v4, %v872_v0  ;;  %v703_v13 = vunpack.c.l.bf16 %v799_v63 }
  0x2f   : > { %v309_v14 = vadd.f32 %v881_v9, %v270_v5  ;;  %v340_v15 = vmax.f32 %v308_v6, 0.0  ;;  %v273_v16 = vmul.f32 %v699_v7, %v872_v0  ;;  %v274_v17 = vmul.f32 %v700_v8, %v872_v0 }
  0x30   : > { %810 = vst [vmem:[%s906_s25 + $0x58] sm:$0xff] %v763_v10   ;;  %v310_v18 = vadd.f32 %v881_v9, %v271_v11  ;;  %v311_v19 = vadd.f32 %v881_v9, %v272_v12  ;;  %v704_v20 = vunpack.c.h.bf16 %v799_v63  ;;  %v275_v21 = vmul.f32 %v703_v13, %v872_v0 }
  0x31   : > { %v341_v22 = vmax.f32 %v309_v14, 0.0  ;;  %v312_v23 = vadd.f32 %v881_v9, %v273_v16  ;;  %v313_v24 = vadd.f32 %v881_v9, %v274_v17 }
  0x32   : > { %v342_v25 = vmax.f32 %v310_v18, 0.0  ;;  %v343_v26 = vmax.f32 %v311_v19, 0.0  ;;  %v276_v27 = vmul.f32 %v704_v20, %v872_v0  ;;  %v314_v28 = vadd.f32 %v881_v9, %v275_v21 }
  0x33   : > { %v768_v29 = vpack.c.bf16 %v341_v22, %v340_v15  ;;  %v344_v30 = vmax.f32 %v312_v23, 0.0  ;;  %v345_v31 = vmax.f32 %v313_v24, 0.0 }
  0x34   : > { %v773_v32 = vpack.c.bf16 %v343_v26, %v342_v25  ;;  %v315_v33 = vadd.f32 %v881_v9, %v276_v27  ;;  %v346_v34 = vmax.f32 %v314_v28, 0.0 }
  0x35   : > { %811 = vst [vmem:[%s906_s25 + $0x60] sm:$0xff] %v768_v29   ;;  %v778_v35 = vpack.c.bf16 %v345_v31, %v344_v30 }
  0x36   : > { %812 = vst [vmem:[%s906_s25 + $0x68] sm:$0xff] %v773_v32   ;;  %v347_v36 = vmax.f32 %v315_v33, 0.0 }
  0x37   : > { %813 = vst [vmem:[%s906_s25 + $0x70] sm:$0xff] %v778_v35  }
  0x38   : > { %v783_v37 = vpack.c.bf16 %v347_v36, %v346_v34 }
  0x3a   : > { %814 = vst [vmem:[%s906_s25 + $0x78] sm:$0xff] %v783_v37  }
  0x3b PF: > { %s13_s12 = sadd.s32 1, %s829_s12  }
  0x3c   : > { %p10_p4 = scmp.ge.s32.totalorder %s13_s12, 4  }
  0x3e   :  { %12 = sbr.rel (!%p10_p4) target bundleno = 1 (0x1), region = 62 }

// kernel: _lambda_.13
= control target key start
LH: loop header
LB: loop body
LE: loop exit
PB: predicated region body
PF: predicated region fallthrough
CT: control target
= control target key end

     0   :  { %s1442_s12 = smov 0   ;;  %s1444_s13 = smov 0   ;;  %s1585_s0 = inlined_call_operand.vmem [shape: bf16[9,512,128], index: 0, kind: input, shape index: {}]   ;;  %s1586_s1 = inlined_call_operand.vmem [shape: bf16[9,128,128], index: 1, kind: input, shape index: {}]   ;;  %s1587_s2 = inlined_call_operand.vmem [shape: f32[1,128], index: 2, kind: input, shape index: {}]   ;;  %s1588_s3 = inlined_call_operand.vmem [shape: bf16[512,128], index: 3, kind: output, shape index: {}]  }
   0x1   :  { %s1446_s14 = smov 0   ;;  %s1448_s15 = smov 0  }
   0x2   :  { %s1450_s16 = smov 0  }
   0x3 LB: > { %s22_s17 = sadd.s32 1, %s1411_s14  ;;  %s25_s18 = sadd.s32 1, %s1415_s15  ;;  %s1419_s16 = sphi %s1450_s16, %s13_s16   ;;  %s1415_s15 = sphi %s1448_s15, %s1592_s15   ;;  %s1411_s14 = sphi %s1446_s14, %s1591_s14   ;;  %s1407_s13 = sphi %s1444_s13, %s1590_s13   ;;  %s1403_s12 = sphi %s1442_s12, %s1589_s12  }
   0x4   : > { %p23_p0 = scmp.ge.s32.totalorder %s22_s17, 9  ;;  %p1031_p1 = scmp.ge.s32.totalorder %s1419_s16, 1 }
   0x5   : > { %p166_p2 = scmp.lt.s32.totalorder %s1419_s16, 19 }
   0x6   : > { %s1594_s17 = smov (%p23_p0, %s22_s17), 0  ;;  %s1596_s18 = smov (!%p23_p0, %s25_s18), %s1415_s15 }
   0x7   : > { %p167_p3 = pnand %p1031_p1, %p166_p2  ;;  %p27_p4 = scmp.ge.s32.totalorder %s1596_s18, 2 }
   0x8   : > { %s1032_s19 = sshll.u32 (!%p167_p3), %s1407_s13, 5  ;;  %p200_p5 = scmp.lt.s32.totalorder (!%p167_p3), %s1403_s12, 8 }
   0x9   : > { %s1598_s18 = smov (%p27_p4, %s1596_s18), 0  ;;  %170 = sbr.rel (%p167_p3) target bundleno = 323 (0x143), region = 32 }
   0xa   : > { %p202_p6 = scmp.lt.s32.totalorder (!%p167_p3), %s1032_s19, 63  ;;  %p1039_p7 = scmp.ne.s32.totalorder (!%p167_p3), %s1403_s12, 0 }
  0x10   : > { %s201_s20 = scalar_select %p200_p5, %s1403_s12, 8 }
  0x11   : > { %s1600_s19 = smov (!%p202_p6, %s1032_s19), 63  ;;  %224 = sbr.rel (%p1039_p7) target bundleno = 35 (0x23), region = 36 }
  0x12   : > { %s1033_s21 = sshll.u32 %s201_s20, 6  ;;  %s1038_s27 = sshll.u32 %s1600_s19, 2  ;;  %v1421_v0 = vmov (!%p1039_p7), 0.0  }
  0x13   : > { %s205_s22 = sadd.s32 %s1033_s21, %s1600_s19  ;;  %s1479_s25 = scalar_lea.vmem %s1586_s1, %s1033_s21  ;;  %225 = vst [vmem:[#allocation2] sm:$0xff] (!%p1039_p7), %v1421_v0  ;;  %226 = vst [vmem:[#allocation2 + $0x8] sm:$0xff] (!%p1039_p7), %v1421_v0 }
  0x14   : > { %s1034_s26 = sshll.u32 %s205_s22, 2  ;;  %s1489_s6 = scalar_lea.vmem %s1588_s3, %s1038_s27  ;;  %227 = vst [vmem:[#allocation2 + $0x10] sm:$0xff] (!%p1039_p7), %v1421_v0  ;;  %228 = vst [vmem:[#allocation2 + $0x18] sm:$0xff] (!%p1039_p7), %v1421_v0 }
  0x15   : > { %s1484_s30 = scalar_lea.vmem %s1585_s0, %s1034_s26  ;;  %229 = vst [vmem:[#allocation2 + $0x20] sm:$0xff] (!%p1039_p7), %v1421_v0  ;;  %230 = vst [vmem:[#allocation2 + $0x28] sm:$0xff] (!%p1039_p7), %v1421_v0 }
  0x16   : > { %231 = vst [vmem:[#allocation2 + $0x30] sm:$0xff] (!%p1039_p7), %v1421_v0  ;;  %232 = vst [vmem:[#allocation2 + $0x38] sm:$0xff] (!%p1039_p7), %v1421_v0 }
  0x17   : > { %233 = vst [vmem:[#allocation2 + $0x40] sm:$0xff] (!%p1039_p7), %v1421_v0  ;;  %234 = vst [vmem:[#allocation2 + $0x48] sm:$0xff] (!%p1039_p7), %v1421_v0 }
  0x18   : > { %235 = vst [vmem:[#allocation2 + $0x50] sm:$0xff] %v1421_v0  ;;  %236 = vst [vmem:[#allocation2 + $0x58] sm:$0xff] %v1421_v0 }
  0x19   : > { %237 = vst [vmem:[#allocation2 + $0x60] sm:$0xff] %v1421_v0  ;;  %238 = vst [vmem:[#allocation2 + $0x68] sm:$0xff] %v1421_v0 }
  0x1a   : > { %239 = vst [vmem:[#allocation2 + $0x70] sm:$0xff] %v1421_v0  ;;  %240 = vst [vmem:[#allocation2 + $0x78] sm:$0xff] %v1421_v0 }
  0x1b   : > { %241 = vst [vmem:[#allocation2 + $0x80] sm:$0xff] %v1421_v0  ;;  %242 = vst [vmem:[#allocation2 + $0x88] sm:$0xff] %v1421_v0 }
  0x1c   : > { %243 = vst [vmem:[#allocation2 + $0x90] sm:$0xff] %v1421_v0  ;;  %244 = vst [vmem:[#allocation2 + $0x98] sm:$0xff] %v1421_v0 }
  0x1d   : > { %245 = vst [vmem:[#allocation2 + $0xa0] sm:$0xff] %v1421_v0  ;;  %246 = vst [vmem:[#allocation2 + $0xa8] sm:$0xff] %v1421_v0 }
  0x1e   : > { %247 = vst [vmem:[#allocation2 + $0xb0] sm:$0xff] %v1421_v0  ;;  %248 = vst [vmem:[#allocation2 + $0xb8] sm:$0xff] %v1421_v0 }
  0x1f   : > { %249 = vst [vmem:[#allocation2 + $0xc0] sm:$0xff] %v1421_v0  ;;  %250 = vst [vmem:[#allocation2 + $0xc8] sm:$0xff] %v1421_v0 }
  0x20   : > { %251 = vst [vmem:[#allocation2 + $0xd0] sm:$0xff] %v1421_v0  ;;  %252 = vst [vmem:[#allocation2 + $0xd8] sm:$0xff] %v1421_v0 }
  0x21   : > { %253 = vst [vmem:[#allocation2 + $0xe0] sm:$0xff] %v1421_v0  ;;  %254 = vst [vmem:[#allocation2 + $0xe8] sm:$0xff] %v1421_v0 }
  0x22   : > { %255 = vst [vmem:[#allocation2 + $0xf0] sm:$0xff] %v1421_v0  ;;  %256 = vst [vmem:[#allocation2 + $0xf8] sm:$0xff] %v1421_v0 }
  0x23 PF: > { %v1357_v1 = vld [vmem:[%s1479_s25] sm:$0xff]   ;;  %v1358_v2 = vld [vmem:[%s1479_s25 + $0x8] sm:$0xff]   ;;  %v1359_v3 = vld [vmem:[%s1479_s25 + $0x10] sm:$0xff]   ;;  %p1064_p8 = scmp.ne.s32.totalorder %s1403_s12, 8 }
  0x24   : > { %1252 = vmatprep.subr.bf16.mxu0 %v1357_v1  ;;  %1300 = vmatprep.subr.bf16.mxu1 %v1357_v1  ;;  %v1360_v4 = vld [vmem:[%s1479_s25 + $0x18] sm:$0xff]   ;;  %v1365_v5 = vld [vmem:[%s1484_s30] sm:$0xff]   ;;  %v1362_v8 = vld [vmem:[%s1479_s25 + $0x28] sm:$0xff]  }
  0x25   : > { %1253 = vmatpush3.bf16.msra.mxu0 %v1357_v1  ;;  %1308 = vmatpush3.bf16.msra.mxu1 %v1357_v1  ;;  %v1366_v6 = vld [vmem:[%s1484_s30 + $0x40] sm:$0xff]   ;;  %v1363_v9 = vld [vmem:[%s1479_s25 + $0x30] sm:$0xff]   ;;  %v1364_v10 = vld [vmem:[%s1479_s25 + $0x38] sm:$0xff]  }
  0x26   : > { %1254 = vmatprep.subr.bf16.mxu0 %v1358_v2  ;;  %1301 = vmatprep.subr.bf16.mxu1 %v1358_v2  ;;  %v1361_v7 = vld [vmem:[%s1479_s25 + $0x20] sm:$0xff]   ;;  %v1367_v11 = vld [vmem:[%s1484_s30 + $0x8] sm:$0xff]   ;;  %v1369_v13 = vld [vmem:[%s1484_s30 + $0x10] sm:$0xff]  }
  0x27   : > { %1268 = vmatprep.mubr.bf16.mxu0 %v1365_v5  ;;  %1284 = vmatprep.mubr.bf16.mxu1 %v1366_v6  ;;  %v1368_v12 = vld [vmem:[%s1484_s30 + $0x48] sm:$0xff]   ;;  %v1370_v14 = vld [vmem:[%s1484_s30 + $0x50] sm:$0xff]   ;;  %v1371_v15 = vld [vmem:[%s1484_s30 + $0x18] sm:$0xff]  }
  0x28   : > { %v1372_v16 = vld [vmem:[%s1484_s30 + $0x58] sm:$0xff]   ;;  %v1373_v17 = vld [vmem:[%s1484_s30 + $0x20] sm:$0xff]   ;;  %v1375_v19 = vld [vmem:[%s1484_s30 + $0x28] sm:$0xff]  }
  0x29   : > { %1255 = vmatpush3.bf16.msra.mxu0 %v1358_v2  ;;  %1309 = vmatpush3.bf16.msra.mxu1 %v1358_v2  ;;  %v1374_v18 = vld [vmem:[%s1484_s30 + $0x60] sm:$0xff]   ;;  %v1376_v20 = vld [vmem:[%s1484_s30 + $0x68] sm:$0xff]   ;;  %v1377_v21 = vld [vmem:[%s1484_s30 + $0x30] sm:$0xff]  }
  0x2a   : > { %1256 = vmatprep.subr.bf16.mxu0 %v1359_v3  ;;  %1302 = vmatprep.subr.bf16.mxu1 %v1359_v3  ;;  %v1378_v22 = vld [vmem:[%s1484_s30 + $0x70] sm:$0xff]   ;;  %v1379_v23 = vld [vmem:[%s1484_s30 + $0x38] sm:$0xff]   ;;  %v257_v27 = vld [vmem:[#allocation2] sm:$0xff] }
  0x2b   : > { %v1380_v24 = vld [vmem:[%s1484_s30 + $0x78] sm:$0xff]   ;;  %v259_v25 = vld [vmem:[#allocation2 + $0x10] sm:$0xff]  ;;  %v273_v28 = vld [vmem:[#allocation2 + $0x80] sm:$0xff] }
  0x2c   : > { %v275_v26 = vld [vmem:[#allocation2 + $0x90] sm:$0xff]  ;;  %v260_v31 = vld [vmem:[#allocation2 + $0x18] sm:$0xff]  ;;  %v258_v37 = vld [vmem:[#allocation2 + $0x8] sm:$0xff] }
  0x2d   : > { %1257 = vmatpush3.bf16.msra.mxu0 %v1359_v3  ;;  %1310 = vmatpush3.bf16.msra.mxu1 %v1359_v3  ;;  %v276_v32 = vld [vmem:[#allocation2 + $0x98] sm:$0xff]  ;;  %v274_v38 = vld [vmem:[#allocation2 + $0x88] sm:$0xff]  ;;  %v263_v49 = vld [vmem:[#allocation2 + $0x30] sm:$0xff] }
  0x2e   : > { %1258 = vmatprep.subr.bf16.mxu0 %v1360_v4  ;;  %1303 = vmatprep.subr.bf16.mxu1 %v1360_v4  ;;  %v279_v50 = vld [vmem:[#allocation2 + $0xb0] sm:$0xff]  ;;  %v261_v51 = vld [vmem:[#allocation2 + $0x20] sm:$0xff]  ;;  %v264_v55 = vld [vmem:[#allocation2 + $0x38] sm:$0xff] }
  0x2f   : > { %v277_v52 = vld [vmem:[#allocation2 + $0xa0] sm:$0xff]  ;;  %v280_v56 = vld [vmem:[#allocation2 + $0xb8] sm:$0xff]  ;;  %v262_v61 = vld [vmem:[#allocation2 + $0x28] sm:$0xff] }
  0x30   : > { %v278_v62 = vld [vmem:[#allocation2 + $0xa8] sm:$0xff] }
  0x31   : > { %1259 = vmatpush3.bf16.msra.mxu0 %v1360_v4  ;;  %1311 = vmatpush3.bf16.msra.mxu1 %v1360_v4 }
  0x32   : > { %1260 = vmatprep.subr.bf16.mxu0 %v1361_v7  ;;  %1304 = vmatprep.subr.bf16.mxu1 %v1361_v7 }
  0x35   : > { %1261 = vmatpush3.bf16.msra.mxu0 %v1361_v7  ;;  %1312 = vmatpush3.bf16.msra.mxu1 %v1361_v7 }
  0x36   : > { %1262 = vmatprep.subr.bf16.mxu0 %v1362_v8  ;;  %1305 = vmatprep.subr.bf16.mxu1 %v1362_v8 }
  0x39   : > { %1263 = vmatpush3.bf16.msra.mxu0 %v1362_v8  ;;  %1313 = vmatpush3.bf16.msra.mxu1 %v1362_v8 }
  0x3a   : > { %1264 = vmatprep.subr.bf16.mxu0 %v1363_v9  ;;  %1306 = vmatprep.subr.bf16.mxu1 %v1363_v9 }
  0x3d   : > { %1265 = vmatpush3.bf16.msra.mxu0 %v1363_v9  ;;  %1314 = vmatpush3.bf16.msra.mxu1 %v1363_v9  ;;  %v267_v9 = vld [vmem:[#allocation2 + $0x50] sm:$0xff] }
  0x3e   : > { %1266 = vmatprep.subr.bf16.mxu0 %v1364_v10  ;;  %1307 = vmatprep.subr.bf16.mxu1 %v1364_v10 }
  0x41   : > { %1267 = vmatpush3.bf16.msra.mxu0 %v1364_v10  ;;  %1315 = vmatpush3.bf16.msra.mxu1 %v1364_v10  ;;  %v283_v10 = vld [vmem:[#allocation2 + $0xd0] sm:$0xff] }
  0x44   : > { %1269 = vmatmul.mubr.bf16.vlgmr.msra.gmra.mrb[0].mxu0 %v1367_v11  ;;  %1285 = vmatmul.mubr.bf16.vlgmr.msra.gmra.mrb[0].mxu1 %v1368_v12  ;;  %v265_v11 = vld [vmem:[#allocation2 + $0x40] sm:$0xff] }
  0x45   : > { %1272 = vmatprep.mubr.bf16.mxu0 %v1369_v13  ;;  %1288 = vmatprep.mubr.bf16.mxu1 %v1370_v14  ;;  %v281_v12 = vld [vmem:[#allocation2 + $0xc0] sm:$0xff] }
  0x4c   : > { %1273 = vmatmul.mubr.bf16.gmra.mrb[4].mxu0 %v1371_v15  ;;  %1289 = vmatmul.mubr.bf16.gmra.mrb[4].mxu1 %v1372_v16  ;;  %v268_v15 = vld [vmem:[#allocation2 + $0x58] sm:$0xff] }
  0x4d   : > { %1276 = vmatprep.mubr.bf16.mxu0 %v1373_v17  ;;  %1292 = vmatprep.mubr.bf16.mxu1 %v1374_v18  ;;  %v284_v16 = vld [vmem:[#allocation2 + $0xd8] sm:$0xff] }
  0x54   : > { %1277 = vmatmul.mubr.bf16.gmra.mrb[8].mxu0 %v1375_v19  ;;  %1293 = vmatmul.mubr.bf16.gmra.mrb[8].mxu1 %v1376_v20 }
  0x55   : > { %1280 = vmatprep.mubr.bf16.mxu0 %v1377_v21  ;;  %1296 = vmatprep.mubr.bf16.mxu1 %v1378_v22  ;;  %v266_v21 = vld [vmem:[#allocation2 + $0x48] sm:$0xff] }
  0x56   : > { %v282_v22 = vld [vmem:[#allocation2 + $0xc8] sm:$0xff] }
  0x5c   : > { %1281 = vmatmul.mubr.bf16.gmra.mrb[12].mxu0 %v1379_v23  ;;  %1297 = vmatmul.mubr.bf16.gmra.mrb[12].mxu1 %v1380_v24 }
 0x117   : > { %v1270_v29 = vpop.f32.mrb[0].mxu0  ;;  %v1286_v30 = vpop.f32.mrb[0].mxu1 }
 0x118   : > { %v644_v33 = vadd.f32 %v1270_v29, %v259_v25  ;;  %v660_v34 = vadd.f32 %v1286_v30, %v275_v26  ;;  %v515_v35 = vpop.f32.mrb[1].mxu0  ;;  %v579_v36 = vpop.f32.mrb[1].mxu1 }
 0x119   : > { %v642_v39 = vadd.f32 %v515_v35, %v257_v27  ;;  %v658_v40 = vadd.f32 %v579_v36, %v273_v28  ;;  %v1271_v41 = vpop.f32.mrb[2].mxu0  ;;  %v1287_v42 = vpop.f32.mrb[2].mxu1  ;;  %v269_v35 = vld [vmem:[#allocation2 + $0x60] sm:$0xff] }
 0x11a   : > { %676 = vst [vmem:[#allocation2 + $0x10] sm:$0xff] %v644_v33  ;;  %692 = vst [vmem:[#allocation2 + $0x90] sm:$0xff] %v660_v34  ;;  %v645_v43 = vadd.f32 %v1271_v41, %v260_v31  ;;  %v661_v44 = vadd.f32 %v1287_v42, %v276_v32  ;;  %v518_v45 = vpop.f32.mrb[3].mxu0  ;;  %v582_v46 = vpop.f32.mrb[3].mxu1  ;;  %v271_v33 = vld [vmem:[#allocation2 + $0x70] sm:$0xff]  ;;  %v285_v36 = vld [vmem:[#allocation2 + $0xe0] sm:$0xff] }
 0x11b   : > { %674 = vst [vmem:[#allocation2] sm:$0xff] %v642_v39  ;;  %690 = vst [vmem:[#allocation2 + $0x80] sm:$0xff] %v658_v40  ;;  %v643_v47 = vadd.f32 %v518_v45, %v258_v37  ;;  %v659_v48 = vadd.f32 %v582_v46, %v274_v38  ;;  %v287_v34 = vld [vmem:[#allocation2 + $0xf0] sm:$0xff]  ;;  %v272_v39 = vld [vmem:[#allocation2 + $0x78] sm:$0xff] }
 0x11c   : > { %677 = vst [vmem:[#allocation2 + $0x18] sm:$0xff] %v645_v43  ;;  %693 = vst [vmem:[#allocation2 + $0x98] sm:$0xff] %v661_v44  ;;  %v288_v40 = vld [vmem:[#allocation2 + $0xf8] sm:$0xff]  ;;  %v270_v45 = vld [vmem:[#allocation2 + $0x68] sm:$0xff] }
 0x11d   : > { %675 = vst [vmem:[#allocation2 + $0x8] sm:$0xff] %v643_v47  ;;  %691 = vst [vmem:[#allocation2 + $0x88] sm:$0xff] %v659_v48  ;;  %v286_v46 = vld [vmem:[#allocation2 + $0xe8] sm:$0xff] }
 0x11f   : > { %v1274_v53 = vpop.f32.mrb[4].mxu0  ;;  %v1290_v54 = vpop.f32.mrb[4].mxu1 }
 0x120   : > { %v648_v57 = vadd.f32 %v1274_v53, %v263_v49  ;;  %v664_v58 = vadd.f32 %v1290_v54, %v279_v50  ;;  %v531_v59 = vpop.f32.mrb[5].mxu0  ;;  %v595_v60 = vpop.f32.mrb[5].mxu1 }
 0x121   : > { %v646_v63 = vadd.f32 %v531_v59, %v261_v51  ;;  %v662_v0 = vadd.f32 %v595_v60, %v277_v52  ;;  %v1275_v1 = vpop.f32.mrb[6].mxu0  ;;  %v1291_v2 = vpop.f32.mrb[6].mxu1  ;;  %v1520_v59 = vld [vmem:[%s1587_s2] ss:$0 sm:$0xff] (!%p1064_p8) }
 0x122   : > { %680 = vst [vmem:[#allocation2 + $0x30] sm:$0xff] %v648_v57  ;;  %696 = vst [vmem:[#allocation2 + $0xb0] sm:$0xff] %v664_v58  ;;  %v649_v3 = vadd.f32 %v1275_v1, %v264_v55  ;;  %v665_v4 = vadd.f32 %v1291_v2, %v280_v56  ;;  %v534_v5 = vpop.f32.mrb[7].mxu0  ;;  %v598_v6 = vpop.f32.mrb[7].mxu1  ;;  %v710_v57 = vld [vmem:[#allocation2] sm:$0xff] (!%p1064_p8) }
 0x123   : > { %678 = vst [vmem:[#allocation2 + $0x20] sm:$0xff] %v646_v63  ;;  %694 = vst [vmem:[#allocation2 + $0xa0] sm:$0xff] %v662_v0  ;;  %v647_v7 = vadd.f32 %v534_v5, %v262_v61  ;;  %v663_v8 = vadd.f32 %v598_v6, %v278_v62  ;;  %v749_v60 = vadd.f32 (!%p1064_p8), %v1520_v59, %v710_v57  ;;  %v712_v62 = vld [vmem:[#allocation2 + $0x10] sm:$0xff] (!%p1064_p8)  ;;  %v713_v63 = vld [vmem:[#allocation2 + $0x18] sm:$0xff] (!%p1064_p8) }
 0x124   : > { %681 = vst [vmem:[#allocation2 + $0x38] sm:$0xff] %v649_v3  ;;  %697 = vst [vmem:[#allocation2 + $0xb8] sm:$0xff] %v665_v4  ;;  %v711_v58 = vld [vmem:[#allocation2 + $0x8] sm:$0xff] (!%p1064_p8)  ;;  %v751_v1 = vadd.f32 (!%p1064_p8), %v1520_v59, %v712_v62  ;;  %v752_v2 = vadd.f32 (!%p1064_p8), %v1520_v59, %v713_v63 }
 0x125   : > { %679 = vst [vmem:[#allocation2 + $0x28] sm:$0xff] %v647_v7  ;;  %695 = vst [vmem:[#allocation2 + $0xa8] sm:$0xff] %v663_v8  ;;  %v750_v61 = vadd.f32 (!%p1064_p8), %v1520_v59, %v711_v58 }
 0x127   : > { %v1278_v13 = vpop.f32.mrb[8].mxu0  ;;  %v1294_v14 = vpop.f32.mrb[8].mxu1  ;;  %v1136_v7 = vpack.c.bf16 (!%p1064_p8), %v750_v61, %v749_v60 }
 0x128   : > { %v652_v17 = vadd.f32 %v1278_v13, %v267_v9  ;;  %v668_v18 = vadd.f32 %v1294_v14, %v283_v10  ;;  %v547_v19 = vpop.f32.mrb[9].mxu0  ;;  %v611_v20 = vpop.f32.mrb[9].mxu1  ;;  %v1141_v14 = vpack.c.bf16 (!%p1064_p8), %v752_v2, %v751_v1 }
 0x129   : > { %v650_v23 = vadd.f32 %v547_v19, %v265_v11  ;;  %v666_v24 = vadd.f32 %v611_v20, %v281_v12  ;;  %v1279_v25 = vpop.f32.mrb[10].mxu0  ;;  %v1295_v26 = vpop.f32.mrb[10].mxu1  ;;  %v716_v5 = vld [vmem:[#allocation2 + $0x30] sm:$0xff] (!%p1064_p8)  ;;  %1137 = vst [vmem:[%s1489_s6] sm:$0xff] (!%p1064_p8), %v1136_v7  }
 0x12a   : > { %684 = vst [vmem:[#allocation2 + $0x50] sm:$0xff] %v652_v17  ;;  %700 = vst [vmem:[#allocation2 + $0xd0] sm:$0xff] %v668_v18  ;;  %v653_v27 = vadd.f32 %v1279_v25, %v268_v15  ;;  %v669_v28 = vadd.f32 %v1295_v26, %v284_v16  ;;  %v550_v29 = vpop.f32.mrb[11].mxu0  ;;  %v614_v30 = vpop.f32.mrb[11].mxu1  ;;  %v714_v0 = vld [vmem:[#allocation2 + $0x20] sm:$0xff] (!%p1064_p8)  ;;  %v755_v9 = vadd.f32 (!%p1064_p8), %v1520_v59, %v716_v5 }
 0x12b   : > { %682 = vst [vmem:[#allocation2 + $0x40] sm:$0xff] %v650_v23  ;;  %698 = vst [vmem:[#allocation2 + $0xc0] sm:$0xff] %v666_v24  ;;  %v651_v31 = vadd.f32 %v550_v29, %v266_v21  ;;  %v667_v32 = vadd.f32 %v614_v30, %v282_v22  ;;  %v753_v4 = vadd.f32 (!%p1064_p8), %v1520_v59, %v714_v0  ;;  %v717_v6 = vld [vmem:[#allocation2 + $0x38] sm:$0xff] (!%p1064_p8) }
 0x12c   : > { %685 = vst [vmem:[#allocation2 + $0x58] sm:$0xff] %v653_v27  ;;  %701 = vst [vmem:[#allocation2 + $0xd8] sm:$0xff] %v669_v28  ;;  %v715_v3 = vld [vmem:[#allocation2 + $0x28] sm:$0xff] (!%p1064_p8)  ;;  %v756_v10 = vadd.f32 (!%p1064_p8), %v1520_v59, %v717_v6  ;;  %v726_v27 = vld [vmem:[#allocation2 + $0x80] sm:$0xff] (!%p1064_p8) }
 0x12d   : > { %683 = vst [vmem:[#allocation2 + $0x48] sm:$0xff] %v651_v31  ;;  %699 = vst [vmem:[#allocation2 + $0xc8] sm:$0xff] %v667_v32  ;;  %v754_v8 = vadd.f32 (!%p1064_p8), %v1520_v59, %v715_v3  ;;  %v727_v32 = vld [vmem:[#allocation2 + $0x88] sm:$0xff] (!%p1064_p8) }
 0x12e   : > { %v1151_v22 = vpack.c.bf16 (!%p1064_p8), %v756_v10, %v755_v9  ;;  %1213 = vst [vmem:[%s1489_s6 + $0x8] sm:$0xff] (!%p1064_p8), %v1141_v14  }
 0x12f   : > { %v1282_v37 = vpop.f32.mrb[12].mxu0  ;;  %v1298_v38 = vpop.f32.mrb[12].mxu1  ;;  %709 = sbr.rel (%p1064_p8) target bundleno = 323 (0x143), region = 40  ;;  %v1146_v21 = vpack.c.bf16 (!%p1064_p8), %v754_v8, %v753_v4 }
 0x130   : > { %v656_v41 = vadd.f32 %v1282_v37, %v271_v33  ;;  %v672_v42 = vadd.f32 %v1298_v38, %v287_v34  ;;  %v563_v43 = vpop.f32.mrb[13].mxu0  ;;  %v627_v44 = vpop.f32.mrb[13].mxu1  ;;  %v728_v33 = vld [vmem:[#allocation2 + $0x90] sm:$0xff] (!%p1064_p8)  ;;  %v729_v34 = vld [vmem:[#allocation2 + $0x98] sm:$0xff] (!%p1064_p8)  ;;  %1215 = vst [vmem:[%s1489_s6 + $0x18] sm:$0xff] (!%p1064_p8), %v1151_v22   ;;  %v766_v37 = vadd.f32 (!%p1064_p8), %v1520_v59, %v727_v32 }
 0x131   : > { %v654_v47 = vadd.f32 %v563_v43, %v269_v35  ;;  %v670_v48 = vadd.f32 %v627_v44, %v285_v36  ;;  %v1283_v49 = vpop.f32.mrb[14].mxu0  ;;  %v1299_v50 = vpop.f32.mrb[14].mxu1  ;;  %v720_v13 = vld [vmem:[#allocation2 + $0x50] sm:$0xff] (!%p1064_p8)  ;;  %1214 = vst [vmem:[%s1489_s6 + $0x10] sm:$0xff] (!%p1064_p8), %v1146_v21   ;;  %v765_v36 = vadd.f32 (!%p1064_p8), %v1520_v59, %v726_v27  ;;  %v767_v38 = vadd.f32 (!%p1064_p8), %v1520_v59, %v728_v33 }
 0x132   : > { %688 = vst [vmem:[#allocation2 + $0x70] sm:$0xff] %v656_v41  ;;  %704 = vst [vmem:[#allocation2 + $0xf0] sm:$0xff] %v672_v42  ;;  %v657_v51 = vadd.f32 %v1283_v49, %v272_v39  ;;  %v673_v52 = vadd.f32 %v1299_v50, %v288_v40  ;;  %v566_v53 = vpop.f32.mrb[15].mxu0  ;;  %v630_v54 = vpop.f32.mrb[15].mxu1  ;;  %v718_v11 = vld [vmem:[#allocation2 + $0x40] sm:$0xff] (!%p1064_p8)  ;;  %v759_v18 = vadd.f32 (!%p1064_p8), %v1520_v59, %v720_v13  ;;  %v731_v40 = vld [vmem:[#allocation2 + $0xa8] sm:$0xff] (!%p1064_p8) }
 0x133   : > { %686 = vst [vmem:[#allocation2 + $0x60] sm:$0xff] %v654_v47  ;;  %702 = vst [vmem:[#allocation2 + $0xe0] sm:$0xff] %v670_v48  ;;  %v655_v55 = vadd.f32 %v566_v53, %v270_v45  ;;  %v671_v56 = vadd.f32 %v630_v54, %v286_v46  ;;  %v757_v15 = vadd.f32 (!%p1064_p8), %v1520_v59, %v718_v11  ;;  %v721_v17 = vld [vmem:[#allocation2 + $0x58] sm:$0xff] (!%p1064_p8)  ;;  %v730_v39 = vld [vmem:[#allocation2 + $0xa0] sm:$0xff] (!%p1064_p8) }
 0x134   : > { %689 = vst [vmem:[#allocation2 + $0x78] sm:$0xff] %v657_v51  ;;  %705 = vst [vmem:[#allocation2 + $0xf8] sm:$0xff] %v673_v52  ;;  %v719_v12 = vld [vmem:[#allocation2 + $0x48] sm:$0xff] (!%p1064_p8)  ;;  %v760_v23 = vadd.f32 (!%p1064_p8), %v1520_v59, %v721_v17  ;;  %v732_v41 = vld [vmem:[#allocation2 + $0xb0] sm:$0xff] (!%p1064_p8)  ;;  %v768_v44 = vadd.f32 (!%p1064_p8), %v1520_v59, %v729_v34  ;;  %v769_v45 = vadd.f32 (!%p1064_p8), %v1520_v59, %v730_v39 }
 0x135   : > { %687 = vst [vmem:[#allocation2 + $0x68] sm:$0xff] %v655_v55  ;;  %703 = vst [vmem:[#allocation2 + $0xe8] sm:$0xff] %v671_v56  ;;  %v758_v16 = vadd.f32 (!%p1064_p8), %v1520_v59, %v719_v12  ;;  %v733_v46 = vld [vmem:[#allocation2 + $0xb8] sm:$0xff] (!%p1064_p8)  ;;  %v734_v47 = vld [vmem:[#allocation2 + $0xc0] sm:$0xff] (!%p1064_p8)  ;;  %v1176_v49 = vpack.c.bf16 (!%p1064_p8), %v766_v37, %v765_v36  ;;  %v770_v50 = vadd.f32 (!%p1064_p8), %v1520_v59, %v731_v40 }
 0x136   : > { %v1161_v35 = vpack.c.bf16 %v760_v23, %v759_v18  ;;  %v735_v48 = vld [vmem:[#allocation2 + $0xc8] sm:$0xff]  ;;  %v771_v51 = vadd.f32 %v1520_v59, %v732_v41  ;;  %v772_v52 = vadd.f32 %v1520_v59, %v733_v46  ;;  %v736_v53 = vld [vmem:[#allocation2 + $0xd0] sm:$0xff]  ;;  %v737_v54 = vld [vmem:[#allocation2 + $0xd8] sm:$0xff]  ;;  %v1181_v56 = vpack.c.bf16 %v768_v44, %v767_v38 }
 0x137   : > { %v1156_v28 = vpack.c.bf16 %v758_v16, %v757_v15  ;;  %v773_v57 = vadd.f32 %v1520_v59, %v734_v47  ;;  %v774_v58 = vadd.f32 %v1520_v59, %v735_v48  ;;  %v775_v60 = vadd.f32 %v1520_v59, %v736_v53  ;;  %1220 = vst [vmem:[%s1489_s6 + $0x40] sm:$0xff] %v1176_v49  }
 0x138   : > { %1217 = vst [vmem:[%s1489_s6 + $0x28] sm:$0xff] %v1161_v35   ;;  %v1186_v0 = vpack.c.bf16 %v770_v50, %v769_v45  ;;  %v1191_v1 = vpack.c.bf16 %v772_v52, %v771_v51  ;;  %v776_v2 = vadd.f32 %v1520_v59, %v737_v54  ;;  %1221 = vst [vmem:[%s1489_s6 + $0x48] sm:$0xff] %v1181_v56  }
 0x139   : > { %v724_v25 = vld [vmem:[#allocation2 + $0x70] sm:$0xff]  ;;  %1216 = vst [vmem:[%s1489_s6 + $0x20] sm:$0xff] %v1156_v28   ;;  %v1196_v4 = vpack.c.bf16 %v774_v58, %v773_v57 }
 0x13a   : > { %v722_v19 = vld [vmem:[#allocation2 + $0x60] sm:$0xff]  ;;  %v763_v30 = vadd.f32 %v1520_v59, %v724_v25  ;;  %v740_v62 = vld [vmem:[#allocation2 + $0xf0] sm:$0xff]  ;;  %1222 = vst [vmem:[%s1489_s6 + $0x50] sm:$0xff] %v1186_v0   ;;  %1223 = vst [vmem:[%s1489_s6 + $0x58] sm:$0xff] %v1191_v1   ;;  %v1201_v8 = vpack.c.bf16 %v776_v2, %v775_v60 }
 0x13b   : > { %v761_v24 = vadd.f32 %v1520_v59, %v722_v19  ;;  %v725_v26 = vld [vmem:[#allocation2 + $0x78] sm:$0xff]  ;;  %v738_v55 = vld [vmem:[#allocation2 + $0xe0] sm:$0xff]  ;;  %v779_v6 = vadd.f32 %v1520_v59, %v740_v62  ;;  %1224 = vst [vmem:[%s1489_s6 + $0x60] sm:$0xff] %v1196_v4  }
 0x13c   : > { %v723_v20 = vld [vmem:[#allocation2 + $0x68] sm:$0xff]  ;;  %v764_v31 = vadd.f32 %v1520_v59, %v725_v26  ;;  %v741_v63 = vld [vmem:[#allocation2 + $0xf8] sm:$0xff]  ;;  %v777_v3 = vadd.f32 %v1520_v59, %v738_v55  ;;  %1225 = vst [vmem:[%s1489_s6 + $0x68] sm:$0xff] %v1201_v8  }
 0x13d   : > { %v762_v29 = vadd.f32 %v1520_v59, %v723_v20  ;;  %v739_v61 = vld [vmem:[#allocation2 + $0xe8] sm:$0xff]  ;;  %v780_v7 = vadd.f32 %v1520_v59, %v741_v63 }
 0x13e   : > { %v1171_v43 = vpack.c.bf16 %v764_v31, %v763_v30  ;;  %v778_v5 = vadd.f32 %v1520_v59, %v739_v61 }
 0x13f   : > { %v1166_v42 = vpack.c.bf16 %v762_v29, %v761_v24  ;;  %v1211_v10 = vpack.c.bf16 %v780_v7, %v779_v6 }
 0x140   : > { %1219 = vst [vmem:[%s1489_s6 + $0x38] sm:$0xff] %v1171_v43   ;;  %v1206_v9 = vpack.c.bf16 %v778_v5, %v777_v3 }
 0x141   : > { %1218 = vst [vmem:[%s1489_s6 + $0x30] sm:$0xff] %v1166_v42   ;;  %1227 = vst [vmem:[%s1489_s6 + $0x78] sm:$0xff] %v1211_v10  }
 0x142   : > { %1226 = vst [vmem:[%s1489_s6 + $0x70] sm:$0xff] %v1206_v9  }
 0x143 PF: > { %s13_s16 = sadd.s32 1, %s1419_s16   ;;  %s1589_s12 = smov %s1411_s14 }
 0x144   : > { %p10_p9 = scmp.ge.s32.totalorder %s13_s16, 20   ;;  %s1590_s13 = smov %s1415_s15 }
 0x145   : > { %s1591_s14 = smov %s1594_s17  ;;  %s1592_s15 = smov %s1598_s18 }
 0x146   :  { %12 = sbr.rel (!%p10_p9) target bundleno = 3 (0x3), region = 73 }

// kernel: _lambda_.15
= control target key start
LH: loop header
LB: loop body
LE: loop exit
PB: predicated region body
PF: predicated region fallthrough
CT: control target
= control target key end

     0   :  { %s1618_s18 = smov 0   ;;  %s1620_s19 = smov 0   ;;  %s1835_s0 = inlined_call_operand.vmem [shape: bf16[9,512,128], index: 0, kind: input, shape index: {}]   ;;  %s1836_s1 = inlined_call_operand.vmem [shape: bf16[9,128,128], index: 1, kind: input, shape index: {}]   ;;  %s1837_s2 = inlined_call_operand.vmem [shape: f32[1,128], index: 2, kind: input, shape index: {}]   ;;  %s1838_s3 = inlined_call_operand.vmem [shape: f32[1,128], index: 3, kind: input, shape index: {}]   ;;  %s1839_s4 = inlined_call_operand.vmem [shape: f32[1,128], index: 4, kind: input, shape index: {}]   ;;  %s1840_s5 = inlined_call_operand.vmem [shape: bf16[512,128], index: 5, kind: output, shape index: {}]  }
   0x1   :  { %s1622_s20 = smov 0   ;;  %s1624_s21 = smov 0  }
   0x2   :  { %s1626_s22 = smov 0  }
   0x3 LB: > { %s24_s23 = sadd.s32 1, %s1577_s20  ;;  %s27_s24 = sadd.s32 1, %s1581_s21  ;;  %s1585_s22 = sphi %s1626_s22, %s15_s22   ;;  %s1581_s21 = sphi %s1624_s21, %s1844_s21   ;;  %s1577_s20 = sphi %s1622_s20, %s1843_s20   ;;  %s1573_s19 = sphi %s1620_s19, %s1842_s19   ;;  %s1569_s18 = sphi %s1618_s18, %s1841_s18  }
   0x4   : > { %p25_p0 = scmp.ge.s32.totalorder %s24_s23, 9  ;;  %p1195_p1 = scmp.ge.s32.totalorder %s1585_s22, 1 }
   0x5   : > { %p216_p2 = scmp.lt.s32.totalorder %s1585_s22, 19 }
   0x6   : > { %s1846_s23 = smov (%p25_p0, %s24_s23), 0  ;;  %s1848_s24 = smov (!%p25_p0, %s27_s24), %s1581_s21 }
   0x7   : > { %p217_p3 = pnand %p1195_p1, %p216_p2  ;;  %p29_p4 = scmp.ge.s32.totalorder %s1848_s24, 2 }
   0x8   : > { %s1196_s25 = sshll.u32 (!%p217_p3), %s1573_s19, 5  ;;  %p254_p5 = scmp.lt.s32.totalorder (!%p217_p3), %s1569_s18, 8 }
   0x9   : > { %s1850_s24 = smov (%p29_p4, %s1848_s24), 0  ;;  %220 = sbr.rel (%p217_p3) target bundleno = 344 (0x158), region = 40 }
   0xa   : > { %p256_p6 = scmp.lt.s32.totalorder (!%p217_p3), %s1196_s25, 63  ;;  %p1203_p7 = scmp.ne.s32.totalorder (!%p217_p3), %s1569_s18, 0 }
  0x10   : > { %s255_s26 = scalar_select %p254_p5, %s1569_s18, 8 }
  0x11   : > { %s1852_s25 = smov (!%p256_p6, %s1196_s25), 63  ;;  %278 = sbr.rel (%p1203_p7) target bundleno = 35 (0x23), region = 44 }
  0x12   : > { %s1197_s27 = sshll.u32 %s255_s26, 6  ;;  %s1202_s8 = sshll.u32 %s1852_s25, 2  ;;  %v1587_v0 = vmov (!%p1203_p7), 0.0  }
  0x13   : > { %s259_s28 = sadd.s32 %s1197_s27, %s1852_s25  ;;  %s1655_s6 = scalar_lea.vmem %s1836_s1, %s1197_s27  ;;  %279 = vst [vmem:[#allocation2] sm:$0xff] (!%p1203_p7), %v1587_v0  ;;  %280 = vst [vmem:[#allocation2 + $0x8] sm:$0xff] (!%p1203_p7), %v1587_v0 }
  0x14   : > { %s1198_s7 = sshll.u32 %s259_s28, 2  ;;  %s1665_s14 = scalar_lea.vmem %s1840_s5, %s1202_s8  ;;  %281 = vst [vmem:[#allocation2 + $0x10] sm:$0xff] (!%p1203_p7), %v1587_v0  ;;  %282 = vst [vmem:[#allocation2 + $0x18] sm:$0xff] (!%p1203_p7), %v1587_v0 }
  0x15   : > { %s1660_s11 = scalar_lea.vmem %s1835_s0, %s1198_s7  ;;  %283 = vst [vmem:[#allocation2 + $0x20] sm:$0xff] (!%p1203_p7), %v1587_v0  ;;  %284 = vst [vmem:[#allocation2 + $0x28] sm:$0xff] (!%p1203_p7), %v1587_v0 }
  0x16   : > { %285 = vst [vmem:[#allocation2 + $0x30] sm:$0xff] (!%p1203_p7), %v1587_v0  ;;  %286 = vst [vmem:[#allocation2 + $0x38] sm:$0xff] (!%p1203_p7), %v1587_v0 }
  0x17   : > { %287 = vst [vmem:[#allocation2 + $0x40] sm:$0xff] (!%p1203_p7), %v1587_v0  ;;  %288 = vst [vmem:[#allocation2 + $0x48] sm:$0xff] (!%p1203_p7), %v1587_v0 }
  0x18   : > { %289 = vst [vmem:[#allocation2 + $0x50] sm:$0xff] %v1587_v0  ;;  %290 = vst [vmem:[#allocation2 + $0x58] sm:$0xff] %v1587_v0 }
  0x19   : > { %291 = vst [vmem:[#allocation2 + $0x60] sm:$0xff] %v1587_v0  ;;  %292 = vst [vmem:[#allocation2 + $0x68] sm:$0xff] %v1587_v0 }
  0x1a   : > { %293 = vst [vmem:[#allocation2 + $0x70] sm:$0xff] %v1587_v0  ;;  %294 = vst [vmem:[#allocation2 + $0x78] sm:$0xff] %v1587_v0 }
  0x1b   : > { %295 = vst [vmem:[#allocation2 + $0x80] sm:$0xff] %v1587_v0  ;;  %296 = vst [vmem:[#allocation2 + $0x88] sm:$0xff] %v1587_v0 }
  0x1c   : > { %297 = vst [vmem:[#allocation2 + $0x90] sm:$0xff] %v1587_v0  ;;  %298 = vst [vmem:[#allocation2 + $0x98] sm:$0xff] %v1587_v0 }
  0x1d   : > { %299 = vst [vmem:[#allocation2 + $0xa0] sm:$0xff] %v1587_v0  ;;  %300 = vst [vmem:[#allocation2 + $0xa8] sm:$0xff] %v1587_v0 }
  0x1e   : > { %301 = vst [vmem:[#allocation2 + $0xb0] sm:$0xff] %v1587_v0  ;;  %302 = vst [vmem:[#allocation2 + $0xb8] sm:$0xff] %v1587_v0 }
  0x1f   : > { %303 = vst [vmem:[#allocation2 + $0xc0] sm:$0xff] %v1587_v0  ;;  %304 = vst [vmem:[#allocation2 + $0xc8] sm:$0xff] %v1587_v0 }
  0x20   : > { %305 = vst [vmem:[#allocation2 + $0xd0] sm:$0xff] %v1587_v0  ;;  %306 = vst [vmem:[#allocation2 + $0xd8] sm:$0xff] %v1587_v0 }
  0x21   : > { %307 = vst [vmem:[#allocation2 + $0xe0] sm:$0xff] %v1587_v0  ;;  %308 = vst [vmem:[#allocation2 + $0xe8] sm:$0xff] %v1587_v0 }
  0x22   : > { %309 = vst [vmem:[#allocation2 + $0xf0] sm:$0xff] %v1587_v0  ;;  %310 = vst [vmem:[#allocation2 + $0xf8] sm:$0xff] %v1587_v0 }
  0x23 PF: > { %v1523_v1 = vld [vmem:[%s1655_s6] sm:$0xff]   ;;  %v1524_v2 = vld [vmem:[%s1655_s6 + $0x8] sm:$0xff]   ;;  %v1525_v3 = vld [vmem:[%s1655_s6 + $0x10] sm:$0xff]   ;;  %p1228_p8 = scmp.ne.s32.totalorder %s1569_s18, 8 }
  0x24   : > { %1418 = vmatprep.subr.bf16.mxu0 %v1523_v1  ;;  %1466 = vmatprep.subr.bf16.mxu1 %v1523_v1  ;;  %v1526_v4 = vld [vmem:[%s1655_s6 + $0x18] sm:$0xff]   ;;  %v1531_v5 = vld [vmem:[%s1660_s11] sm:$0xff]   ;;  %v1528_v8 = vld [vmem:[%s1655_s6 + $0x28] sm:$0xff]  }
  0x25   : > { %1419 = vmatpush3.bf16.msra.mxu0 %v1523_v1  ;;  %1474 = vmatpush3.bf16.msra.mxu1 %v1523_v1  ;;  %v1532_v6 = vld [vmem:[%s1660_s11 + $0x40] sm:$0xff]   ;;  %v1529_v9 = vld [vmem:[%s1655_s6 + $0x30] sm:$0xff]   ;;  %v1530_v10 = vld [vmem:[%s1655_s6 + $0x38] sm:$0xff]  }
  0x26   : > { %1420 = vmatprep.subr.bf16.mxu0 %v1524_v2  ;;  %1467 = vmatprep.subr.bf16.mxu1 %v1524_v2  ;;  %v1527_v7 = vld [vmem:[%s1655_s6 + $0x20] sm:$0xff]   ;;  %v1533_v11 = vld [vmem:[%s1660_s11 + $0x8] sm:$0xff]   ;;  %v1535_v13 = vld [vmem:[%s1660_s11 + $0x10] sm:$0xff]  }
  0x27   : > { %1434 = vmatprep.mubr.bf16.mxu0 %v1531_v5  ;;  %1450 = vmatprep.mubr.bf16.mxu1 %v1532_v6  ;;  %v1534_v12 = vld [vmem:[%s1660_s11 + $0x48] sm:$0xff]   ;;  %v1536_v14 = vld [vmem:[%s1660_s11 + $0x50] sm:$0xff]   ;;  %v1537_v15 = vld [vmem:[%s1660_s11 + $0x18] sm:$0xff]  }
  0x28   : > { %v1538_v16 = vld [vmem:[%s1660_s11 + $0x58] sm:$0xff]   ;;  %v1539_v17 = vld [vmem:[%s1660_s11 + $0x20] sm:$0xff]   ;;  %v1541_v19 = vld [vmem:[%s1660_s11 + $0x28] sm:$0xff]  }
  0x29   : > { %1421 = vmatpush3.bf16.msra.mxu0 %v1524_v2  ;;  %1475 = vmatpush3.bf16.msra.mxu1 %v1524_v2  ;;  %v1540_v18 = vld [vmem:[%s1660_s11 + $0x60] sm:$0xff]   ;;  %v1542_v20 = vld [vmem:[%s1660_s11 + $0x68] sm:$0xff]   ;;  %v1543_v21 = vld [vmem:[%s1660_s11 + $0x30] sm:$0xff]  }
  0x2a   : > { %1422 = vmatprep.subr.bf16.mxu0 %v1525_v3  ;;  %1468 = vmatprep.subr.bf16.mxu1 %v1525_v3  ;;  %v1544_v22 = vld [vmem:[%s1660_s11 + $0x70] sm:$0xff]   ;;  %v1545_v23 = vld [vmem:[%s1660_s11 + $0x38] sm:$0xff]   ;;  %v311_v27 = vld [vmem:[#allocation2] sm:$0xff] }
  0x2b   : > { %v1546_v24 = vld [vmem:[%s1660_s11 + $0x78] sm:$0xff]   ;;  %v313_v25 = vld [vmem:[#allocation2 + $0x10] sm:$0xff]  ;;  %v327_v28 = vld [vmem:[#allocation2 + $0x80] sm:$0xff] }
  0x2c   : > { %v329_v26 = vld [vmem:[#allocation2 + $0x90] sm:$0xff]  ;;  %v314_v31 = vld [vmem:[#allocation2 + $0x18] sm:$0xff]  ;;  %v312_v37 = vld [vmem:[#allocation2 + $0x8] sm:$0xff] }
  0x2d   : > { %1423 = vmatpush3.bf16.msra.mxu0 %v1525_v3  ;;  %1476 = vmatpush3.bf16.msra.mxu1 %v1525_v3  ;;  %v330_v32 = vld [vmem:[#allocation2 + $0x98] sm:$0xff]  ;;  %v328_v38 = vld [vmem:[#allocation2 + $0x88] sm:$0xff]  ;;  %v317_v49 = vld [vmem:[#allocation2 + $0x30] sm:$0xff] }
  0x2e   : > { %1424 = vmatprep.subr.bf16.mxu0 %v1526_v4  ;;  %1469 = vmatprep.subr.bf16.mxu1 %v1526_v4  ;;  %v333_v50 = vld [vmem:[#allocation2 + $0xb0] sm:$0xff]  ;;  %v315_v51 = vld [vmem:[#allocation2 + $0x20] sm:$0xff]  ;;  %v318_v55 = vld [vmem:[#allocation2 + $0x38] sm:$0xff] }
  0x2f   : > { %v331_v52 = vld [vmem:[#allocation2 + $0xa0] sm:$0xff]  ;;  %v334_v56 = vld [vmem:[#allocation2 + $0xb8] sm:$0xff]  ;;  %v316_v61 = vld [vmem:[#allocation2 + $0x28] sm:$0xff] }
  0x30   : > { %v332_v62 = vld [vmem:[#allocation2 + $0xa8] sm:$0xff] }
  0x31   : > { %1425 = vmatpush3.bf16.msra.mxu0 %v1526_v4  ;;  %1477 = vmatpush3.bf16.msra.mxu1 %v1526_v4 }
  0x32   : > { %1426 = vmatprep.subr.bf16.mxu0 %v1527_v7  ;;  %1470 = vmatprep.subr.bf16.mxu1 %v1527_v7 }
  0x35   : > { %1427 = vmatpush3.bf16.msra.mxu0 %v1527_v7  ;;  %1478 = vmatpush3.bf16.msra.mxu1 %v1527_v7 }
  0x36   : > { %1428 = vmatprep.subr.bf16.mxu0 %v1528_v8  ;;  %1471 = vmatprep.subr.bf16.mxu1 %v1528_v8 }
  0x39   : > { %1429 = vmatpush3.bf16.msra.mxu0 %v1528_v8  ;;  %1479 = vmatpush3.bf16.msra.mxu1 %v1528_v8 }
  0x3a   : > { %1430 = vmatprep.subr.bf16.mxu0 %v1529_v9  ;;  %1472 = vmatprep.subr.bf16.mxu1 %v1529_v9 }
  0x3d   : > { %1431 = vmatpush3.bf16.msra.mxu0 %v1529_v9  ;;  %1480 = vmatpush3.bf16.msra.mxu1 %v1529_v9  ;;  %v321_v9 = vld [vmem:[#allocation2 + $0x50] sm:$0xff] }
  0x3e   : > { %1432 = vmatprep.subr.bf16.mxu0 %v1530_v10  ;;  %1473 = vmatprep.subr.bf16.mxu1 %v1530_v10 }
  0x41   : > { %1433 = vmatpush3.bf16.msra.mxu0 %v1530_v10  ;;  %1481 = vmatpush3.bf16.msra.mxu1 %v1530_v10  ;;  %v337_v10 = vld [vmem:[#allocation2 + $0xd0] sm:$0xff] }
  0x44   : > { %1435 = vmatmul.mubr.bf16.vlgmr.msra.gmra.mrb[0].mxu0 %v1533_v11  ;;  %1451 = vmatmul.mubr.bf16.vlgmr.msra.gmra.mrb[0].mxu1 %v1534_v12  ;;  %v319_v11 = vld [vmem:[#allocation2 + $0x40] sm:$0xff] }
  0x45   : > { %1438 = vmatprep.mubr.bf16.mxu0 %v1535_v13  ;;  %1454 = vmatprep.mubr.bf16.mxu1 %v1536_v14  ;;  %v335_v12 = vld [vmem:[#allocation2 + $0xc0] sm:$0xff] }
  0x4c   : > { %1439 = vmatmul.mubr.bf16.gmra.mrb[4].mxu0 %v1537_v15  ;;  %1455 = vmatmul.mubr.bf16.gmra.mrb[4].mxu1 %v1538_v16  ;;  %v322_v15 = vld [vmem:[#allocation2 + $0x58] sm:$0xff] }
  0x4d   : > { %1442 = vmatprep.mubr.bf16.mxu0 %v1539_v17  ;;  %1458 = vmatprep.mubr.bf16.mxu1 %v1540_v18  ;;  %v338_v16 = vld [vmem:[#allocation2 + $0xd8] sm:$0xff] }
  0x54   : > { %1443 = vmatmul.mubr.bf16.gmra.mrb[8].mxu0 %v1541_v19  ;;  %1459 = vmatmul.mubr.bf16.gmra.mrb[8].mxu1 %v1542_v20 }
  0x55   : > { %1446 = vmatprep.mubr.bf16.mxu0 %v1543_v21  ;;  %1462 = vmatprep.mubr.bf16.mxu1 %v1544_v22  ;;  %v320_v21 = vld [vmem:[#allocation2 + $0x48] sm:$0xff] }
  0x56   : > { %v336_v22 = vld [vmem:[#allocation2 + $0xc8] sm:$0xff] }
  0x5c   : > { %1447 = vmatmul.mubr.bf16.gmra.mrb[12].mxu0 %v1545_v23  ;;  %1463 = vmatmul.mubr.bf16.gmra.mrb[12].mxu1 %v1546_v24 }
 0x117   : > { %v1436_v29 = vpop.f32.mrb[0].mxu0  ;;  %v1452_v30 = vpop.f32.mrb[0].mxu1 }
 0x118   : > { %v698_v33 = vadd.f32 %v1436_v29, %v313_v25  ;;  %v714_v34 = vadd.f32 %v1452_v30, %v329_v26  ;;  %v569_v35 = vpop.f32.mrb[1].mxu0  ;;  %v633_v36 = vpop.f32.mrb[1].mxu1 }
 0x119   : > { %v696_v39 = vadd.f32 %v569_v35, %v311_v27  ;;  %v712_v40 = vadd.f32 %v633_v36, %v327_v28  ;;  %v1437_v41 = vpop.f32.mrb[2].mxu0  ;;  %v1453_v42 = vpop.f32.mrb[2].mxu1  ;;  %v323_v35 = vld [vmem:[#allocation2 + $0x60] sm:$0xff] }
 0x11a   : > { %730 = vst [vmem:[#allocation2 + $0x10] sm:$0xff] %v698_v33  ;;  %746 = vst [vmem:[#allocation2 + $0x90] sm:$0xff] %v714_v34  ;;  %v699_v43 = vadd.f32 %v1437_v41, %v314_v31  ;;  %v715_v44 = vadd.f32 %v1453_v42, %v330_v32  ;;  %v572_v45 = vpop.f32.mrb[3].mxu0  ;;  %v636_v46 = vpop.f32.mrb[3].mxu1  ;;  %v325_v33 = vld [vmem:[#allocation2 + $0x70] sm:$0xff]  ;;  %v339_v36 = vld [vmem:[#allocation2 + $0xe0] sm:$0xff] }
 0x11b   : > { %728 = vst [vmem:[#allocation2] sm:$0xff] %v696_v39  ;;  %744 = vst [vmem:[#allocation2 + $0x80] sm:$0xff] %v712_v40  ;;  %v697_v47 = vadd.f32 %v572_v45, %v312_v37  ;;  %v713_v48 = vadd.f32 %v636_v46, %v328_v38  ;;  %v341_v34 = vld [vmem:[#allocation2 + $0xf0] sm:$0xff]  ;;  %v326_v39 = vld [vmem:[#allocation2 + $0x78] sm:$0xff] }
 0x11c   : > { %731 = vst [vmem:[#allocation2 + $0x18] sm:$0xff] %v699_v43  ;;  %747 = vst [vmem:[#allocation2 + $0x98] sm:$0xff] %v715_v44  ;;  %v342_v40 = vld [vmem:[#allocation2 + $0xf8] sm:$0xff]  ;;  %v324_v45 = vld [vmem:[#allocation2 + $0x68] sm:$0xff] }
 0x11d   : > { %729 = vst [vmem:[#allocation2 + $0x8] sm:$0xff] %v697_v47  ;;  %745 = vst [vmem:[#allocation2 + $0x88] sm:$0xff] %v713_v48  ;;  %v340_v46 = vld [vmem:[#allocation2 + $0xe8] sm:$0xff] }
 0x11f   : > { %v1440_v53 = vpop.f32.mrb[4].mxu0  ;;  %v1456_v54 = vpop.f32.mrb[4].mxu1 }
 0x120   : > { %v702_v57 = vadd.f32 %v1440_v53, %v317_v49  ;;  %v718_v58 = vadd.f32 %v1456_v54, %v333_v50  ;;  %v585_v59 = vpop.f32.mrb[5].mxu0  ;;  %v649_v60 = vpop.f32.mrb[5].mxu1 }
 0x121   : > { %v700_v63 = vadd.f32 %v585_v59, %v315_v51  ;;  %v716_v0 = vadd.f32 %v649_v60, %v331_v52  ;;  %v1441_v1 = vpop.f32.mrb[6].mxu0  ;;  %v1457_v2 = vpop.f32.mrb[6].mxu1  ;;  %v1696_v59 = vld [vmem:[%s1837_s2] ss:$0 sm:$0xff] (!%p1228_p8) }
 0x122   : > { %734 = vst [vmem:[#allocation2 + $0x30] sm:$0xff] %v702_v57  ;;  %750 = vst [vmem:[#allocation2 + $0xb0] sm:$0xff] %v718_v58  ;;  %v703_v3 = vadd.f32 %v1441_v1, %v318_v55  ;;  %v719_v4 = vadd.f32 %v1457_v2, %v334_v56  ;;  %v588_v5 = vpop.f32.mrb[7].mxu0  ;;  %v652_v6 = vpop.f32.mrb[7].mxu1  ;;  %v764_v57 = vld [vmem:[#allocation2] sm:$0xff] (!%p1228_p8) }
 0x123   : > { %732 = vst [vmem:[#allocation2 + $0x20] sm:$0xff] %v700_v63  ;;  %748 = vst [vmem:[#allocation2 + $0xa0] sm:$0xff] %v716_v0  ;;  %v701_v7 = vadd.f32 %v588_v5, %v316_v61  ;;  %v717_v8 = vadd.f32 %v652_v6, %v332_v62  ;;  %v803_v60 = vadd.f32 (!%p1228_p8), %v1696_v59, %v764_v57  ;;  %v1703_v62 = vld [vmem:[%s1838_s3] ss:$0 sm:$0xff] (!%p1228_p8)  ;;  %v766_v0 = vld [vmem:[#allocation2 + $0x10] sm:$0xff] (!%p1228_p8) }
 0x124   : > { %735 = vst [vmem:[#allocation2 + $0x38] sm:$0xff] %v703_v3  ;;  %751 = vst [vmem:[#allocation2 + $0xb8] sm:$0xff] %v719_v4  ;;  %v765_v58 = vld [vmem:[#allocation2 + $0x8] sm:$0xff] (!%p1228_p8)  ;;  %v1708_v63 = vld [vmem:[%s1839_s4] ss:$0 sm:$0xff] (!%p1228_p8)  ;;  %v805_v2 = vadd.f32 (!%p1228_p8), %v1696_v59, %v766_v0 }
 0x125   : > { %733 = vst [vmem:[#allocation2 + $0x28] sm:$0xff] %v701_v7  ;;  %749 = vst [vmem:[#allocation2 + $0xa8] sm:$0xff] %v717_v8  ;;  %v804_v61 = vadd.f32 (!%p1228_p8), %v1696_v59, %v765_v58  ;;  %v767_v1 = vld [vmem:[#allocation2 + $0x18] sm:$0xff] (!%p1228_p8)  ;;  %v842_v5 = vmul.f32 (!%p1228_p8), %v1703_v62, %v803_v60 }
 0x126   : > { %v806_v7 = vadd.f32 (!%p1228_p8), %v1696_v59, %v767_v1 }
 0x127   : > { %v1444_v13 = vpop.f32.mrb[8].mxu0  ;;  %v1460_v14 = vpop.f32.mrb[8].mxu1  ;;  %v843_v6 = vmul.f32 (!%p1228_p8), %v1703_v62, %v804_v61 }
 0x128   : > { %v706_v17 = vadd.f32 %v1444_v13, %v321_v9  ;;  %v722_v18 = vadd.f32 %v1460_v14, %v337_v10  ;;  %v601_v19 = vpop.f32.mrb[9].mxu0  ;;  %v665_v20 = vpop.f32.mrb[9].mxu1 }
 0x129   : > { %v704_v23 = vadd.f32 %v601_v19, %v319_v11  ;;  %v720_v24 = vadd.f32 %v665_v20, %v335_v12  ;;  %v1445_v25 = vpop.f32.mrb[10].mxu0  ;;  %v1461_v26 = vpop.f32.mrb[10].mxu1  ;;  %v770_v9 = vld [vmem:[#allocation2 + $0x30] sm:$0xff] (!%p1228_p8)  ;;  %v844_v11 = vmul.f32 (!%p1228_p8), %v1703_v62, %v805_v2  ;;  %v780_v2 = vld [vmem:[#allocation2 + $0x80] sm:$0xff] (!%p1228_p8) }
 0x12a   : > { %738 = vst [vmem:[#allocation2 + $0x50] sm:$0xff] %v706_v17  ;;  %754 = vst [vmem:[#allocation2 + $0xd0] sm:$0xff] %v722_v18  ;;  %v707_v27 = vadd.f32 %v1445_v25, %v322_v15  ;;  %v723_v28 = vadd.f32 %v1461_v26, %v338_v16  ;;  %v604_v29 = vpop.f32.mrb[11].mxu0  ;;  %v668_v30 = vpop.f32.mrb[11].mxu1  ;;  %v768_v3 = vld [vmem:[#allocation2 + $0x20] sm:$0xff] (!%p1228_p8)  ;;  %v809_v13 = vadd.f32 (!%p1228_p8), %v1696_v59, %v770_v9 }
 0x12b   : > { %736 = vst [vmem:[#allocation2 + $0x40] sm:$0xff] %v704_v23  ;;  %752 = vst [vmem:[#allocation2 + $0xc0] sm:$0xff] %v720_v24  ;;  %v705_v31 = vadd.f32 %v604_v29, %v320_v21  ;;  %v721_v32 = vadd.f32 %v668_v30, %v336_v22  ;;  %v807_v8 = vadd.f32 (!%p1228_p8), %v1696_v59, %v768_v3  ;;  %v771_v10 = vld [vmem:[#allocation2 + $0x38] sm:$0xff] (!%p1228_p8) }
 0x12c   : > { %739 = vst [vmem:[#allocation2 + $0x58] sm:$0xff] %v707_v27  ;;  %755 = vst [vmem:[#allocation2 + $0xd8] sm:$0xff] %v723_v28  ;;  %v769_v4 = vld [vmem:[#allocation2 + $0x28] sm:$0xff] (!%p1228_p8)  ;;  %v810_v14 = vadd.f32 (!%p1228_p8), %v1696_v59, %v771_v10  ;;  %v881_v15 = vadd.f32 (!%p1228_p8), %v1708_v63, %v842_v5  ;;  %v882_v16 = vadd.f32 (!%p1228_p8), %v1708_v63, %v843_v6 }
 0x12d   : > { %737 = vst [vmem:[#allocation2 + $0x48] sm:$0xff] %v705_v31  ;;  %753 = vst [vmem:[#allocation2 + $0xc8] sm:$0xff] %v721_v32  ;;  %v808_v12 = vadd.f32 (!%p1228_p8), %v1696_v59, %v769_v4  ;;  %v845_v17 = vmul.f32 (!%p1228_p8), %v1703_v62, %v806_v7  ;;  %v846_v18 = vmul.f32 (!%p1228_p8), %v1703_v62, %v807_v8 }
 0x12e   : > { %v883_v19 = vadd.f32 (!%p1228_p8), %v1708_v63, %v844_v11  ;;  %v848_v21 = vmul.f32 (!%p1228_p8), %v1703_v62, %v809_v13  ;;  %v849_v22 = vmul.f32 (!%p1228_p8), %v1703_v62, %v810_v14  ;;  %v913_v24 = vmax.f32 (!%p1228_p8), %v881_v15, 0.0  ;;  %v781_v11 = vld [vmem:[#allocation2 + $0x88] sm:$0xff] (!%p1228_p8) }
 0x12f   : > { %v1448_v37 = vpop.f32.mrb[12].mxu0  ;;  %v1464_v38 = vpop.f32.mrb[12].mxu1  ;;  %763 = sbr.rel (%p1228_p8) target bundleno = 344 (0x158), region = 48  ;;  %v847_v20 = vmul.f32 (!%p1228_p8), %v1703_v62, %v808_v12  ;;  %v914_v25 = vmax.f32 (!%p1228_p8), %v882_v16, 0.0  ;;  %v884_v26 = vadd.f32 (!%p1228_p8), %v1708_v63, %v845_v17  ;;  %v885_v27 = vadd.f32 (!%p1228_p8), %v1708_v63, %v846_v18  ;;  %v782_v16 = vld [vmem:[#allocation2 + $0x90] sm:$0xff] (!%p1228_p8)  ;;  %v783_v17 = vld [vmem:[#allocation2 + $0x98] sm:$0xff] (!%p1228_p8) }
 0x130   : > { %v710_v41 = vadd.f32 %v1448_v37, %v325_v33  ;;  %v726_v42 = vadd.f32 %v1464_v38, %v341_v34  ;;  %v617_v43 = vpop.f32.mrb[13].mxu0  ;;  %v681_v44 = vpop.f32.mrb[13].mxu1  ;;  %v915_v29 = vmax.f32 (!%p1228_p8), %v883_v19, 0.0  ;;  %v887_v31 = vadd.f32 (!%p1228_p8), %v1708_v63, %v848_v21 }
 0x131   : > { %v708_v47 = vadd.f32 %v617_v43, %v323_v35  ;;  %v724_v48 = vadd.f32 %v681_v44, %v339_v36  ;;  %v1449_v49 = vpop.f32.mrb[14].mxu0  ;;  %v1465_v50 = vpop.f32.mrb[14].mxu1  ;;  %v886_v30 = vadd.f32 (!%p1228_p8), %v1708_v63, %v847_v20  ;;  %v888_v32 = vadd.f32 (!%p1228_p8), %v1708_v63, %v849_v22  ;;  %v774_v33 = vld [vmem:[#allocation2 + $0x50] sm:$0xff] (!%p1228_p8)  ;;  %v784_v22 = vld [vmem:[#allocation2 + $0xa0] sm:$0xff] (!%p1228_p8) }
 0x132   : > { %742 = vst [vmem:[#allocation2 + $0x70] sm:$0xff] %v710_v41  ;;  %758 = vst [vmem:[#allocation2 + $0xf0] sm:$0xff] %v726_v42  ;;  %v711_v51 = vadd.f32 %v1449_v49, %v326_v39  ;;  %v727_v52 = vadd.f32 %v1465_v50, %v342_v40  ;;  %v620_v53 = vpop.f32.mrb[15].mxu0  ;;  %v684_v54 = vpop.f32.mrb[15].mxu1  ;;  %v772_v23 = vld [vmem:[#allocation2 + $0x40] sm:$0xff] (!%p1228_p8)  ;;  %v1302_v35 = vpack.c.bf16 (!%p1228_p8), %v914_v25, %v913_v24  ;;  %v916_v36 = vmax.f32 (!%p1228_p8), %v884_v26, 0.0 }
 0x133   : > { %740 = vst [vmem:[#allocation2 + $0x60] sm:$0xff] %v708_v47  ;;  %756 = vst [vmem:[#allocation2 + $0xe0] sm:$0xff] %v724_v48  ;;  %v709_v55 = vadd.f32 %v620_v53, %v324_v45  ;;  %v725_v56 = vadd.f32 %v684_v54, %v340_v46  ;;  %v775_v34 = vld [vmem:[#allocation2 + $0x58] sm:$0xff] (!%p1228_p8)  ;;  %v917_v37 = vmax.f32 (!%p1228_p8), %v885_v27, 0.0  ;;  %v811_v38 = vadd.f32 (!%p1228_p8), %v1696_v59, %v772_v23  ;;  %v785_v27 = vld [vmem:[#allocation2 + $0xa8] sm:$0xff] (!%p1228_p8) }
 0x134   : > { %743 = vst [vmem:[#allocation2 + $0x78] sm:$0xff] %v711_v51  ;;  %759 = vst [vmem:[#allocation2 + $0xf8] sm:$0xff] %v727_v52  ;;  %v773_v28 = vld [vmem:[#allocation2 + $0x48] sm:$0xff] (!%p1228_p8)  ;;  %v918_v40 = vmax.f32 (!%p1228_p8), %v886_v30, 0.0  ;;  %v919_v41 = vmax.f32 (!%p1228_p8), %v887_v31, 0.0  ;;  %v920_v42 = vmax.f32 (!%p1228_p8), %v888_v32, 0.0  ;;  %v1307_v45 = vpack.c.bf16 (!%p1228_p8), %v916_v36, %v915_v29 }
 0x135   : > { %741 = vst [vmem:[#allocation2 + $0x68] sm:$0xff] %v709_v55  ;;  %757 = vst [vmem:[#allocation2 + $0xe8] sm:$0xff] %v725_v56  ;;  %v812_v43 = vadd.f32 (!%p1228_p8), %v1696_v59, %v773_v28  ;;  %v850_v46 = vmul.f32 (!%p1228_p8), %v1703_v62, %v811_v38  ;;  %v813_v47 = vadd.f32 (!%p1228_p8), %v1696_v59, %v774_v33  ;;  %v786_v32 = vld [vmem:[#allocation2 + $0xb0] sm:$0xff] (!%p1228_p8) }
 0x136   : > { %1303 = vst [vmem:[%s1665_s14] sm:$0xff] %v1302_v35   ;;  %v814_v48 = vadd.f32 %v1696_v59, %v775_v34  ;;  %v1312_v51 = vpack.c.bf16 %v918_v40, %v917_v37  ;;  %v1317_v52 = vpack.c.bf16 %v920_v42, %v919_v41  ;;  %1379 = vst [vmem:[%s1665_s14 + $0x8] sm:$0xff] %v1307_v45   ;;  %v787_v37 = vld [vmem:[#allocation2 + $0xb8] sm:$0xff]  ;;  %v788_v42 = vld [vmem:[#allocation2 + $0xc0] sm:$0xff] }
 0x137   : > { %v851_v53 = vmul.f32 %v1703_v62, %v812_v43  ;;  %v889_v55 = vadd.f32 %v1708_v63, %v850_v46  ;;  %v852_v56 = vmul.f32 %v1703_v62, %v813_v47  ;;  %v819_v15 = vadd.f32 %v1696_v59, %v780_v2 }
 0x138   : > { %v853_v57 = vmul.f32 %v1703_v62, %v814_v48  ;;  %1380 = vst [vmem:[%s1665_s14 + $0x10] sm:$0xff] %v1312_v51   ;;  %1381 = vst [vmem:[%s1665_s14 + $0x18] sm:$0xff] %v1317_v52   ;;  %v820_v25 = vadd.f32 %v1696_v59, %v781_v11  ;;  %v821_v30 = vadd.f32 %v1696_v59, %v782_v16  ;;  %v789_v51 = vld [vmem:[#allocation2 + $0xc8] sm:$0xff] }
 0x139   : > { %v778_v49 = vld [vmem:[#allocation2 + $0x70] sm:$0xff]  ;;  %v890_v60 = vadd.f32 %v1708_v63, %v851_v53  ;;  %v921_v3 = vmax.f32 %v889_v55, 0.0  ;;  %v891_v4 = vadd.f32 %v1708_v63, %v852_v56  ;;  %v858_v26 = vmul.f32 %v1703_v62, %v819_v15 }
 0x13a   : > { %v776_v39 = vld [vmem:[#allocation2 + $0x60] sm:$0xff]  ;;  %v817_v0 = vadd.f32 %v1696_v59, %v778_v49  ;;  %v892_v5 = vadd.f32 %v1708_v63, %v853_v57  ;;  %v822_v31 = vadd.f32 %v1696_v59, %v783_v17  ;;  %v859_v34 = vmul.f32 %v1703_v62, %v820_v25  ;;  %v794_v15 = vld [vmem:[#allocation2 + $0xf0] sm:$0xff] }
 0x13b   : > { %v779_v50 = vld [vmem:[#allocation2 + $0x78] sm:$0xff]  ;;  %v815_v54 = vadd.f32 %v1696_v59, %v776_v39  ;;  %v922_v7 = vmax.f32 %v890_v60, 0.0  ;;  %v923_v12 = vmax.f32 %v891_v4, 0.0  ;;  %v897_v35 = vadd.f32 %v1708_v63, %v858_v26 }
 0x13c   : > { %v777_v44 = vld [vmem:[#allocation2 + $0x68] sm:$0xff]  ;;  %v818_v1 = vadd.f32 %v1696_v59, %v779_v50  ;;  %v856_v9 = vmul.f32 %v1703_v62, %v817_v0  ;;  %v924_v13 = vmax.f32 %v892_v5, 0.0  ;;  %v823_v36 = vadd.f32 %v1696_v59, %v784_v22  ;;  %v791_v0 = vld [vmem:[#allocation2 + $0xd8] sm:$0xff]  ;;  %v792_v5 = vld [vmem:[#allocation2 + $0xe0] sm:$0xff] }
 0x13d   : > { %v816_v58 = vadd.f32 %v1696_v59, %v777_v44  ;;  %v854_v61 = vmul.f32 %v1703_v62, %v815_v54  ;;  %v1322_v18 = vpack.c.bf16 %v922_v7, %v921_v3  ;;  %v860_v39 = vmul.f32 %v1703_v62, %v821_v30 }
 0x13e   : > { %v857_v10 = vmul.f32 %v1703_v62, %v818_v1  ;;  %v895_v20 = vadd.f32 %v1708_v63, %v856_v9  ;;  %v1327_v23 = vpack.c.bf16 %v924_v13, %v923_v12  ;;  %v861_v40 = vmul.f32 %v1703_v62, %v822_v31 }
 0x13f   : > { %v855_v6 = vmul.f32 %v1703_v62, %v816_v58  ;;  %v893_v8 = vadd.f32 %v1708_v63, %v854_v61  ;;  %1382 = vst [vmem:[%s1665_s14 + $0x20] sm:$0xff] %v1322_v18   ;;  %v824_v41 = vadd.f32 %v1696_v59, %v785_v27  ;;  %v898_v43 = vadd.f32 %v1708_v63, %v859_v34  ;;  %v790_v61 = vld [vmem:[#allocation2 + $0xd0] sm:$0xff] }
 0x140   : > { %v896_v21 = vadd.f32 %v1708_v63, %v857_v10  ;;  %v927_v28 = vmax.f32 %v895_v20, 0.0  ;;  %1383 = vst [vmem:[%s1665_s14 + $0x28] sm:$0xff] %v1327_v23   ;;  %v929_v44 = vmax.f32 %v897_v35, 0.0  ;;  %v862_v45 = vmul.f32 %v1703_v62, %v823_v36  ;;  %v793_v10 = vld [vmem:[#allocation2 + $0xe8] sm:$0xff] }
 0x141   : > { %v894_v14 = vadd.f32 %v1708_v63, %v855_v6  ;;  %v925_v19 = vmax.f32 %v893_v8, 0.0  ;;  %v825_v46 = vadd.f32 %v1696_v59, %v786_v32  ;;  %v899_v47 = vadd.f32 %v1708_v63, %v860_v39 }
 0x142   : > { %v928_v29 = vmax.f32 %v896_v21, 0.0  ;;  %v900_v48 = vadd.f32 %v1708_v63, %v861_v40  ;;  %v863_v49 = vmul.f32 %v1703_v62, %v824_v41  ;;  %v826_v50 = vadd.f32 %v1696_v59, %v787_v37 }
 0x143   : > { %v926_v24 = vmax.f32 %v894_v14, 0.0  ;;  %v930_v52 = vmax.f32 %v898_v43, 0.0  ;;  %v901_v53 = vadd.f32 %v1708_v63, %v862_v45  ;;  %v864_v54 = vmul.f32 %v1703_v62, %v825_v46 }
 0x144   : > { %v1337_v38 = vpack.c.bf16 %v928_v29, %v927_v28  ;;  %v827_v55 = vadd.f32 %v1696_v59, %v788_v42  ;;  %v931_v56 = vmax.f32 %v899_v47, 0.0  ;;  %v932_v57 = vmax.f32 %v900_v48, 0.0 }
 0x145   : > { %v1332_v33 = vpack.c.bf16 %v926_v24, %v925_v19  ;;  %v902_v58 = vadd.f32 %v1708_v63, %v863_v49  ;;  %v865_v60 = vmul.f32 %v1703_v62, %v826_v50  ;;  %v1342_v1 = vpack.c.bf16 %v930_v52, %v929_v44  ;;  %v795_v24 = vld [vmem:[#allocation2 + $0xf8] sm:$0xff] }
 0x146   : > { %1385 = vst [vmem:[%s1665_s14 + $0x38] sm:$0xff] %v1337_v38   ;;  %v933_v2 = vmax.f32 %v901_v53, 0.0  ;;  %v903_v3 = vadd.f32 %v1708_v63, %v864_v54  ;;  %v828_v4 = vadd.f32 %v1696_v59, %v789_v51  ;;  %v1347_v6 = vpack.c.bf16 %v932_v57, %v931_v56 }
 0x147   : > { %1384 = vst [vmem:[%s1665_s14 + $0x30] sm:$0xff] %v1332_v33   ;;  %v934_v7 = vmax.f32 %v902_v58, 0.0  ;;  %v904_v8 = vadd.f32 %v1708_v63, %v865_v60  ;;  %v866_v9 = vmul.f32 %v1703_v62, %v827_v55  ;;  %1386 = vst [vmem:[%s1665_s14 + $0x40] sm:$0xff] %v1342_v1   ;;  %v829_v13 = vadd.f32 %v1696_v59, %v790_v61 }
 0x148   : > { %v935_v11 = vmax.f32 %v903_v3, 0.0  ;;  %v867_v12 = vmul.f32 %v1703_v62, %v828_v4  ;;  %v830_v14 = vadd.f32 %v1696_v59, %v791_v0  ;;  %1387 = vst [vmem:[%s1665_s14 + $0x48] sm:$0xff] %v1347_v6   ;;  %v831_v19 = vadd.f32 %v1696_v59, %v792_v5 }
 0x149   : > { %v1352_v16 = vpack.c.bf16 %v934_v7, %v933_v2  ;;  %v936_v17 = vmax.f32 %v904_v8, 0.0  ;;  %v905_v18 = vadd.f32 %v1708_v63, %v866_v9  ;;  %v868_v21 = vmul.f32 %v1703_v62, %v829_v13 }
 0x14a   : > { %v906_v20 = vadd.f32 %v1708_v63, %v867_v12  ;;  %v869_v22 = vmul.f32 %v1703_v62, %v830_v14  ;;  %v832_v23 = vadd.f32 %v1696_v59, %v793_v10  ;;  %v870_v27 = vmul.f32 %v1703_v62, %v831_v19 }
 0x14b   : > { %1388 = vst [vmem:[%s1665_s14 + $0x50] sm:$0xff] %v1352_v16   ;;  %v1357_v25 = vpack.c.bf16 %v936_v17, %v935_v11  ;;  %v937_v26 = vmax.f32 %v905_v18, 0.0  ;;  %v833_v28 = vadd.f32 %v1696_v59, %v794_v15  ;;  %v907_v30 = vadd.f32 %v1708_v63, %v868_v21 }
 0x14c   : > { %v938_v29 = vmax.f32 %v906_v20, 0.0  ;;  %v908_v31 = vadd.f32 %v1708_v63, %v869_v22  ;;  %v871_v32 = vmul.f32 %v1703_v62, %v832_v23  ;;  %v909_v33 = vadd.f32 %v1708_v63, %v870_v27 }
 0x14d   : > { %1389 = vst [vmem:[%s1665_s14 + $0x58] sm:$0xff] %v1357_v25   ;;  %v834_v34 = vadd.f32 %v1696_v59, %v795_v24  ;;  %v872_v35 = vmul.f32 %v1703_v62, %v833_v28  ;;  %v939_v37 = vmax.f32 %v907_v30, 0.0 }
 0x14e   : > { %v1362_v36 = vpack.c.bf16 %v938_v29, %v937_v26  ;;  %v940_v38 = vmax.f32 %v908_v31, 0.0  ;;  %v910_v39 = vadd.f32 %v1708_v63, %v871_v32  ;;  %v941_v40 = vmax.f32 %v909_v33, 0.0 }
 0x14f   : > { %v873_v41 = vmul.f32 %v1703_v62, %v834_v34  ;;  %v911_v42 = vadd.f32 %v1708_v63, %v872_v35 }
 0x150   : > { %1390 = vst [vmem:[%s1665_s14 + $0x60] sm:$0xff] %v1362_v36   ;;  %v1367_v43 = vpack.c.bf16 %v940_v38, %v939_v37  ;;  %v942_v44 = vmax.f32 %v910_v39, 0.0 }
 0x151   : > { %v912_v45 = vadd.f32 %v1708_v63, %v873_v41  ;;  %v943_v59 = vmax.f32 %v911_v42, 0.0 }
 0x152   : > { %1391 = vst [vmem:[%s1665_s14 + $0x68] sm:$0xff] %v1367_v43   ;;  %v1372_v46 = vpack.c.bf16 %v942_v44, %v941_v40 }
 0x153   : > { %v944_v47 = vmax.f32 %v912_v45, 0.0 }
 0x154   : > { %1392 = vst [vmem:[%s1665_s14 + $0x70] sm:$0xff] %v1372_v46  }
 0x155   : > { %v1377_v48 = vpack.c.bf16 %v944_v47, %v943_v59 }
 0x157   : > { %1393 = vst [vmem:[%s1665_s14 + $0x78] sm:$0xff] %v1377_v48  }
 0x158 PF: > { %s15_s22 = sadd.s32 1, %s1585_s22   ;;  %s1841_s18 = smov %s1577_s20 }
 0x159   : > { %p12_p9 = scmp.ge.s32.totalorder %s15_s22, 20   ;;  %s1842_s19 = smov %s1581_s21 }
 0x15a   : > { %s1843_s20 = smov %s1846_s23  ;;  %s1844_s21 = smov %s1850_s24 }
 0x15b   :  { %14 = sbr.rel (!%p12_p9) target bundleno = 3 (0x3), region = 81 }

// kernel: _lambda_.19
= control target key start
LH: loop header
LB: loop body
LE: loop exit
PB: predicated region body
PF: predicated region fallthrough
CT: control target
= control target key end

     0   :  { %s705_s1 = inlined_call_operand.vmem [shape: bf16[1,128,128], index: 1, kind: input, shape index: {}]   ;;  %s706_s0 = inlined_call_operand.vmem [shape: bf16[1,128,128], index: 0, kind: input, shape index: {}]   ;;  %s707_s2 = inlined_call_operand.vmem [shape: f32[1,128], index: 2, kind: input, shape index: {}]   ;;  %s708_s3 = inlined_call_operand.vmem [shape: bf16[128,128], index: 3, kind: output, shape index: {}]  }
   0x1   :  { %v594_v0 = vld [vmem:[%s705_s1] sm:$0xff]   ;;  %v595_v1 = vld [vmem:[%s705_s1 + $0x8] sm:$0xff]   ;;  %v596_v2 = vld [vmem:[%s705_s1 + $0x10] sm:$0xff]  }
   0x2   :  { %546 = vmatprep.subr.bf16.mxu0 %v594_v0  ;;  %578 = vmatprep.subr.bf16.mxu1 %v594_v0  ;;  %v597_v3 = vld [vmem:[%s705_s1 + $0x18] sm:$0xff]   ;;  %v602_v4 = vld [vmem:[%s706_s0] sm:$0xff]   ;;  %v599_v7 = vld [vmem:[%s705_s1 + $0x28] sm:$0xff]  }
   0x3   :  { %547 = vmatpush3.bf16.msra.mxu0 %v594_v0  ;;  %586 = vmatpush3.bf16.msra.mxu1 %v594_v0  ;;  %v603_v5 = vld [vmem:[%s706_s0 + $0x20] sm:$0xff]   ;;  %v600_v8 = vld [vmem:[%s705_s1 + $0x30] sm:$0xff]   ;;  %v601_v9 = vld [vmem:[%s705_s1 + $0x38] sm:$0xff]  }
   0x4   :  { %548 = vmatprep.subr.bf16.mxu0 %v595_v1  ;;  %579 = vmatprep.subr.bf16.mxu1 %v595_v1  ;;  %v598_v6 = vld [vmem:[%s705_s1 + $0x20] sm:$0xff]   ;;  %v604_v10 = vld [vmem:[%s706_s0 + $0x8] sm:$0xff]   ;;  %v606_v12 = vld [vmem:[%s706_s0 + $0x10] sm:$0xff]  }
   0x5   :  { %562 = vmatprep.mubr.bf16.mxu0 %v602_v4  ;;  %570 = vmatprep.mubr.bf16.mxu1 %v603_v5  ;;  %v605_v11 = vld [vmem:[%s706_s0 + $0x28] sm:$0xff]   ;;  %v607_v13 = vld [vmem:[%s706_s0 + $0x30] sm:$0xff]   ;;  %v608_v14 = vld [vmem:[%s706_s0 + $0x18] sm:$0xff]  }
   0x6   :  { %v609_v15 = vld [vmem:[%s706_s0 + $0x38] sm:$0xff]   ;;  %v450_v17 = vld [vmem:[%s707_s2] ss:$0 sm:$0xff] }
   0x7   :  { %549 = vmatpush3.bf16.msra.mxu0 %v595_v1  ;;  %587 = vmatpush3.bf16.msra.mxu1 %v595_v1 }
   0x8   :  { %550 = vmatprep.subr.bf16.mxu0 %v596_v2  ;;  %580 = vmatprep.subr.bf16.mxu1 %v596_v2 }
   0xb   :  { %551 = vmatpush3.bf16.msra.mxu0 %v596_v2  ;;  %588 = vmatpush3.bf16.msra.mxu1 %v596_v2 }
   0xc   :  { %552 = vmatprep.subr.bf16.mxu0 %v597_v3  ;;  %581 = vmatprep.subr.bf16.mxu1 %v597_v3 }
   0xf   :  { %553 = vmatpush3.bf16.msra.mxu0 %v597_v3  ;;  %589 = vmatpush3.bf16.msra.mxu1 %v597_v3 }
  0x10   :  { %554 = vmatprep.subr.bf16.mxu0 %v598_v6  ;;  %582 = vmatprep.subr.bf16.mxu1 %v598_v6 }
  0x13   :  { %555 = vmatpush3.bf16.msra.mxu0 %v598_v6  ;;  %590 = vmatpush3.bf16.msra.mxu1 %v598_v6 }
  0x14   :  { %556 = vmatprep.subr.bf16.mxu0 %v599_v7  ;;  %583 = vmatprep.subr.bf16.mxu1 %v599_v7 }
  0x17   :  { %557 = vmatpush3.bf16.msra.mxu0 %v599_v7  ;;  %591 = vmatpush3.bf16.msra.mxu1 %v599_v7 }
  0x18   :  { %558 = vmatprep.subr.bf16.mxu0 %v600_v8  ;;  %584 = vmatprep.subr.bf16.mxu1 %v600_v8 }
  0x1b   :  { %559 = vmatpush3.bf16.msra.mxu0 %v600_v8  ;;  %592 = vmatpush3.bf16.msra.mxu1 %v600_v8 }
  0x1c   :  { %560 = vmatprep.subr.bf16.mxu0 %v601_v9  ;;  %585 = vmatprep.subr.bf16.mxu1 %v601_v9 }
  0x1f   :  { %561 = vmatpush3.bf16.msra.mxu0 %v601_v9  ;;  %593 = vmatpush3.bf16.msra.mxu1 %v601_v9 }
  0x22   :  { %563 = vmatmul.mubr.bf16.vlgmr.msra.gmra.mrb[0].mxu0 %v604_v10  ;;  %571 = vmatmul.mubr.bf16.vlgmr.msra.gmra.mrb[0].mxu1 %v605_v11 }
  0x23   :  { %566 = vmatprep.mubr.bf16.mxu0 %v606_v12  ;;  %574 = vmatprep.mubr.bf16.mxu1 %v607_v13 }
  0x2a   :  { %567 = vmatmul.mubr.bf16.gmra.mrb[4].mxu0 %v608_v14  ;;  %575 = vmatmul.mubr.bf16.gmra.mrb[4].mxu1 %v609_v15 }
  0xf5   :  { %v564_v16 = vpop.f32.mrb[0].mxu0  ;;  %v572_v18 = vpop.f32.mrb[0].mxu1 }
  0xf6   :  { %v213_v19 = vpop.f32.mrb[1].mxu0  ;;  %v245_v20 = vpop.f32.mrb[1].mxu1  ;;  %v336_v23 = vadd.f32 %v564_v16, %v450_v17  ;;  %v344_v24 = vadd.f32 %v572_v18, %v450_v17 }
  0xf7   :  { %v565_v21 = vpop.f32.mrb[2].mxu0  ;;  %v573_v22 = vpop.f32.mrb[2].mxu1  ;;  %v334_v29 = vadd.f32 %v450_v17, %v213_v19  ;;  %v342_v30 = vadd.f32 %v450_v17, %v245_v20 }
  0xf8   :  { %v337_v25 = vadd.f32 %v565_v21, %v450_v17  ;;  %v345_v26 = vadd.f32 %v573_v22, %v450_v17  ;;  %v216_v27 = vpop.f32.mrb[3].mxu0  ;;  %v248_v28 = vpop.f32.mrb[3].mxu1 }
  0xf9   :  { %v335_v31 = vadd.f32 %v450_v17, %v216_v27  ;;  %v343_v32 = vadd.f32 %v450_v17, %v248_v28 }
  0xfa   :  { %v491_v33 = vpack.c.bf16 %v337_v25, %v336_v23  ;;  %v511_v34 = vpack.c.bf16 %v345_v26, %v344_v24 }
  0xfb   :  { %v486_v35 = vpack.c.bf16 %v335_v31, %v334_v29  ;;  %v506_v36 = vpack.c.bf16 %v343_v32, %v342_v30 }
  0xfc   :  { %523 = vst [vmem:[%s708_s3 + $0x8] sm:$0xff] %v491_v33   ;;  %527 = vst [vmem:[%s708_s3 + $0x28] sm:$0xff] %v511_v34  }
  0xfd   :  { %487 = vst [vmem:[%s708_s3] sm:$0xff] %v486_v35   ;;  %526 = vst [vmem:[%s708_s3 + $0x20] sm:$0xff] %v506_v36   ;;  %v568_v37 = vpop.f32.mrb[4].mxu0  ;;  %v576_v38 = vpop.f32.mrb[4].mxu1 }
  0xfe   :  { %v229_v39 = vpop.f32.mrb[5].mxu0  ;;  %v261_v40 = vpop.f32.mrb[5].mxu1  ;;  %v340_v43 = vadd.f32 %v568_v37, %v450_v17  ;;  %v348_v44 = vadd.f32 %v576_v38, %v450_v17 }
  0xff   :  { %v569_v41 = vpop.f32.mrb[6].mxu0  ;;  %v577_v42 = vpop.f32.mrb[6].mxu1  ;;  %v338_v49 = vadd.f32 %v450_v17, %v229_v39  ;;  %v346_v50 = vadd.f32 %v450_v17, %v261_v40 }
 0x100   :  { %v341_v45 = vadd.f32 %v569_v41, %v450_v17  ;;  %v349_v46 = vadd.f32 %v577_v42, %v450_v17  ;;  %v232_v47 = vpop.f32.mrb[7].mxu0  ;;  %v264_v48 = vpop.f32.mrb[7].mxu1 }
 0x101   :  { %v339_v51 = vadd.f32 %v450_v17, %v232_v47  ;;  %v347_v52 = vadd.f32 %v450_v17, %v264_v48 }
 0x102   :  { %v501_v53 = vpack.c.bf16 %v341_v45, %v340_v43  ;;  %v521_v54 = vpack.c.bf16 %v349_v46, %v348_v44 }
 0x103   :  { %v496_v55 = vpack.c.bf16 %v339_v51, %v338_v49  ;;  %v516_v56 = vpack.c.bf16 %v347_v52, %v346_v50 }
 0x104   :  { %525 = vst [vmem:[%s708_s3 + $0x18] sm:$0xff] %v501_v53   ;;  %529 = vst [vmem:[%s708_s3 + $0x38] sm:$0xff] %v521_v54  }
 0x105   :  { %524 = vst [vmem:[%s708_s3 + $0x10] sm:$0xff] %v496_v55   ;;  %528 = vst [vmem:[%s708_s3 + $0x30] sm:$0xff] %v516_v56  }

// kernel: _lambda_.16
= control target key start
LH: loop header
LB: loop body
LE: loop exit
PB: predicated region body
PF: predicated region fallthrough
CT: control target
= control target key end

     0   :  { %s1685_s15 = smov 0   ;;  %s1687_s16 = smov 0   ;;  %s1849_s0 = inlined_call_operand.vmem [shape: bf16[9,512,128], index: 0, kind: input, shape index: {}]   ;;  %s1850_s1 = inlined_call_operand.vmem [shape: bf16[9,128,128], index: 1, kind: input, shape index: {}]   ;;  %s1851_s2 = inlined_call_operand.vmem [shape: f32[1,128], index: 2, kind: input, shape index: {}]   ;;  %s1852_s3 = inlined_call_operand.vmem [shape: bf16[512,128], index: 3, kind: input, shape index: {}]   ;;  %s1853_s4 = inlined_call_operand.vmem [shape: bf16[512,128], index: 4, kind: output, shape index: {}]  }
   0x1   :  { %s1689_s17 = smov 0   ;;  %s1691_s18 = smov 0  }
   0x2   :  { %s1693_s19 = smov 0  }
   0x3 LB: > { %s23_s20 = sadd.s32 1, %s1649_s17  ;;  %s26_s21 = sadd.s32 1, %s1653_s18  ;;  %s1657_s19 = sphi %s1693_s19, %s14_s19   ;;  %s1653_s18 = sphi %s1691_s18, %s1857_s18   ;;  %s1649_s17 = sphi %s1689_s17, %s1856_s17   ;;  %s1645_s16 = sphi %s1687_s16, %s1855_s16   ;;  %s1641_s15 = sphi %s1685_s15, %s1854_s15  }
   0x4   : > { %p24_p0 = scmp.ge.s32.totalorder %s23_s20, 9  ;;  %p1188_p1 = scmp.ge.s32.totalorder %s1657_s19, 1 }
   0x5   : > { %p202_p2 = scmp.lt.s32.totalorder %s1657_s19, 19 }
   0x6   : > { %s1859_s20 = smov (%p24_p0, %s23_s20), 0  ;;  %s1861_s21 = smov (!%p24_p0, %s26_s21), %s1653_s18 }
   0x7   : > { %p203_p3 = pnand %p1188_p1, %p202_p2  ;;  %p28_p4 = scmp.ge.s32.totalorder %s1861_s21, 2 }
   0x8   : > { %s1189_s22 = sshll.u32 (!%p203_p3), %s1645_s16, 5  ;;  %p243_p5 = scmp.lt.s32.totalorder (!%p203_p3), %s1641_s15, 8 }
   0x9   : > { %s1863_s21 = smov (%p28_p4, %s1861_s21), 0  ;;  %206 = sbr.rel (%p203_p3) target bundleno = 333 (0x14d), region = 36 }
   0xa   : > { %p245_p6 = scmp.lt.s32.totalorder (!%p203_p3), %s1189_s22, 63  ;;  %p1198_p7 = scmp.ne.s32.totalorder (!%p203_p3), %s1641_s15, 0 }
  0x10   : > { %s244_s23 = scalar_select %p243_p5, %s1641_s15, 8 }
  0x11   : > { %s1865_s22 = smov (!%p245_p6, %s1189_s22), 63  ;;  %273 = sbr.rel (%p1198_p7) target bundleno = 35 (0x23), region = 40 }
  0x12   : > { %s1190_s24 = sshll.u32 %s244_s23, 6  ;;  %s1195_s30 = sshll.u32 %s1865_s22, 2  ;;  %v1659_v0 = vmov (!%p1198_p7), 0.0  }
  0x13   : > { %s248_s25 = sadd.s32 %s1190_s24, %s1865_s22  ;;  %s1722_s28 = scalar_lea.vmem %s1850_s1, %s1190_s24  ;;  %274 = vst [vmem:[#allocation2] sm:$0xff] (!%p1198_p7), %v1659_v0  ;;  %275 = vst [vmem:[#allocation2 + $0x8] sm:$0xff] (!%p1198_p7), %v1659_v0 }
  0x14   : > { %s1191_s29 = sshll.u32 %s248_s25, 2  ;;  %s1732_s10 = scalar_lea.vmem %s1852_s3, %s1195_s30  ;;  %276 = vst [vmem:[#allocation2 + $0x10] sm:$0xff] (!%p1198_p7), %v1659_v0  ;;  %277 = vst [vmem:[#allocation2 + $0x18] sm:$0xff] (!%p1198_p7), %v1659_v0 }
  0x15   : > { %s1727_s7 = scalar_lea.vmem %s1849_s0, %s1191_s29  ;;  %s1737_s13 = scalar_lea.vmem %s1853_s4, %s1195_s30  ;;  %278 = vst [vmem:[#allocation2 + $0x20] sm:$0xff] (!%p1198_p7), %v1659_v0  ;;  %279 = vst [vmem:[#allocation2 + $0x28] sm:$0xff] (!%p1198_p7), %v1659_v0 }
  0x16   : > { %280 = vst [vmem:[#allocation2 + $0x30] sm:$0xff] (!%p1198_p7), %v1659_v0  ;;  %281 = vst [vmem:[#allocation2 + $0x38] sm:$0xff] (!%p1198_p7), %v1659_v0 }
  0x17   : > { %282 = vst [vmem:[#allocation2 + $0x40] sm:$0xff] (!%p1198_p7), %v1659_v0  ;;  %283 = vst [vmem:[#allocation2 + $0x48] sm:$0xff] (!%p1198_p7), %v1659_v0 }
  0x18   : > { %284 = vst [vmem:[#allocation2 + $0x50] sm:$0xff] %v1659_v0  ;;  %285 = vst [vmem:[#allocation2 + $0x58] sm:$0xff] %v1659_v0 }
  0x19   : > { %286 = vst [vmem:[#allocation2 + $0x60] sm:$0xff] %v1659_v0  ;;  %287 = vst [vmem:[#allocation2 + $0x68] sm:$0xff] %v1659_v0 }
  0x1a   : > { %288 = vst [vmem:[#allocation2 + $0x70] sm:$0xff] %v1659_v0  ;;  %289 = vst [vmem:[#allocation2 + $0x78] sm:$0xff] %v1659_v0 }
  0x1b   : > { %290 = vst [vmem:[#allocation2 + $0x80] sm:$0xff] %v1659_v0  ;;  %291 = vst [vmem:[#allocation2 + $0x88] sm:$0xff] %v1659_v0 }
  0x1c   : > { %292 = vst [vmem:[#allocation2 + $0x90] sm:$0xff] %v1659_v0  ;;  %293 = vst [vmem:[#allocation2 + $0x98] sm:$0xff] %v1659_v0 }
  0x1d   : > { %294 = vst [vmem:[#allocation2 + $0xa0] sm:$0xff] %v1659_v0  ;;  %295 = vst [vmem:[#allocation2 + $0xa8] sm:$0xff] %v1659_v0 }
  0x1e   : > { %296 = vst [vmem:[#allocation2 + $0xb0] sm:$0xff] %v1659_v0  ;;  %297 = vst [vmem:[#allocation2 + $0xb8] sm:$0xff] %v1659_v0 }
  0x1f   : > { %298 = vst [vmem:[#allocation2 + $0xc0] sm:$0xff] %v1659_v0  ;;  %299 = vst [vmem:[#allocation2 + $0xc8] sm:$0xff] %v1659_v0 }
  0x20   : > { %300 = vst [vmem:[#allocation2 + $0xd0] sm:$0xff] %v1659_v0  ;;  %301 = vst [vmem:[#allocation2 + $0xd8] sm:$0xff] %v1659_v0 }
  0x21   : > { %302 = vst [vmem:[#allocation2 + $0xe0] sm:$0xff] %v1659_v0  ;;  %303 = vst [vmem:[#allocation2 + $0xe8] sm:$0xff] %v1659_v0 }
  0x22   : > { %304 = vst [vmem:[#allocation2 + $0xf0] sm:$0xff] %v1659_v0  ;;  %305 = vst [vmem:[#allocation2 + $0xf8] sm:$0xff] %v1659_v0 }
  0x23 PF: > { %v1595_v1 = vld [vmem:[%s1722_s28] sm:$0xff]   ;;  %v1596_v2 = vld [vmem:[%s1722_s28 + $0x8] sm:$0xff]   ;;  %v1597_v3 = vld [vmem:[%s1722_s28 + $0x10] sm:$0xff]   ;;  %p1223_p8 = scmp.ne.s32.totalorder %s1641_s15, 8 }
  0x24   : > { %1490 = vmatprep.subr.bf16.mxu0 %v1595_v1  ;;  %1538 = vmatprep.subr.bf16.mxu1 %v1595_v1  ;;  %v1598_v4 = vld [vmem:[%s1722_s28 + $0x18] sm:$0xff]   ;;  %v1603_v5 = vld [vmem:[%s1727_s7] sm:$0xff]   ;;  %v1600_v8 = vld [vmem:[%s1722_s28 + $0x28] sm:$0xff]  }
  0x25   : > { %1491 = vmatpush3.bf16.msra.mxu0 %v1595_v1  ;;  %1546 = vmatpush3.bf16.msra.mxu1 %v1595_v1  ;;  %v1604_v6 = vld [vmem:[%s1727_s7 + $0x40] sm:$0xff]   ;;  %v1601_v9 = vld [vmem:[%s1722_s28 + $0x30] sm:$0xff]   ;;  %v1602_v10 = vld [vmem:[%s1722_s28 + $0x38] sm:$0xff]  }
  0x26   : > { %1492 = vmatprep.subr.bf16.mxu0 %v1596_v2  ;;  %1539 = vmatprep.subr.bf16.mxu1 %v1596_v2  ;;  %v1599_v7 = vld [vmem:[%s1722_s28 + $0x20] sm:$0xff]   ;;  %v1605_v11 = vld [vmem:[%s1727_s7 + $0x8] sm:$0xff]   ;;  %v1607_v13 = vld [vmem:[%s1727_s7 + $0x10] sm:$0xff]  }
  0x27   : > { %1506 = vmatprep.mubr.bf16.mxu0 %v1603_v5  ;;  %1522 = vmatprep.mubr.bf16.mxu1 %v1604_v6  ;;  %v1606_v12 = vld [vmem:[%s1727_s7 + $0x48] sm:$0xff]   ;;  %v1608_v14 = vld [vmem:[%s1727_s7 + $0x50] sm:$0xff]   ;;  %v1609_v15 = vld [vmem:[%s1727_s7 + $0x18] sm:$0xff]  }
  0x28   : > { %v1610_v16 = vld [vmem:[%s1727_s7 + $0x58] sm:$0xff]   ;;  %v1611_v17 = vld [vmem:[%s1727_s7 + $0x20] sm:$0xff]   ;;  %v1613_v19 = vld [vmem:[%s1727_s7 + $0x28] sm:$0xff]  }
  0x29   : > { %1493 = vmatpush3.bf16.msra.mxu0 %v1596_v2  ;;  %1547 = vmatpush3.bf16.msra.mxu1 %v1596_v2  ;;  %v1612_v18 = vld [vmem:[%s1727_s7 + $0x60] sm:$0xff]   ;;  %v1614_v20 = vld [vmem:[%s1727_s7 + $0x68] sm:$0xff]   ;;  %v1615_v21 = vld [vmem:[%s1727_s7 + $0x30] sm:$0xff]  }
  0x2a   : > { %1494 = vmatprep.subr.bf16.mxu0 %v1597_v3  ;;  %1540 = vmatprep.subr.bf16.mxu1 %v1597_v3  ;;  %v1616_v22 = vld [vmem:[%s1727_s7 + $0x70] sm:$0xff]   ;;  %v1617_v23 = vld [vmem:[%s1727_s7 + $0x38] sm:$0xff]   ;;  %v306_v27 = vld [vmem:[#allocation2] sm:$0xff] }
  0x2b   : > { %v1618_v24 = vld [vmem:[%s1727_s7 + $0x78] sm:$0xff]   ;;  %v308_v25 = vld [vmem:[#allocation2 + $0x10] sm:$0xff]  ;;  %v322_v28 = vld [vmem:[#allocation2 + $0x80] sm:$0xff] }
  0x2c   : > { %v324_v26 = vld [vmem:[#allocation2 + $0x90] sm:$0xff]  ;;  %v309_v31 = vld [vmem:[#allocation2 + $0x18] sm:$0xff]  ;;  %v307_v37 = vld [vmem:[#allocation2 + $0x8] sm:$0xff] }
  0x2d   : > { %1495 = vmatpush3.bf16.msra.mxu0 %v1597_v3  ;;  %1548 = vmatpush3.bf16.msra.mxu1 %v1597_v3  ;;  %v325_v32 = vld [vmem:[#allocation2 + $0x98] sm:$0xff]  ;;  %v323_v38 = vld [vmem:[#allocation2 + $0x88] sm:$0xff]  ;;  %v312_v49 = vld [vmem:[#allocation2 + $0x30] sm:$0xff] }
  0x2e   : > { %1496 = vmatprep.subr.bf16.mxu0 %v1598_v4  ;;  %1541 = vmatprep.subr.bf16.mxu1 %v1598_v4  ;;  %v328_v50 = vld [vmem:[#allocation2 + $0xb0] sm:$0xff]  ;;  %v310_v51 = vld [vmem:[#allocation2 + $0x20] sm:$0xff]  ;;  %v313_v55 = vld [vmem:[#allocation2 + $0x38] sm:$0xff] }
  0x2f   : > { %v326_v52 = vld [vmem:[#allocation2 + $0xa0] sm:$0xff]  ;;  %v329_v56 = vld [vmem:[#allocation2 + $0xb8] sm:$0xff]  ;;  %v311_v61 = vld [vmem:[#allocation2 + $0x28] sm:$0xff] }
  0x30   : > { %v327_v62 = vld [vmem:[#allocation2 + $0xa8] sm:$0xff] }
  0x31   : > { %1497 = vmatpush3.bf16.msra.mxu0 %v1598_v4  ;;  %1549 = vmatpush3.bf16.msra.mxu1 %v1598_v4 }
  0x32   : > { %1498 = vmatprep.subr.bf16.mxu0 %v1599_v7  ;;  %1542 = vmatprep.subr.bf16.mxu1 %v1599_v7 }
  0x35   : > { %1499 = vmatpush3.bf16.msra.mxu0 %v1599_v7  ;;  %1550 = vmatpush3.bf16.msra.mxu1 %v1599_v7 }
  0x36   : > { %1500 = vmatprep.subr.bf16.mxu0 %v1600_v8  ;;  %1543 = vmatprep.subr.bf16.mxu1 %v1600_v8 }
  0x39   : > { %1501 = vmatpush3.bf16.msra.mxu0 %v1600_v8  ;;  %1551 = vmatpush3.bf16.msra.mxu1 %v1600_v8 }
  0x3a   : > { %1502 = vmatprep.subr.bf16.mxu0 %v1601_v9  ;;  %1544 = vmatprep.subr.bf16.mxu1 %v1601_v9 }
  0x3d   : > { %1503 = vmatpush3.bf16.msra.mxu0 %v1601_v9  ;;  %1552 = vmatpush3.bf16.msra.mxu1 %v1601_v9  ;;  %v316_v9 = vld [vmem:[#allocation2 + $0x50] sm:$0xff] }
  0x3e   : > { %1504 = vmatprep.subr.bf16.mxu0 %v1602_v10  ;;  %1545 = vmatprep.subr.bf16.mxu1 %v1602_v10 }
  0x41   : > { %1505 = vmatpush3.bf16.msra.mxu0 %v1602_v10  ;;  %1553 = vmatpush3.bf16.msra.mxu1 %v1602_v10  ;;  %v332_v10 = vld [vmem:[#allocation2 + $0xd0] sm:$0xff] }
  0x44   : > { %1507 = vmatmul.mubr.bf16.vlgmr.msra.gmra.mrb[0].mxu0 %v1605_v11  ;;  %1523 = vmatmul.mubr.bf16.vlgmr.msra.gmra.mrb[0].mxu1 %v1606_v12  ;;  %v314_v11 = vld [vmem:[#allocation2 + $0x40] sm:$0xff] }
  0x45   : > { %1510 = vmatprep.mubr.bf16.mxu0 %v1607_v13  ;;  %1526 = vmatprep.mubr.bf16.mxu1 %v1608_v14  ;;  %v330_v12 = vld [vmem:[#allocation2 + $0xc0] sm:$0xff] }
  0x4c   : > { %1511 = vmatmul.mubr.bf16.gmra.mrb[4].mxu0 %v1609_v15  ;;  %1527 = vmatmul.mubr.bf16.gmra.mrb[4].mxu1 %v1610_v16  ;;  %v317_v15 = vld [vmem:[#allocation2 + $0x58] sm:$0xff] }
  0x4d   : > { %1514 = vmatprep.mubr.bf16.mxu0 %v1611_v17  ;;  %1530 = vmatprep.mubr.bf16.mxu1 %v1612_v18  ;;  %v333_v16 = vld [vmem:[#allocation2 + $0xd8] sm:$0xff] }
  0x54   : > { %1515 = vmatmul.mubr.bf16.gmra.mrb[8].mxu0 %v1613_v19  ;;  %1531 = vmatmul.mubr.bf16.gmra.mrb[8].mxu1 %v1614_v20 }
  0x55   : > { %1518 = vmatprep.mubr.bf16.mxu0 %v1615_v21  ;;  %1534 = vmatprep.mubr.bf16.mxu1 %v1616_v22  ;;  %v315_v21 = vld [vmem:[#allocation2 + $0x48] sm:$0xff] }
  0x56   : > { %v331_v22 = vld [vmem:[#allocation2 + $0xc8] sm:$0xff] }
  0x5c   : > { %1519 = vmatmul.mubr.bf16.gmra.mrb[12].mxu0 %v1617_v23  ;;  %1535 = vmatmul.mubr.bf16.gmra.mrb[12].mxu1 %v1618_v24 }
 0x117   : > { %v1508_v29 = vpop.f32.mrb[0].mxu0  ;;  %v1524_v30 = vpop.f32.mrb[0].mxu1 }
 0x118   : > { %v693_v33 = vadd.f32 %v1508_v29, %v308_v25  ;;  %v709_v34 = vadd.f32 %v1524_v30, %v324_v26  ;;  %v564_v35 = vpop.f32.mrb[1].mxu0  ;;  %v628_v36 = vpop.f32.mrb[1].mxu1 }
 0x119   : > { %v691_v39 = vadd.f32 %v564_v35, %v306_v27  ;;  %v707_v40 = vadd.f32 %v628_v36, %v322_v28  ;;  %v1509_v41 = vpop.f32.mrb[2].mxu0  ;;  %v1525_v42 = vpop.f32.mrb[2].mxu1  ;;  %v318_v35 = vld [vmem:[#allocation2 + $0x60] sm:$0xff] }
 0x11a   : > { %725 = vst [vmem:[#allocation2 + $0x10] sm:$0xff] %v693_v33  ;;  %741 = vst [vmem:[#allocation2 + $0x90] sm:$0xff] %v709_v34  ;;  %v694_v43 = vadd.f32 %v1509_v41, %v309_v31  ;;  %v710_v44 = vadd.f32 %v1525_v42, %v325_v32  ;;  %v567_v45 = vpop.f32.mrb[3].mxu0  ;;  %v631_v46 = vpop.f32.mrb[3].mxu1  ;;  %v320_v33 = vld [vmem:[#allocation2 + $0x70] sm:$0xff]  ;;  %v334_v36 = vld [vmem:[#allocation2 + $0xe0] sm:$0xff] }
 0x11b   : > { %723 = vst [vmem:[#allocation2] sm:$0xff] %v691_v39  ;;  %739 = vst [vmem:[#allocation2 + $0x80] sm:$0xff] %v707_v40  ;;  %v692_v47 = vadd.f32 %v567_v45, %v307_v37  ;;  %v708_v48 = vadd.f32 %v631_v46, %v323_v38  ;;  %v336_v34 = vld [vmem:[#allocation2 + $0xf0] sm:$0xff]  ;;  %v321_v39 = vld [vmem:[#allocation2 + $0x78] sm:$0xff] }
 0x11c   : > { %726 = vst [vmem:[#allocation2 + $0x18] sm:$0xff] %v694_v43  ;;  %742 = vst [vmem:[#allocation2 + $0x98] sm:$0xff] %v710_v44  ;;  %v337_v40 = vld [vmem:[#allocation2 + $0xf8] sm:$0xff]  ;;  %v319_v45 = vld [vmem:[#allocation2 + $0x68] sm:$0xff] }
 0x11d   : > { %724 = vst [vmem:[#allocation2 + $0x8] sm:$0xff] %v692_v47  ;;  %740 = vst [vmem:[#allocation2 + $0x88] sm:$0xff] %v708_v48  ;;  %v335_v46 = vld [vmem:[#allocation2 + $0xe8] sm:$0xff] }
 0x11f   : > { %v1512_v53 = vpop.f32.mrb[4].mxu0  ;;  %v1528_v54 = vpop.f32.mrb[4].mxu1 }
 0x120   : > { %v697_v57 = vadd.f32 %v1512_v53, %v312_v49  ;;  %v713_v58 = vadd.f32 %v1528_v54, %v328_v50  ;;  %v580_v59 = vpop.f32.mrb[5].mxu0  ;;  %v644_v60 = vpop.f32.mrb[5].mxu1 }
 0x121   : > { %v695_v63 = vadd.f32 %v580_v59, %v310_v51  ;;  %v711_v0 = vadd.f32 %v644_v60, %v326_v52  ;;  %v1513_v1 = vpop.f32.mrb[6].mxu0  ;;  %v1529_v2 = vpop.f32.mrb[6].mxu1  ;;  %v1768_v59 = vld [vmem:[%s1851_s2] ss:$0 sm:$0xff] (!%p1223_p8) }
 0x122   : > { %729 = vst [vmem:[#allocation2 + $0x30] sm:$0xff] %v697_v57  ;;  %745 = vst [vmem:[#allocation2 + $0xb0] sm:$0xff] %v713_v58  ;;  %v698_v3 = vadd.f32 %v1513_v1, %v313_v55  ;;  %v714_v4 = vadd.f32 %v1529_v2, %v329_v56  ;;  %v583_v5 = vpop.f32.mrb[7].mxu0  ;;  %v647_v6 = vpop.f32.mrb[7].mxu1  ;;  %v759_v57 = vld [vmem:[#allocation2] sm:$0xff] (!%p1223_p8) }
 0x123   : > { %727 = vst [vmem:[#allocation2 + $0x20] sm:$0xff] %v695_v63  ;;  %743 = vst [vmem:[#allocation2 + $0xa0] sm:$0xff] %v711_v0  ;;  %v696_v7 = vadd.f32 %v583_v5, %v311_v61  ;;  %v712_v8 = vadd.f32 %v647_v6, %v327_v62  ;;  %v798_v60 = vadd.f32 (!%p1223_p8), %v1768_v59, %v759_v57  ;;  %v1293_v62 = vld [vmem:[%s1732_s10] sm:$0xff] (!%p1223_p8)   ;;  %v761_v63 = vld [vmem:[#allocation2 + $0x10] sm:$0xff] (!%p1223_p8) }
 0x124   : > { %730 = vst [vmem:[#allocation2 + $0x38] sm:$0xff] %v698_v3  ;;  %746 = vst [vmem:[#allocation2 + $0xb8] sm:$0xff] %v714_v4  ;;  %v760_v58 = vld [vmem:[#allocation2 + $0x8] sm:$0xff] (!%p1223_p8)  ;;  %v762_v0 = vld [vmem:[#allocation2 + $0x18] sm:$0xff] (!%p1223_p8)  ;;  %v1294_v1 = vunpack.c.l.bf16 (!%p1223_p8), %v1293_v62  ;;  %v1295_v2 = vunpack.c.h.bf16 (!%p1223_p8), %v1293_v62  ;;  %v800_v3 = vadd.f32 (!%p1223_p8), %v1768_v59, %v761_v63 }
 0x125   : > { %728 = vst [vmem:[#allocation2 + $0x28] sm:$0xff] %v696_v7  ;;  %744 = vst [vmem:[#allocation2 + $0xa8] sm:$0xff] %v712_v8  ;;  %v799_v61 = vadd.f32 (!%p1223_p8), %v1768_v59, %v760_v58  ;;  %v801_v4 = vadd.f32 (!%p1223_p8), %v1768_v59, %v762_v0  ;;  %v1436_v5 = vld [vmem:[%s1732_s10 + $0x8] sm:$0xff] (!%p1223_p8)  }
 0x126   : > { %v1298_v8 = vunpack.c.l.bf16 (!%p1223_p8), %v1436_v5  ;;  %v776_v62 = vld [vmem:[#allocation2 + $0x88] sm:$0xff] (!%p1223_p8) }
 0x127   : > { %v1516_v13 = vpop.f32.mrb[8].mxu0  ;;  %v1532_v14 = vpop.f32.mrb[8].mxu1 }
 0x128   : > { %v701_v17 = vadd.f32 %v1516_v13, %v316_v9  ;;  %v717_v18 = vadd.f32 %v1532_v14, %v332_v10  ;;  %v596_v19 = vpop.f32.mrb[9].mxu0  ;;  %v660_v20 = vpop.f32.mrb[9].mxu1  ;;  %v1299_v9 = vunpack.c.h.bf16 (!%p1223_p8), %v1436_v5 }
 0x129   : > { %v699_v23 = vadd.f32 %v596_v19, %v314_v11  ;;  %v715_v24 = vadd.f32 %v660_v20, %v330_v12  ;;  %v1517_v25 = vpop.f32.mrb[10].mxu0  ;;  %v1533_v26 = vpop.f32.mrb[10].mxu1  ;;  %v1437_v12 = vld [vmem:[%s1732_s10 + $0x10] sm:$0xff] (!%p1223_p8)   ;;  %v1438_v19 = vld [vmem:[%s1732_s10 + $0x18] sm:$0xff] (!%p1223_p8)  }
 0x12a   : > { %733 = vst [vmem:[#allocation2 + $0x50] sm:$0xff] %v701_v17  ;;  %749 = vst [vmem:[#allocation2 + $0xd0] sm:$0xff] %v717_v18  ;;  %v702_v27 = vadd.f32 %v1517_v25, %v317_v15  ;;  %v718_v28 = vadd.f32 %v1533_v26, %v333_v16  ;;  %v599_v29 = vpop.f32.mrb[11].mxu0  ;;  %v663_v30 = vpop.f32.mrb[11].mxu1  ;;  %v763_v6 = vld [vmem:[#allocation2 + $0x20] sm:$0xff] (!%p1223_p8)  ;;  %v765_v13 = vld [vmem:[#allocation2 + $0x30] sm:$0xff] (!%p1223_p8)  ;;  %v894_v15 = vadd.f32 (!%p1223_p8), %v1294_v1, %v798_v60  ;;  %v1302_v17 = vunpack.c.l.bf16 (!%p1223_p8), %v1437_v12 }
 0x12b   : > { %731 = vst [vmem:[#allocation2 + $0x40] sm:$0xff] %v699_v23  ;;  %747 = vst [vmem:[#allocation2 + $0xc0] sm:$0xff] %v715_v24  ;;  %v700_v31 = vadd.f32 %v599_v29, %v315_v21  ;;  %v716_v32 = vadd.f32 %v663_v30, %v331_v22  ;;  %v802_v10 = vadd.f32 (!%p1223_p8), %v1768_v59, %v763_v6  ;;  %v766_v14 = vld [vmem:[#allocation2 + $0x38] sm:$0xff] (!%p1223_p8)  ;;  %v1303_v18 = vunpack.c.h.bf16 (!%p1223_p8), %v1437_v12  ;;  %v1439_v26 = vld [vmem:[%s1732_s10 + $0x20] sm:$0xff] (!%p1223_p8)  }
 0x12c   : > { %734 = vst [vmem:[#allocation2 + $0x58] sm:$0xff] %v702_v27  ;;  %750 = vst [vmem:[#allocation2 + $0xd8] sm:$0xff] %v718_v28  ;;  %v764_v7 = vld [vmem:[#allocation2 + $0x28] sm:$0xff] (!%p1223_p8)  ;;  %v895_v16 = vadd.f32 (!%p1223_p8), %v1295_v2, %v799_v61  ;;  %v896_v22 = vadd.f32 (!%p1223_p8), %v1298_v8, %v800_v3  ;;  %v897_v23 = vadd.f32 (!%p1223_p8), %v1299_v9, %v801_v4  ;;  %v1306_v30 = vunpack.c.l.bf16 (!%p1223_p8), %v1438_v19  ;;  %v775_v61 = vld [vmem:[#allocation2 + $0x80] sm:$0xff] (!%p1223_p8) }
 0x12d   : > { %732 = vst [vmem:[#allocation2 + $0x48] sm:$0xff] %v700_v31  ;;  %748 = vst [vmem:[#allocation2 + $0xc8] sm:$0xff] %v716_v32  ;;  %v803_v11 = vadd.f32 (!%p1223_p8), %v1768_v59, %v764_v7  ;;  %v804_v24 = vadd.f32 (!%p1223_p8), %v1768_v59, %v765_v13  ;;  %v805_v25 = vadd.f32 (!%p1223_p8), %v1768_v59, %v766_v14  ;;  %v1443_v3 = vld [vmem:[%s1732_s10 + $0x40] sm:$0xff] (!%p1223_p8)   ;;  %v777_v8 = vld [vmem:[#allocation2 + $0x90] sm:$0xff] (!%p1223_p8) }
 0x12e   : > { %v1359_v27 = vpack.c.bf16 (!%p1223_p8), %v895_v16, %v894_v15  ;;  %v898_v28 = vadd.f32 (!%p1223_p8), %v1302_v17, %v802_v10  ;;  %v778_v9 = vld [vmem:[#allocation2 + $0x98] sm:$0xff] (!%p1223_p8)  ;;  %v1444_v10 = vld [vmem:[%s1732_s10 + $0x48] sm:$0xff] (!%p1223_p8)   ;;  %v814_v13 = vadd.f32 (!%p1223_p8), %v1768_v59, %v775_v61  ;;  %v815_v14 = vadd.f32 (!%p1223_p8), %v1768_v59, %v776_v62  ;;  %v1449_v62 = vld [vmem:[%s1732_s10 + $0x70] sm:$0xff] (!%p1223_p8)  }
 0x12f   : > { %v1520_v37 = vpop.f32.mrb[12].mxu0  ;;  %v1536_v38 = vpop.f32.mrb[12].mxu1  ;;  %758 = sbr.rel (%p1223_p8) target bundleno = 333 (0x14d), region = 44  ;;  %v899_v29 = vadd.f32 (!%p1223_p8), %v1303_v18, %v803_v11  ;;  %v1326_v17 = vunpack.c.l.bf16 (!%p1223_p8), %v1443_v3  ;;  %v1327_v18 = vunpack.c.h.bf16 (!%p1223_p8), %v1443_v3 }
 0x130   : > { %v705_v41 = vadd.f32 %v1520_v37, %v320_v33  ;;  %v721_v42 = vadd.f32 %v1536_v38, %v336_v34  ;;  %v612_v43 = vpop.f32.mrb[13].mxu0  ;;  %v676_v44 = vpop.f32.mrb[13].mxu1  ;;  %v1440_v33 = vld [vmem:[%s1732_s10 + $0x28] sm:$0xff] (!%p1223_p8)   ;;  %v1364_v34 = vpack.c.bf16 (!%p1223_p8), %v897_v23, %v896_v22  ;;  %1360 = vst [vmem:[%s1737_s13] sm:$0xff] (!%p1223_p8), %v1359_v27   ;;  %v816_v23 = vadd.f32 (!%p1223_p8), %v1768_v59, %v777_v8 }
 0x131   : > { %v703_v47 = vadd.f32 %v612_v43, %v318_v35  ;;  %v719_v48 = vadd.f32 %v676_v44, %v334_v36  ;;  %v1521_v49 = vpop.f32.mrb[14].mxu0  ;;  %v1537_v50 = vpop.f32.mrb[14].mxu1  ;;  %v769_v31 = vld [vmem:[#allocation2 + $0x50] sm:$0xff] (!%p1223_p8)  ;;  %v1307_v35 = vunpack.c.h.bf16 (!%p1223_p8), %v1438_v19  ;;  %v779_v19 = vld [vmem:[#allocation2 + $0xa0] sm:$0xff] (!%p1223_p8) }
 0x132   : > { %737 = vst [vmem:[#allocation2 + $0x70] sm:$0xff] %v705_v41  ;;  %753 = vst [vmem:[#allocation2 + $0xf0] sm:$0xff] %v721_v42  ;;  %v706_v51 = vadd.f32 %v1521_v49, %v321_v39  ;;  %v722_v52 = vadd.f32 %v1537_v50, %v337_v40  ;;  %v615_v53 = vpop.f32.mrb[15].mxu0  ;;  %v679_v54 = vpop.f32.mrb[15].mxu1  ;;  %v767_v20 = vld [vmem:[#allocation2 + $0x40] sm:$0xff] (!%p1223_p8)  ;;  %v1369_v39 = vpack.c.bf16 (!%p1223_p8), %v899_v29, %v898_v28  ;;  %v1310_v41 = vunpack.c.l.bf16 (!%p1223_p8), %v1439_v26  ;;  %v1441_v44 = vld [vmem:[%s1732_s10 + $0x30] sm:$0xff] (!%p1223_p8)  }
 0x133   : > { %735 = vst [vmem:[#allocation2 + $0x60] sm:$0xff] %v703_v47  ;;  %751 = vst [vmem:[#allocation2 + $0xe0] sm:$0xff] %v719_v48  ;;  %v704_v55 = vadd.f32 %v615_v53, %v319_v45  ;;  %v720_v56 = vadd.f32 %v679_v54, %v335_v46  ;;  %v770_v32 = vld [vmem:[#allocation2 + $0x58] sm:$0xff] (!%p1223_p8)  ;;  %v806_v36 = vadd.f32 (!%p1223_p8), %v1768_v59, %v767_v20  ;;  %v1311_v42 = vunpack.c.h.bf16 (!%p1223_p8), %v1439_v26  ;;  %v780_v20 = vld [vmem:[#allocation2 + $0xa8] sm:$0xff] (!%p1223_p8) }
 0x134   : > { %738 = vst [vmem:[#allocation2 + $0x78] sm:$0xff] %v706_v51  ;;  %754 = vst [vmem:[#allocation2 + $0xf8] sm:$0xff] %v722_v52  ;;  %v768_v21 = vld [vmem:[#allocation2 + $0x48] sm:$0xff] (!%p1223_p8)  ;;  %v900_v40 = vadd.f32 (!%p1223_p8), %v1306_v30, %v804_v24  ;;  %v901_v45 = vadd.f32 (!%p1223_p8), %v1307_v35, %v805_v25  ;;  %v808_v46 = vadd.f32 (!%p1223_p8), %v1768_v59, %v769_v31  ;;  %v1314_v48 = vunpack.c.l.bf16 (!%p1223_p8), %v1440_v33  ;;  %v781_v26 = vld [vmem:[#allocation2 + $0xb0] sm:$0xff] (!%p1223_p8) }
 0x135   : > { %736 = vst [vmem:[#allocation2 + $0x68] sm:$0xff] %v704_v55  ;;  %752 = vst [vmem:[#allocation2 + $0xe8] sm:$0xff] %v720_v56  ;;  %v807_v37 = vadd.f32 (!%p1223_p8), %v1768_v59, %v768_v21  ;;  %v809_v47 = vadd.f32 (!%p1223_p8), %v1768_v59, %v770_v32  ;;  %v902_v50 = vadd.f32 (!%p1223_p8), %v1310_v41, %v806_v36  ;;  %v1315_v52 = vunpack.c.h.bf16 (!%p1223_p8), %v1440_v33  ;;  %v1442_v55 = vld [vmem:[%s1732_s10 + $0x38] sm:$0xff] (!%p1223_p8)   ;;  %v1445_v21 = vld [vmem:[%s1732_s10 + $0x50] sm:$0xff] (!%p1223_p8)  }
 0x136   : > { %1451 = vst [vmem:[%s1737_s13 + $0x8] sm:$0xff] %v1364_v34   ;;  %1452 = vst [vmem:[%s1737_s13 + $0x10] sm:$0xff] %v1369_v39   ;;  %v1374_v56 = vpack.c.bf16 %v901_v45, %v900_v40  ;;  %v904_v57 = vadd.f32 %v1314_v48, %v808_v46  ;;  %v1318_v60 = vunpack.c.l.bf16 %v1441_v44  ;;  %v1319_v1 = vunpack.c.h.bf16 %v1441_v44  ;;  %v782_v31 = vld [vmem:[#allocation2 + $0xb8] sm:$0xff]  ;;  %v785_v48 = vld [vmem:[#allocation2 + $0xd0] sm:$0xff] }
 0x137   : > { %v903_v51 = vadd.f32 %v1311_v42, %v807_v37  ;;  %v905_v0 = vadd.f32 %v1315_v52, %v809_v47  ;;  %v1322_v6 = vunpack.c.l.bf16 %v1442_v55  ;;  %v1323_v7 = vunpack.c.h.bf16 %v1442_v55  ;;  %v1446_v32 = vld [vmem:[%s1732_s10 + $0x58] sm:$0xff]   ;;  %v783_v37 = vld [vmem:[#allocation2 + $0xc0] sm:$0xff] }
 0x138   : > { %1453 = vst [vmem:[%s1737_s13 + $0x18] sm:$0xff] %v1374_v56   ;;  %v817_v24 = vadd.f32 %v1768_v59, %v778_v9  ;;  %v1330_v25 = vunpack.c.l.bf16 %v1444_v10  ;;  %v910_v28 = vadd.f32 %v1326_v17, %v814_v13  ;;  %v911_v29 = vadd.f32 %v1327_v18, %v815_v14  ;;  %v1450_v9 = vld [vmem:[%s1732_s10 + $0x78] sm:$0xff]  }
 0x139   : > { %v773_v49 = vld [vmem:[#allocation2 + $0x70] sm:$0xff]  ;;  %v1379_v63 = vpack.c.bf16 %v903_v51, %v902_v50  ;;  %v1384_v11 = vpack.c.bf16 %v905_v0, %v904_v57  ;;  %v1331_v30 = vunpack.c.h.bf16 %v1444_v10  ;;  %v818_v34 = vadd.f32 %v1768_v59, %v779_v19  ;;  %v1448_v50 = vld [vmem:[%s1732_s10 + $0x68] sm:$0xff]  }
 0x13a   : > { %v771_v38 = vld [vmem:[#allocation2 + $0x60] sm:$0xff]  ;;  %v812_v2 = vadd.f32 %v1768_v59, %v773_v49  ;;  %v912_v33 = vadd.f32 %v1330_v25, %v816_v23  ;;  %v819_v35 = vadd.f32 %v1768_v59, %v780_v20  ;;  %v1334_v36 = vunpack.c.l.bf16 %v1445_v21  ;;  %v786_v49 = vld [vmem:[#allocation2 + $0xd8] sm:$0xff]  ;;  %v789_v3 = vld [vmem:[#allocation2 + $0xf0] sm:$0xff] }
 0x13b   : > { %v810_v53 = vadd.f32 %v1768_v59, %v771_v38  ;;  %v774_v54 = vld [vmem:[#allocation2 + $0x78] sm:$0xff]  ;;  %1454 = vst [vmem:[%s1737_s13 + $0x20] sm:$0xff] %v1379_v63   ;;  %1455 = vst [vmem:[%s1737_s13 + $0x28] sm:$0xff] %v1384_v11   ;;  %v784_v38 = vld [vmem:[#allocation2 + $0xc8] sm:$0xff]  ;;  %v1399_v39 = vpack.c.bf16 %v911_v29, %v910_v28  ;;  %v913_v40 = vadd.f32 %v1331_v30, %v817_v24  ;;  %v1335_v41 = vunpack.c.h.bf16 %v1445_v21 }
 0x13c   : > { %v772_v43 = vld [vmem:[#allocation2 + $0x68] sm:$0xff]  ;;  %v813_v5 = vadd.f32 %v1768_v59, %v774_v54  ;;  %v908_v15 = vadd.f32 %v1322_v6, %v812_v2  ;;  %v820_v42 = vadd.f32 %v1768_v59, %v781_v26  ;;  %v914_v44 = vadd.f32 %v1334_v36, %v818_v34  ;;  %v790_v8 = vld [vmem:[#allocation2 + $0xf8] sm:$0xff] }
 0x13d   : > { %v811_v58 = vadd.f32 %v1768_v59, %v772_v43  ;;  %v906_v4 = vadd.f32 %v1318_v60, %v810_v53  ;;  %v1447_v43 = vld [vmem:[%s1732_s10 + $0x60] sm:$0xff]   ;;  %v821_v45 = vadd.f32 %v1768_v59, %v782_v31  ;;  %v1338_v46 = vunpack.c.l.bf16 %v1446_v32  ;;  %1458 = vst [vmem:[%s1737_s13 + $0x40] sm:$0xff] %v1399_v39   ;;  %v788_v61 = vld [vmem:[#allocation2 + $0xe8] sm:$0xff] }
 0x13e   : > { %v909_v16 = vadd.f32 %v1323_v7, %v813_v5  ;;  %v1339_v47 = vunpack.c.h.bf16 %v1446_v32  ;;  %v1404_v51 = vpack.c.bf16 %v913_v40, %v912_v33  ;;  %v915_v52 = vadd.f32 %v1335_v41, %v819_v35  ;;  %v787_v60 = vld [vmem:[#allocation2 + $0xe0] sm:$0xff] }
 0x13f   : > { %v907_v12 = vadd.f32 %v1319_v1, %v811_v58  ;;  %v822_v53 = vadd.f32 %v1768_v59, %v783_v37  ;;  %v823_v54 = vadd.f32 %v1768_v59, %v784_v38  ;;  %v916_v55 = vadd.f32 %v1338_v46, %v820_v42 }
 0x140   : > { %v1394_v27 = vpack.c.bf16 %v909_v16, %v908_v15  ;;  %v917_v56 = vadd.f32 %v1339_v47, %v821_v45  ;;  %v1342_v57 = vunpack.c.l.bf16 %v1447_v43  ;;  %v1343_v58 = vunpack.c.h.bf16 %v1447_v43  ;;  %1459 = vst [vmem:[%s1737_s13 + $0x48] sm:$0xff] %v1404_v51  }
 0x141   : > { %v1389_v22 = vpack.c.bf16 %v907_v12, %v906_v4  ;;  %v1409_v63 = vpack.c.bf16 %v915_v52, %v914_v44  ;;  %v824_v0 = vadd.f32 %v1768_v59, %v785_v48  ;;  %v825_v1 = vadd.f32 %v1768_v59, %v786_v49 }
 0x142   : > { %1457 = vst [vmem:[%s1737_s13 + $0x38] sm:$0xff] %v1394_v27   ;;  %v1346_v2 = vunpack.c.l.bf16 %v1448_v50  ;;  %v1414_v4 = vpack.c.bf16 %v917_v56, %v916_v55  ;;  %v918_v5 = vadd.f32 %v1342_v57, %v822_v53  ;;  %v919_v6 = vadd.f32 %v1343_v58, %v823_v54 }
 0x143   : > { %1456 = vst [vmem:[%s1737_s13 + $0x30] sm:$0xff] %v1389_v22   ;;  %v1347_v7 = vunpack.c.h.bf16 %v1448_v50  ;;  %1460 = vst [vmem:[%s1737_s13 + $0x50] sm:$0xff] %v1409_v63   ;;  %v826_v11 = vadd.f32 %v1768_v59, %v787_v60  ;;  %v827_v12 = vadd.f32 %v1768_v59, %v788_v61  ;;  %v1350_v13 = vunpack.c.l.bf16 %v1449_v62 }
 0x144   : > { %v920_v10 = vadd.f32 %v1346_v2, %v824_v0  ;;  %1461 = vst [vmem:[%s1737_s13 + $0x58] sm:$0xff] %v1414_v4   ;;  %v1419_v14 = vpack.c.bf16 %v919_v6, %v918_v5  ;;  %v1351_v16 = vunpack.c.h.bf16 %v1449_v62  ;;  %v828_v17 = vadd.f32 %v1768_v59, %v789_v3 }
 0x145   : > { %v921_v15 = vadd.f32 %v1347_v7, %v825_v1  ;;  %v922_v18 = vadd.f32 %v1350_v13, %v826_v11  ;;  %v829_v19 = vadd.f32 %v1768_v59, %v790_v8  ;;  %v1354_v20 = vunpack.c.l.bf16 %v1450_v9 }
 0x146   : > { %v1355_v21 = vunpack.c.h.bf16 %v1450_v9  ;;  %1462 = vst [vmem:[%s1737_s13 + $0x60] sm:$0xff] %v1419_v14   ;;  %v923_v23 = vadd.f32 %v1351_v16, %v827_v12 }
 0x147   : > { %v1424_v22 = vpack.c.bf16 %v921_v15, %v920_v10  ;;  %v924_v24 = vadd.f32 %v1354_v20, %v828_v17 }
 0x148   : > { %v925_v25 = vadd.f32 %v1355_v21, %v829_v19  ;;  %v1429_v26 = vpack.c.bf16 %v923_v23, %v922_v18 }
 0x149   : > { %1463 = vst [vmem:[%s1737_s13 + $0x68] sm:$0xff] %v1424_v22  }
 0x14a   : > { %v1434_v27 = vpack.c.bf16 %v925_v25, %v924_v24  ;;  %1464 = vst [vmem:[%s1737_s13 + $0x70] sm:$0xff] %v1429_v26  }
 0x14c   : > { %1465 = vst [vmem:[%s1737_s13 + $0x78] sm:$0xff] %v1434_v27  }
 0x14d PF: > { %s14_s19 = sadd.s32 1, %s1657_s19   ;;  %s1854_s15 = smov %s1649_s17 }
 0x14e   : > { %p11_p9 = scmp.ge.s32.totalorder %s14_s19, 20   ;;  %s1855_s16 = smov %s1653_s18 }
 0x14f   : > { %s1856_s17 = smov %s1859_s20  ;;  %s1857_s18 = smov %s1863_s21 }
 0x150   :  { %13 = sbr.rel (!%p11_p9) target bundleno = 3 (0x3), region = 80 }

// kernel: _lambda_.18
= control target key start
LH: loop header
LB: loop body
LE: loop exit
PB: predicated region body
PF: predicated region fallthrough
CT: control target
= control target key end

     0   :  { %s1107_s18 = smov 0   ;;  %s1109_s19 = smov 0   ;;  %s1253_s0 = inlined_call_operand.vmem [shape: bf16[9,128,128], index: 0, kind: input, shape index: {}]   ;;  %s1254_s1 = inlined_call_operand.vmem [shape: bf16[9,128,128], index: 1, kind: input, shape index: {}]   ;;  %s1255_s2 = inlined_call_operand.vmem [shape: f32[1,128], index: 2, kind: input, shape index: {}]   ;;  %s1256_s3 = inlined_call_operand.vmem [shape: f32[1,128], index: 3, kind: input, shape index: {}]   ;;  %s1257_s4 = inlined_call_operand.vmem [shape: f32[1,128], index: 4, kind: input, shape index: {}]   ;;  %s1258_s5 = inlined_call_operand.vmem [shape: bf16[128,128], index: 5, kind: output, shape index: {}]  }
   0x1   :  { %s1111_s20 = smov 0  }
   0x2 LB: > { %s24_s21 = sadd.s32 1, %s1070_s19  ;;  %p836_p0 = scmp.ge.s32.totalorder %s1074_s20, 1  ;;  %s1074_s20 = sphi %s1111_s20, %s15_s20   ;;  %s1070_s19 = sphi %s1109_s19, %s1260_s19   ;;  %s1066_s18 = sphi %s1107_s18, %s1259_s18  }
   0x3   : > { %p25_p1 = scmp.ge.s32.totalorder %s24_s21, 9  ;;  %p216_p2 = scmp.lt.s32.totalorder %s1074_s20, 10 }
   0x5   : > { %s1262_s21 = smov (%p25_p1, %s24_s21), 0  ;;  %p217_p3 = pnand %p836_p0, %p216_p2 }
   0x6   : > { %p254_p4 = scmp.lt.s32.totalorder (!%p217_p3), %s1066_s18, 8  ;;  %p841_p5 = scmp.ne.s32.totalorder (!%p217_p3), %s1066_s18, 0 }
   0x7   : > { %220 = sbr.rel (%p217_p3) target bundleno = 304 (0x130), region = 40 }
   0xe   : > { %s255_s22 = scalar_select %p254_p4, %s1066_s18, 8 }
   0xf   : > { %278 = sbr.rel (%p841_p5) target bundleno = 24 (0x18), region = 44  ;;  %v1076_v0 = vmov (!%p841_p5), 0.0  }
  0x10   : > { %s882_s23 = sshll.u32 %s255_s22, 6  ;;  %279 = vst [vmem:[#allocation2] sm:$0xff] (!%p841_p5), %v1076_v0  ;;  %280 = vst [vmem:[#allocation2 + $0x8] sm:$0xff] (!%p841_p5), %v1076_v0 }
  0x11   : > { %s1132_s26 = scalar_lea.vmem %s1253_s0, %s882_s23  ;;  %s1137_s29 = scalar_lea.vmem %s1254_s1, %s882_s23  ;;  %281 = vst [vmem:[#allocation2 + $0x10] sm:$0xff] (!%p841_p5), %v1076_v0  ;;  %282 = vst [vmem:[#allocation2 + $0x18] sm:$0xff] (!%p841_p5), %v1076_v0 }
  0x12   : > { %283 = vst [vmem:[#allocation2 + $0x20] sm:$0xff] (!%p841_p5), %v1076_v0  ;;  %284 = vst [vmem:[#allocation2 + $0x28] sm:$0xff] (!%p841_p5), %v1076_v0 }
  0x13   : > { %285 = vst [vmem:[#allocation2 + $0x30] sm:$0xff] (!%p841_p5), %v1076_v0  ;;  %286 = vst [vmem:[#allocation2 + $0x38] sm:$0xff] (!%p841_p5), %v1076_v0 }
  0x14   : > { %287 = vst [vmem:[#allocation2 + $0x40] sm:$0xff] (!%p841_p5), %v1076_v0  ;;  %288 = vst [vmem:[#allocation2 + $0x48] sm:$0xff] (!%p841_p5), %v1076_v0 }
  0x15   : > { %289 = vst [vmem:[#allocation2 + $0x50] sm:$0xff] (!%p841_p5), %v1076_v0  ;;  %290 = vst [vmem:[#allocation2 + $0x58] sm:$0xff] (!%p841_p5), %v1076_v0 }
  0x16   : > { %291 = vst [vmem:[#allocation2 + $0x60] sm:$0xff] %v1076_v0  ;;  %292 = vst [vmem:[#allocation2 + $0x68] sm:$0xff] %v1076_v0 }
  0x17   : > { %293 = vst [vmem:[#allocation2 + $0x70] sm:$0xff] %v1076_v0  ;;  %294 = vst [vmem:[#allocation2 + $0x78] sm:$0xff] %v1076_v0 }
  0x18 PF: > { %v1036_v1 = vld [vmem:[%s1137_s29] sm:$0xff]   ;;  %v1037_v2 = vld [vmem:[%s1137_s29 + $0x8] sm:$0xff]   ;;  %v1038_v3 = vld [vmem:[%s1137_s29 + $0x10] sm:$0xff]   ;;  %p858_p6 = scmp.ne.s32.totalorder %s1066_s18, 8 }
  0x19   : > { %963 = vmatprep.subr.bf16.mxu0 %v1036_v1  ;;  %995 = vmatprep.subr.bf16.mxu1 %v1036_v1  ;;  %v1039_v4 = vld [vmem:[%s1137_s29 + $0x18] sm:$0xff]   ;;  %v1044_v5 = vld [vmem:[%s1132_s26] sm:$0xff]   ;;  %v1041_v8 = vld [vmem:[%s1137_s29 + $0x28] sm:$0xff]  }
  0x1a   : > { %964 = vmatpush3.bf16.msra.mxu0 %v1036_v1  ;;  %1003 = vmatpush3.bf16.msra.mxu1 %v1036_v1  ;;  %v1045_v6 = vld [vmem:[%s1132_s26 + $0x20] sm:$0xff]   ;;  %v1042_v9 = vld [vmem:[%s1137_s29 + $0x30] sm:$0xff]   ;;  %v1043_v10 = vld [vmem:[%s1137_s29 + $0x38] sm:$0xff]  }
  0x1b   : > { %965 = vmatprep.subr.bf16.mxu0 %v1037_v2  ;;  %996 = vmatprep.subr.bf16.mxu1 %v1037_v2  ;;  %v1040_v7 = vld [vmem:[%s1137_s29 + $0x20] sm:$0xff]   ;;  %v1046_v11 = vld [vmem:[%s1132_s26 + $0x8] sm:$0xff]   ;;  %v1048_v13 = vld [vmem:[%s1132_s26 + $0x10] sm:$0xff]  }
  0x1c   : > { %979 = vmatprep.mubr.bf16.mxu0 %v1044_v5  ;;  %987 = vmatprep.mubr.bf16.mxu1 %v1045_v6  ;;  %v1047_v12 = vld [vmem:[%s1132_s26 + $0x28] sm:$0xff]   ;;  %v1049_v14 = vld [vmem:[%s1132_s26 + $0x30] sm:$0xff]   ;;  %v1050_v15 = vld [vmem:[%s1132_s26 + $0x18] sm:$0xff]  }
  0x1d   : > { %v1051_v16 = vld [vmem:[%s1132_s26 + $0x38] sm:$0xff]   ;;  %v297_v17 = vld [vmem:[#allocation2 + $0x10] sm:$0xff]  ;;  %v295_v19 = vld [vmem:[#allocation2] sm:$0xff] }
  0x1e   : > { %966 = vmatpush3.bf16.msra.mxu0 %v1037_v2  ;;  %1004 = vmatpush3.bf16.msra.mxu1 %v1037_v2  ;;  %v305_v18 = vld [vmem:[#allocation2 + $0x50] sm:$0xff]  ;;  %v303_v20 = vld [vmem:[#allocation2 + $0x40] sm:$0xff]  ;;  %v298_v23 = vld [vmem:[#allocation2 + $0x18] sm:$0xff] }
  0x1f   : > { %967 = vmatprep.subr.bf16.mxu0 %v1038_v3  ;;  %997 = vmatprep.subr.bf16.mxu1 %v1038_v3  ;;  %v306_v24 = vld [vmem:[#allocation2 + $0x58] sm:$0xff]  ;;  %v296_v29 = vld [vmem:[#allocation2 + $0x8] sm:$0xff]  ;;  %v301_v41 = vld [vmem:[#allocation2 + $0x30] sm:$0xff] }
  0x20   : > { %v304_v30 = vld [vmem:[#allocation2 + $0x48] sm:$0xff]  ;;  %v309_v42 = vld [vmem:[#allocation2 + $0x70] sm:$0xff]  ;;  %v299_v43 = vld [vmem:[#allocation2 + $0x20] sm:$0xff] }
  0x21   : > { %v307_v44 = vld [vmem:[#allocation2 + $0x60] sm:$0xff]  ;;  %v302_v47 = vld [vmem:[#allocation2 + $0x38] sm:$0xff]  ;;  %v300_v53 = vld [vmem:[#allocation2 + $0x28] sm:$0xff] }
  0x22   : > { %968 = vmatpush3.bf16.msra.mxu0 %v1038_v3  ;;  %1005 = vmatpush3.bf16.msra.mxu1 %v1038_v3  ;;  %v310_v48 = vld [vmem:[#allocation2 + $0x78] sm:$0xff]  ;;  %v308_v54 = vld [vmem:[#allocation2 + $0x68] sm:$0xff]  ;;  %v1160_v3 = vld [vmem:[%s1255_s2] ss:$0 sm:$0xff] (!%p858_p6) }
  0x23   : > { %969 = vmatprep.subr.bf16.mxu0 %v1039_v4  ;;  %998 = vmatprep.subr.bf16.mxu1 %v1039_v4  ;;  %v1167_v6 = vld [vmem:[%s1256_s3] ss:$0 sm:$0xff] (!%p858_p6) }
  0x26   : > { %970 = vmatpush3.bf16.msra.mxu0 %v1039_v4  ;;  %1006 = vmatpush3.bf16.msra.mxu1 %v1039_v4 }
  0x27   : > { %971 = vmatprep.subr.bf16.mxu0 %v1040_v7  ;;  %999 = vmatprep.subr.bf16.mxu1 %v1040_v7 }
  0x2a   : > { %972 = vmatpush3.bf16.msra.mxu0 %v1040_v7  ;;  %1007 = vmatpush3.bf16.msra.mxu1 %v1040_v7  ;;  %v1172_v7 = vld [vmem:[%s1257_s4] ss:$0 sm:$0xff] (!%p858_p6) }
  0x2b   : > { %973 = vmatprep.subr.bf16.mxu0 %v1041_v8  ;;  %1000 = vmatprep.subr.bf16.mxu1 %v1041_v8 }
  0x2e   : > { %974 = vmatpush3.bf16.msra.mxu0 %v1041_v8  ;;  %1008 = vmatpush3.bf16.msra.mxu1 %v1041_v8 }
  0x2f   : > { %975 = vmatprep.subr.bf16.mxu0 %v1042_v9  ;;  %1001 = vmatprep.subr.bf16.mxu1 %v1042_v9 }
  0x32   : > { %976 = vmatpush3.bf16.msra.mxu0 %v1042_v9  ;;  %1009 = vmatpush3.bf16.msra.mxu1 %v1042_v9 }
  0x33   : > { %977 = vmatprep.subr.bf16.mxu0 %v1043_v10  ;;  %1002 = vmatprep.subr.bf16.mxu1 %v1043_v10 }
  0x36   : > { %978 = vmatpush3.bf16.msra.mxu0 %v1043_v10  ;;  %1010 = vmatpush3.bf16.msra.mxu1 %v1043_v10 }
  0x39   : > { %980 = vmatmul.mubr.bf16.vlgmr.msra.gmra.mrb[0].mxu0 %v1046_v11  ;;  %988 = vmatmul.mubr.bf16.vlgmr.msra.gmra.mrb[0].mxu1 %v1047_v12 }
  0x3a   : > { %983 = vmatprep.mubr.bf16.mxu0 %v1048_v13  ;;  %991 = vmatprep.mubr.bf16.mxu1 %v1049_v14 }
  0x41   : > { %984 = vmatmul.mubr.bf16.gmra.mrb[4].mxu0 %v1050_v15  ;;  %992 = vmatmul.mubr.bf16.gmra.mrb[4].mxu1 %v1051_v16 }
 0x10c   : > { %v981_v21 = vpop.f32.mrb[0].mxu0  ;;  %v989_v22 = vpop.f32.mrb[0].mxu1 }
 0x10d   : > { %v538_v25 = vadd.f32 %v981_v21, %v297_v17  ;;  %v546_v26 = vadd.f32 %v989_v22, %v305_v18  ;;  %v473_v27 = vpop.f32.mrb[1].mxu0  ;;  %v505_v28 = vpop.f32.mrb[1].mxu1 }
 0x10e   : > { %v536_v31 = vadd.f32 %v473_v27, %v295_v19  ;;  %v544_v32 = vadd.f32 %v505_v28, %v303_v20  ;;  %v982_v33 = vpop.f32.mrb[2].mxu0  ;;  %v990_v34 = vpop.f32.mrb[2].mxu1 }
 0x10f   : > { %554 = vst [vmem:[#allocation2 + $0x10] sm:$0xff] %v538_v25  ;;  %562 = vst [vmem:[#allocation2 + $0x50] sm:$0xff] %v546_v26  ;;  %v539_v35 = vadd.f32 %v982_v33, %v298_v23  ;;  %v547_v36 = vadd.f32 %v990_v34, %v306_v24  ;;  %v476_v37 = vpop.f32.mrb[3].mxu0  ;;  %v508_v38 = vpop.f32.mrb[3].mxu1 }
 0x110   : > { %552 = vst [vmem:[#allocation2] sm:$0xff] %v536_v31  ;;  %560 = vst [vmem:[#allocation2 + $0x40] sm:$0xff] %v544_v32  ;;  %v537_v39 = vadd.f32 %v476_v37, %v296_v29  ;;  %v545_v40 = vadd.f32 %v508_v38, %v304_v30 }
 0x111   : > { %555 = vst [vmem:[#allocation2 + $0x18] sm:$0xff] %v539_v35  ;;  %563 = vst [vmem:[#allocation2 + $0x58] sm:$0xff] %v547_v36 }
 0x112   : > { %553 = vst [vmem:[#allocation2 + $0x8] sm:$0xff] %v537_v39  ;;  %561 = vst [vmem:[#allocation2 + $0x48] sm:$0xff] %v545_v40 }
 0x114   : > { %v985_v45 = vpop.f32.mrb[4].mxu0  ;;  %v993_v46 = vpop.f32.mrb[4].mxu1  ;;  %571 = sbr.rel (%p858_p6) target bundleno = 304 (0x130), region = 48 }
 0x115   : > { %v542_v49 = vadd.f32 %v985_v45, %v301_v41  ;;  %v550_v50 = vadd.f32 %v993_v46, %v309_v42  ;;  %v489_v51 = vpop.f32.mrb[5].mxu0  ;;  %v521_v52 = vpop.f32.mrb[5].mxu1 }
 0x116   : > { %v540_v55 = vadd.f32 %v489_v51, %v299_v43  ;;  %v548_v56 = vadd.f32 %v521_v52, %v307_v44  ;;  %v986_v57 = vpop.f32.mrb[6].mxu0  ;;  %v994_v58 = vpop.f32.mrb[6].mxu1  ;;  %v574_v8 = vld [vmem:[#allocation2 + $0x10] sm:$0xff] (!%p858_p6) }
 0x117   : > { %558 = vst [vmem:[#allocation2 + $0x30] sm:$0xff] %v542_v49  ;;  %566 = vst [vmem:[#allocation2 + $0x70] sm:$0xff] %v550_v50  ;;  %v543_v59 = vadd.f32 %v986_v57, %v302_v47  ;;  %v551_v60 = vadd.f32 %v994_v58, %v310_v48  ;;  %v492_v61 = vpop.f32.mrb[7].mxu0  ;;  %v524_v62 = vpop.f32.mrb[7].mxu1  ;;  %v572_v1 = vld [vmem:[#allocation2] sm:$0xff] (!%p858_p6)  ;;  %v597_v10 = vadd.f32 (!%p858_p6), %v1160_v3, %v574_v8  ;;  %v582_v41 = vld [vmem:[#allocation2 + $0x50] sm:$0xff] (!%p858_p6) }
 0x118   : > { %556 = vst [vmem:[#allocation2 + $0x20] sm:$0xff] %v540_v55  ;;  %564 = vst [vmem:[#allocation2 + $0x60] sm:$0xff] %v548_v56  ;;  %v541_v63 = vadd.f32 %v492_v61, %v300_v53  ;;  %v549_v0 = vadd.f32 %v524_v62, %v308_v54  ;;  %v595_v4 = vadd.f32 (!%p858_p6), %v1160_v3, %v572_v1  ;;  %v575_v9 = vld [vmem:[#allocation2 + $0x18] sm:$0xff] (!%p858_p6)  ;;  %v580_v31 = vld [vmem:[#allocation2 + $0x40] sm:$0xff] (!%p858_p6) }
 0x119   : > { %559 = vst [vmem:[#allocation2 + $0x38] sm:$0xff] %v543_v59  ;;  %567 = vst [vmem:[#allocation2 + $0x78] sm:$0xff] %v551_v60  ;;  %v573_v2 = vld [vmem:[#allocation2 + $0x8] sm:$0xff] (!%p858_p6)  ;;  %v598_v15 = vadd.f32 (!%p858_p6), %v1160_v3, %v575_v9  ;;  %v620_v19 = vmul.f32 (!%p858_p6), %v1167_v6, %v597_v10  ;;  %v583_v42 = vld [vmem:[#allocation2 + $0x58] sm:$0xff] (!%p858_p6)  ;;  %v603_v46 = vadd.f32 (!%p858_p6), %v1160_v3, %v580_v31 }
 0x11a   : > { %557 = vst [vmem:[#allocation2 + $0x28] sm:$0xff] %v541_v63  ;;  %565 = vst [vmem:[#allocation2 + $0x68] sm:$0xff] %v549_v0  ;;  %v596_v5 = vadd.f32 (!%p858_p6), %v1160_v3, %v573_v2  ;;  %v618_v13 = vmul.f32 (!%p858_p6), %v1167_v6, %v595_v4  ;;  %v581_v36 = vld [vmem:[#allocation2 + $0x48] sm:$0xff] (!%p858_p6)  ;;  %v605_v55 = vadd.f32 (!%p858_p6), %v1160_v3, %v582_v41 }
 0x11b   : > { %v621_v25 = vmul.f32 %v1167_v6, %v598_v15  ;;  %v643_v27 = vadd.f32 %v1172_v7, %v620_v19  ;;  %v604_v51 = vadd.f32 %v1160_v3, %v581_v36  ;;  %v626_v54 = vmul.f32 %v1167_v6, %v603_v46 }
 0x11c   : > { %v619_v14 = vmul.f32 %v1167_v6, %v596_v5  ;;  %v641_v23 = vadd.f32 %v1172_v7, %v618_v13  ;;  %v606_v56 = vadd.f32 %v1160_v3, %v583_v42  ;;  %v628_v0 = vmul.f32 %v1167_v6, %v605_v55 }
 0x11d   : > { %v644_v34 = vadd.f32 %v1172_v7, %v621_v25  ;;  %v659_v37 = vmax.f32 %v643_v27, 0.0  ;;  %v627_v61 = vmul.f32 %v1167_v6, %v604_v51  ;;  %v649_v63 = vadd.f32 %v1172_v7, %v626_v54 }
 0x11e   : > { %v578_v17 = vld [vmem:[#allocation2 + $0x30] sm:$0xff]  ;;  %v642_v24 = vadd.f32 %v1172_v7, %v619_v14  ;;  %v657_v32 = vmax.f32 %v641_v23, 0.0  ;;  %v629_v1 = vmul.f32 %v1167_v6, %v606_v56 }
 0x11f   : > { %v576_v11 = vld [vmem:[#allocation2 + $0x20] sm:$0xff]  ;;  %v601_v21 = vadd.f32 %v1160_v3, %v578_v17  ;;  %v660_v44 = vmax.f32 %v644_v34, 0.0  ;;  %v586_v57 = vld [vmem:[#allocation2 + $0x70] sm:$0xff]  ;;  %v650_v4 = vadd.f32 %v1172_v7, %v627_v61  ;;  %v665_v10 = vmax.f32 %v649_v63, 0.0 }
 0x120   : > { %v599_v16 = vadd.f32 %v1160_v3, %v576_v11  ;;  %v579_v18 = vld [vmem:[#allocation2 + $0x38] sm:$0xff]  ;;  %v658_v33 = vmax.f32 %v642_v24, 0.0  ;;  %v584_v47 = vld [vmem:[#allocation2 + $0x60] sm:$0xff]  ;;  %v609_v8 = vadd.f32 %v1160_v3, %v586_v57  ;;  %v651_v11 = vadd.f32 %v1172_v7, %v628_v0 }
 0x121   : > { %v577_v12 = vld [vmem:[#allocation2 + $0x28] sm:$0xff]  ;;  %v602_v22 = vadd.f32 %v1160_v3, %v579_v18  ;;  %v624_v29 = vmul.f32 %v1167_v6, %v601_v21  ;;  %v908_v53 = vpack.c.bf16 %v660_v44, %v659_v37  ;;  %v587_v58 = vld [vmem:[#allocation2 + $0x78] sm:$0xff]  ;;  %v607_v62 = vadd.f32 %v1160_v3, %v584_v47 }
 0x122   : > { %v600_v20 = vadd.f32 %v1160_v3, %v577_v12  ;;  %v622_v26 = vmul.f32 %v1167_v6, %v599_v16  ;;  %v903_v43 = vpack.c.bf16 %v658_v33, %v657_v32  ;;  %v585_v52 = vld [vmem:[#allocation2 + $0x68] sm:$0xff]  ;;  %v610_v9 = vadd.f32 %v1160_v3, %v587_v58 }
 0x123   : > { %v625_v30 = vmul.f32 %v1167_v6, %v602_v22  ;;  %v647_v39 = vadd.f32 %v1172_v7, %v624_v29  ;;  %940 = vst [vmem:[%s1258_s5 + $0x8] sm:$0xff] %v908_v53   ;;  %v608_v2 = vadd.f32 %v1160_v3, %v585_v52  ;;  %v630_v5 = vmul.f32 %v1167_v6, %v607_v62 }
 0x124   : > { %v623_v28 = vmul.f32 %v1167_v6, %v600_v20  ;;  %v645_v35 = vadd.f32 %v1172_v7, %v622_v26  ;;  %904 = vst [vmem:[%s1258_s5] sm:$0xff] %v903_v43   ;;  %v652_v12 = vadd.f32 %v1172_v7, %v629_v1  ;;  %v666_v14 = vmax.f32 %v650_v4, 0.0 }
 0x125   : > { %v648_v40 = vadd.f32 %v1172_v7, %v625_v30  ;;  %v663_v49 = vmax.f32 %v647_v39, 0.0  ;;  %v631_v13 = vmul.f32 %v1167_v6, %v608_v2  ;;  %v653_v15 = vadd.f32 %v1172_v7, %v630_v5 }
 0x126   : > { %v646_v38 = vadd.f32 %v1172_v7, %v623_v28  ;;  %v661_v45 = vmax.f32 %v645_v35, 0.0  ;;  %v632_v16 = vmul.f32 %v1167_v6, %v609_v8  ;;  %v633_v17 = vmul.f32 %v1167_v6, %v610_v9 }
 0x127   : > { %v664_v50 = vmax.f32 %v648_v40, 0.0  ;;  %v667_v18 = vmax.f32 %v651_v11, 0.0  ;;  %v668_v19 = vmax.f32 %v652_v12, 0.0  ;;  %v654_v20 = vadd.f32 %v1172_v7, %v631_v13 }
 0x128   : > { %v662_v48 = vmax.f32 %v646_v38, 0.0  ;;  %v923_v21 = vpack.c.bf16 %v666_v14, %v665_v10  ;;  %v669_v3 = vmax.f32 %v653_v15, 0.0  ;;  %v655_v22 = vadd.f32 %v1172_v7, %v632_v16 }
 0x129   : > { %v918_v60 = vpack.c.bf16 %v664_v50, %v663_v49  ;;  %v656_v23 = vadd.f32 %v1172_v7, %v633_v17  ;;  %v928_v24 = vpack.c.bf16 %v668_v19, %v667_v18  ;;  %v670_v25 = vmax.f32 %v654_v20, 0.0 }
 0x12a   : > { %v913_v59 = vpack.c.bf16 %v662_v48, %v661_v45  ;;  %943 = vst [vmem:[%s1258_s5 + $0x20] sm:$0xff] %v923_v21   ;;  %v671_v26 = vmax.f32 %v655_v22, 0.0 }
 0x12b   : > { %942 = vst [vmem:[%s1258_s5 + $0x18] sm:$0xff] %v918_v60   ;;  %v672_v27 = vmax.f32 %v656_v23, 0.0  ;;  %944 = vst [vmem:[%s1258_s5 + $0x28] sm:$0xff] %v928_v24   ;;  %v933_v6 = vpack.c.bf16 %v670_v25, %v669_v3 }
 0x12c   : > { %941 = vst [vmem:[%s1258_s5 + $0x10] sm:$0xff] %v913_v59  }
 0x12d   : > { %v938_v28 = vpack.c.bf16 %v672_v27, %v671_v26  ;;  %945 = vst [vmem:[%s1258_s5 + $0x30] sm:$0xff] %v933_v6  }
 0x12f   : > { %946 = vst [vmem:[%s1258_s5 + $0x38] sm:$0xff] %v938_v28  }
 0x130 PF: > { %s15_s20 = sadd.s32 1, %s1074_s20   ;;  %s1259_s18 = smov %s1070_s19 }
 0x131   : > { %p12_p7 = scmp.ge.s32.totalorder %s15_s20, 11   ;;  %s1260_s19 = smov %s1262_s21 }
 0x133   :  { %14 = sbr.rel (!%p12_p7) target bundleno = 2 (0x2), region = 81 }

// kernel: _lambda_.20
= control target key start
LH: loop header
LB: loop body
LE: loop exit
PB: predicated region body
PF: predicated region fallthrough
CT: control target
= control target key end

     0   :  { %s1136_s15 = smov 0   ;;  %s1138_s16 = smov 0   ;;  %s1264_s0 = inlined_call_operand.vmem [shape: bf16[9,128,128], index: 0, kind: input, shape index: {}]   ;;  %s1265_s1 = inlined_call_operand.vmem [shape: bf16[9,128,128], index: 1, kind: input, shape index: {}]   ;;  %s1266_s2 = inlined_call_operand.vmem [shape: f32[1,128], index: 2, kind: input, shape index: {}]   ;;  %s1267_s3 = inlined_call_operand.vmem [shape: bf16[128,128], index: 3, kind: input, shape index: {}]   ;;  %s1268_s4 = inlined_call_operand.vmem [shape: bf16[128,128], index: 4, kind: output, shape index: {}]  }
   0x1   :  { %s1140_s17 = smov 0  }
   0x2 LB: > { %s23_s18 = sadd.s32 1, %s1104_s16  ;;  %p833_p0 = scmp.ge.s32.totalorder %s1108_s17, 1  ;;  %s1108_s17 = sphi %s1140_s17, %s14_s17   ;;  %s1104_s16 = sphi %s1138_s16, %s1270_s16   ;;  %s1100_s15 = sphi %s1136_s15, %s1269_s15  }
   0x3   : > { %p24_p1 = scmp.ge.s32.totalorder %s23_s18, 9  ;;  %p202_p2 = scmp.lt.s32.totalorder %s1108_s17, 10 }
   0x5   : > { %s1272_s18 = smov (%p24_p1, %s23_s18), 0  ;;  %p203_p3 = pnand %p833_p0, %p202_p2 }
   0x6   : > { %p243_p4 = scmp.lt.s32.totalorder (!%p203_p3), %s1100_s15, 8  ;;  %p838_p5 = scmp.ne.s32.totalorder (!%p203_p3), %s1100_s15, 0 }
   0x7   : > { %206 = sbr.rel (%p203_p3) target bundleno = 298 (0x12a), region = 36 }
   0xe   : > { %s244_s19 = scalar_select %p243_p4, %s1100_s15, 8 }
   0xf   : > { %273 = sbr.rel (%p838_p5) target bundleno = 24 (0x18), region = 40  ;;  %v1110_v0 = vmov (!%p838_p5), 0.0  }
  0x10   : > { %s877_s20 = sshll.u32 %s244_s19, 6  ;;  %274 = vst [vmem:[#allocation2] sm:$0xff] (!%p838_p5), %v1110_v0  ;;  %275 = vst [vmem:[#allocation2 + $0x8] sm:$0xff] (!%p838_p5), %v1110_v0 }
  0x11   : > { %s1161_s23 = scalar_lea.vmem %s1264_s0, %s877_s20  ;;  %s1166_s26 = scalar_lea.vmem %s1265_s1, %s877_s20  ;;  %276 = vst [vmem:[#allocation2 + $0x10] sm:$0xff] (!%p838_p5), %v1110_v0  ;;  %277 = vst [vmem:[#allocation2 + $0x18] sm:$0xff] (!%p838_p5), %v1110_v0 }
  0x12   : > { %278 = vst [vmem:[#allocation2 + $0x20] sm:$0xff] (!%p838_p5), %v1110_v0  ;;  %279 = vst [vmem:[#allocation2 + $0x28] sm:$0xff] (!%p838_p5), %v1110_v0 }
  0x13   : > { %280 = vst [vmem:[#allocation2 + $0x30] sm:$0xff] (!%p838_p5), %v1110_v0  ;;  %281 = vst [vmem:[#allocation2 + $0x38] sm:$0xff] (!%p838_p5), %v1110_v0 }
  0x14   : > { %282 = vst [vmem:[#allocation2 + $0x40] sm:$0xff] (!%p838_p5), %v1110_v0  ;;  %283 = vst [vmem:[#allocation2 + $0x48] sm:$0xff] (!%p838_p5), %v1110_v0 }
  0x15   : > { %284 = vst [vmem:[#allocation2 + $0x50] sm:$0xff] (!%p838_p5), %v1110_v0  ;;  %285 = vst [vmem:[#allocation2 + $0x58] sm:$0xff] (!%p838_p5), %v1110_v0 }
  0x16   : > { %286 = vst [vmem:[#allocation2 + $0x60] sm:$0xff] %v1110_v0  ;;  %287 = vst [vmem:[#allocation2 + $0x68] sm:$0xff] %v1110_v0 }
  0x17   : > { %288 = vst [vmem:[#allocation2 + $0x70] sm:$0xff] %v1110_v0  ;;  %289 = vst [vmem:[#allocation2 + $0x78] sm:$0xff] %v1110_v0 }
  0x18 PF: > { %v1070_v1 = vld [vmem:[%s1166_s26] sm:$0xff]   ;;  %v1071_v2 = vld [vmem:[%s1166_s26 + $0x8] sm:$0xff]   ;;  %v1072_v3 = vld [vmem:[%s1166_s26 + $0x10] sm:$0xff]   ;;  %p855_p6 = scmp.ne.s32.totalorder %s1100_s15, 8 }
  0x19   : > { %997 = vmatprep.subr.bf16.mxu0 %v1070_v1  ;;  %1029 = vmatprep.subr.bf16.mxu1 %v1070_v1  ;;  %v1073_v4 = vld [vmem:[%s1166_s26 + $0x18] sm:$0xff]   ;;  %v1078_v5 = vld [vmem:[%s1161_s23] sm:$0xff]   ;;  %v1075_v8 = vld [vmem:[%s1166_s26 + $0x28] sm:$0xff]  }
  0x1a   : > { %998 = vmatpush3.bf16.msra.mxu0 %v1070_v1  ;;  %1037 = vmatpush3.bf16.msra.mxu1 %v1070_v1  ;;  %v1079_v6 = vld [vmem:[%s1161_s23 + $0x20] sm:$0xff]   ;;  %v1076_v9 = vld [vmem:[%s1166_s26 + $0x30] sm:$0xff]   ;;  %v1077_v10 = vld [vmem:[%s1166_s26 + $0x38] sm:$0xff]  }
  0x1b   : > { %999 = vmatprep.subr.bf16.mxu0 %v1071_v2  ;;  %1030 = vmatprep.subr.bf16.mxu1 %v1071_v2  ;;  %v1074_v7 = vld [vmem:[%s1166_s26 + $0x20] sm:$0xff]   ;;  %v1080_v11 = vld [vmem:[%s1161_s23 + $0x8] sm:$0xff]   ;;  %v1082_v13 = vld [vmem:[%s1161_s23 + $0x10] sm:$0xff]  }
  0x1c   : > { %1013 = vmatprep.mubr.bf16.mxu0 %v1078_v5  ;;  %1021 = vmatprep.mubr.bf16.mxu1 %v1079_v6  ;;  %v1081_v12 = vld [vmem:[%s1161_s23 + $0x28] sm:$0xff]   ;;  %v1083_v14 = vld [vmem:[%s1161_s23 + $0x30] sm:$0xff]   ;;  %v1084_v15 = vld [vmem:[%s1161_s23 + $0x18] sm:$0xff]  }
  0x1d   : > { %v1085_v16 = vld [vmem:[%s1161_s23 + $0x38] sm:$0xff]   ;;  %v292_v17 = vld [vmem:[#allocation2 + $0x10] sm:$0xff]  ;;  %v290_v19 = vld [vmem:[#allocation2] sm:$0xff] }
  0x1e   : > { %1000 = vmatpush3.bf16.msra.mxu0 %v1071_v2  ;;  %1038 = vmatpush3.bf16.msra.mxu1 %v1071_v2  ;;  %v300_v18 = vld [vmem:[#allocation2 + $0x50] sm:$0xff]  ;;  %v298_v20 = vld [vmem:[#allocation2 + $0x40] sm:$0xff]  ;;  %v293_v23 = vld [vmem:[#allocation2 + $0x18] sm:$0xff] }
  0x1f   : > { %1001 = vmatprep.subr.bf16.mxu0 %v1072_v3  ;;  %1031 = vmatprep.subr.bf16.mxu1 %v1072_v3  ;;  %v301_v24 = vld [vmem:[#allocation2 + $0x58] sm:$0xff]  ;;  %v291_v29 = vld [vmem:[#allocation2 + $0x8] sm:$0xff]  ;;  %v296_v41 = vld [vmem:[#allocation2 + $0x30] sm:$0xff] }
  0x20   : > { %v299_v30 = vld [vmem:[#allocation2 + $0x48] sm:$0xff]  ;;  %v304_v42 = vld [vmem:[#allocation2 + $0x70] sm:$0xff]  ;;  %v294_v43 = vld [vmem:[#allocation2 + $0x20] sm:$0xff] }
  0x21   : > { %v302_v44 = vld [vmem:[#allocation2 + $0x60] sm:$0xff]  ;;  %v297_v47 = vld [vmem:[#allocation2 + $0x38] sm:$0xff]  ;;  %v295_v53 = vld [vmem:[#allocation2 + $0x28] sm:$0xff] }
  0x22   : > { %1002 = vmatpush3.bf16.msra.mxu0 %v1072_v3  ;;  %1039 = vmatpush3.bf16.msra.mxu1 %v1072_v3  ;;  %v305_v48 = vld [vmem:[#allocation2 + $0x78] sm:$0xff]  ;;  %v303_v54 = vld [vmem:[#allocation2 + $0x68] sm:$0xff]  ;;  %v1189_v3 = vld [vmem:[%s1266_s2] ss:$0 sm:$0xff] (!%p855_p6) }
  0x23   : > { %1003 = vmatprep.subr.bf16.mxu0 %v1073_v4  ;;  %1032 = vmatprep.subr.bf16.mxu1 %v1073_v4  ;;  %v896_v6 = vld [vmem:[%s1267_s3] sm:$0xff] (!%p855_p6)  }
  0x26   : > { %1004 = vmatpush3.bf16.msra.mxu0 %v1073_v4  ;;  %1040 = vmatpush3.bf16.msra.mxu1 %v1073_v4 }
  0x27   : > { %1005 = vmatprep.subr.bf16.mxu0 %v1074_v7  ;;  %1033 = vmatprep.subr.bf16.mxu1 %v1074_v7 }
  0x2a   : > { %1006 = vmatpush3.bf16.msra.mxu0 %v1074_v7  ;;  %1041 = vmatpush3.bf16.msra.mxu1 %v1074_v7 }
  0x2b   : > { %1007 = vmatprep.subr.bf16.mxu0 %v1075_v8  ;;  %1034 = vmatprep.subr.bf16.mxu1 %v1075_v8 }
  0x2e   : > { %1008 = vmatpush3.bf16.msra.mxu0 %v1075_v8  ;;  %1042 = vmatpush3.bf16.msra.mxu1 %v1075_v8 }
  0x2f   : > { %1009 = vmatprep.subr.bf16.mxu0 %v1076_v9  ;;  %1035 = vmatprep.subr.bf16.mxu1 %v1076_v9 }
  0x32   : > { %1010 = vmatpush3.bf16.msra.mxu0 %v1076_v9  ;;  %1043 = vmatpush3.bf16.msra.mxu1 %v1076_v9  ;;  %v897_v9 = vunpack.c.l.bf16 (!%p855_p6), %v896_v6 }
  0x33   : > { %1011 = vmatprep.subr.bf16.mxu0 %v1077_v10  ;;  %1036 = vmatprep.subr.bf16.mxu1 %v1077_v10 }
  0x36   : > { %1012 = vmatpush3.bf16.msra.mxu0 %v1077_v10  ;;  %1044 = vmatpush3.bf16.msra.mxu1 %v1077_v10  ;;  %v898_v10 = vunpack.c.h.bf16 (!%p855_p6), %v896_v6 }
  0x39   : > { %1014 = vmatmul.mubr.bf16.vlgmr.msra.gmra.mrb[0].mxu0 %v1080_v11  ;;  %1022 = vmatmul.mubr.bf16.vlgmr.msra.gmra.mrb[0].mxu1 %v1081_v12 }
  0x3a   : > { %1017 = vmatprep.mubr.bf16.mxu0 %v1082_v13  ;;  %1025 = vmatprep.mubr.bf16.mxu1 %v1083_v14  ;;  %v967_v13 = vld [vmem:[%s1267_s3 + $0x8] sm:$0xff] (!%p855_p6)  }
  0x41   : > { %1018 = vmatmul.mubr.bf16.gmra.mrb[4].mxu0 %v1084_v15  ;;  %1026 = vmatmul.mubr.bf16.gmra.mrb[4].mxu1 %v1085_v16  ;;  %v901_v16 = vunpack.c.l.bf16 (!%p855_p6), %v967_v13 }
 0x10c   : > { %v1015_v21 = vpop.f32.mrb[0].mxu0  ;;  %v1023_v22 = vpop.f32.mrb[0].mxu1 }
 0x10d   : > { %v533_v25 = vadd.f32 %v1015_v21, %v292_v17  ;;  %v541_v26 = vadd.f32 %v1023_v22, %v300_v18  ;;  %v468_v27 = vpop.f32.mrb[1].mxu0  ;;  %v500_v28 = vpop.f32.mrb[1].mxu1  ;;  %v902_v17 = vunpack.c.h.bf16 (!%p855_p6), %v967_v13 }
 0x10e   : > { %v531_v31 = vadd.f32 %v468_v27, %v290_v19  ;;  %v539_v32 = vadd.f32 %v500_v28, %v298_v20  ;;  %v1016_v33 = vpop.f32.mrb[2].mxu0  ;;  %v1024_v34 = vpop.f32.mrb[2].mxu1  ;;  %v968_v20 = vld [vmem:[%s1267_s3 + $0x10] sm:$0xff] (!%p855_p6)   ;;  %v969_v27 = vld [vmem:[%s1267_s3 + $0x18] sm:$0xff] (!%p855_p6)  }
 0x10f   : > { %549 = vst [vmem:[#allocation2 + $0x10] sm:$0xff] %v533_v25  ;;  %557 = vst [vmem:[#allocation2 + $0x50] sm:$0xff] %v541_v26  ;;  %v534_v35 = vadd.f32 %v1016_v33, %v293_v23  ;;  %v542_v36 = vadd.f32 %v1024_v34, %v301_v24  ;;  %v471_v37 = vpop.f32.mrb[3].mxu0  ;;  %v503_v38 = vpop.f32.mrb[3].mxu1  ;;  %v905_v25 = vunpack.c.l.bf16 (!%p855_p6), %v968_v20  ;;  %v906_v26 = vunpack.c.h.bf16 (!%p855_p6), %v968_v20  ;;  %v970_v34 = vld [vmem:[%s1267_s3 + $0x20] sm:$0xff] (!%p855_p6)  }
 0x110   : > { %547 = vst [vmem:[#allocation2] sm:$0xff] %v531_v31  ;;  %555 = vst [vmem:[#allocation2 + $0x40] sm:$0xff] %v539_v32  ;;  %v532_v39 = vadd.f32 %v471_v37, %v291_v29  ;;  %v540_v40 = vadd.f32 %v503_v38, %v299_v30  ;;  %v909_v38 = vunpack.c.l.bf16 (!%p855_p6), %v969_v27 }
 0x111   : > { %550 = vst [vmem:[#allocation2 + $0x18] sm:$0xff] %v534_v35  ;;  %558 = vst [vmem:[#allocation2 + $0x58] sm:$0xff] %v542_v36 }
 0x112   : > { %548 = vst [vmem:[#allocation2 + $0x8] sm:$0xff] %v532_v39  ;;  %556 = vst [vmem:[#allocation2 + $0x48] sm:$0xff] %v540_v40 }
 0x114   : > { %v1019_v45 = vpop.f32.mrb[4].mxu0  ;;  %v1027_v46 = vpop.f32.mrb[4].mxu1  ;;  %566 = sbr.rel (%p855_p6) target bundleno = 298 (0x12a), region = 44 }
 0x115   : > { %v537_v49 = vadd.f32 %v1019_v45, %v296_v41  ;;  %v545_v50 = vadd.f32 %v1027_v46, %v304_v42  ;;  %v484_v51 = vpop.f32.mrb[5].mxu0  ;;  %v516_v52 = vpop.f32.mrb[5].mxu1  ;;  %v971_v41 = vld [vmem:[%s1267_s3 + $0x28] sm:$0xff] (!%p855_p6)  }
 0x116   : > { %v535_v55 = vadd.f32 %v484_v51, %v294_v43  ;;  %v543_v56 = vadd.f32 %v516_v52, %v302_v44  ;;  %v1020_v57 = vpop.f32.mrb[6].mxu0  ;;  %v1028_v58 = vpop.f32.mrb[6].mxu1  ;;  %v569_v7 = vld [vmem:[#allocation2 + $0x10] sm:$0xff] (!%p855_p6)  ;;  %v910_v43 = vunpack.c.h.bf16 (!%p855_p6), %v969_v27 }
 0x117   : > { %553 = vst [vmem:[#allocation2 + $0x30] sm:$0xff] %v537_v49  ;;  %561 = vst [vmem:[#allocation2 + $0x70] sm:$0xff] %v545_v50  ;;  %v538_v59 = vadd.f32 %v1020_v57, %v297_v47  ;;  %v546_v60 = vadd.f32 %v1028_v58, %v305_v48  ;;  %v487_v61 = vpop.f32.mrb[7].mxu0  ;;  %v519_v62 = vpop.f32.mrb[7].mxu1  ;;  %v567_v1 = vld [vmem:[#allocation2] sm:$0xff] (!%p855_p6)  ;;  %v592_v11 = vadd.f32 (!%p855_p6), %v1189_v3, %v569_v7  ;;  %v577_v39 = vld [vmem:[#allocation2 + $0x50] sm:$0xff] (!%p855_p6)  ;;  %v913_v49 = vunpack.c.l.bf16 (!%p855_p6), %v970_v34 }
 0x118   : > { %551 = vst [vmem:[#allocation2 + $0x20] sm:$0xff] %v535_v55  ;;  %559 = vst [vmem:[#allocation2 + $0x60] sm:$0xff] %v543_v56  ;;  %v536_v63 = vadd.f32 %v487_v61, %v295_v53  ;;  %v544_v0 = vadd.f32 %v519_v62, %v303_v54  ;;  %v590_v4 = vadd.f32 (!%p855_p6), %v1189_v3, %v567_v1  ;;  %v570_v8 = vld [vmem:[#allocation2 + $0x18] sm:$0xff] (!%p855_p6)  ;;  %v575_v28 = vld [vmem:[#allocation2 + $0x40] sm:$0xff] (!%p855_p6)  ;;  %v914_v50 = vunpack.c.h.bf16 (!%p855_p6), %v970_v34 }
 0x119   : > { %554 = vst [vmem:[#allocation2 + $0x38] sm:$0xff] %v538_v59  ;;  %562 = vst [vmem:[#allocation2 + $0x78] sm:$0xff] %v546_v60  ;;  %v568_v2 = vld [vmem:[#allocation2 + $0x8] sm:$0xff] (!%p855_p6)  ;;  %v593_v12 = vadd.f32 (!%p855_p6), %v1189_v3, %v570_v8  ;;  %v640_v30 = vadd.f32 (!%p855_p6), %v901_v16, %v592_v11  ;;  %v578_v40 = vld [vmem:[#allocation2 + $0x58] sm:$0xff] (!%p855_p6)  ;;  %v598_v44 = vadd.f32 (!%p855_p6), %v1189_v3, %v575_v28  ;;  %v917_v56 = vunpack.c.l.bf16 (!%p855_p6), %v971_v41 }
 0x11a   : > { %552 = vst [vmem:[#allocation2 + $0x28] sm:$0xff] %v536_v63  ;;  %560 = vst [vmem:[#allocation2 + $0x68] sm:$0xff] %v544_v0  ;;  %v591_v5 = vadd.f32 (!%p855_p6), %v1189_v3, %v568_v2  ;;  %v638_v23 = vadd.f32 (!%p855_p6), %v897_v9, %v590_v4  ;;  %v576_v29 = vld [vmem:[#allocation2 + $0x48] sm:$0xff] (!%p855_p6)  ;;  %v972_v52 = vld [vmem:[%s1267_s3 + $0x30] sm:$0xff] (!%p855_p6)   ;;  %v600_v54 = vadd.f32 (!%p855_p6), %v1189_v3, %v577_v39  ;;  %v918_v60 = vunpack.c.h.bf16 (!%p855_p6), %v971_v41 }
 0x11b   : > { %v641_v31 = vadd.f32 %v902_v17, %v593_v12  ;;  %v599_v45 = vadd.f32 %v1189_v3, %v576_v29  ;;  %v601_v55 = vadd.f32 %v1189_v3, %v578_v40  ;;  %v646_v58 = vadd.f32 %v913_v49, %v598_v44  ;;  %v973_v63 = vld [vmem:[%s1267_s3 + $0x38] sm:$0xff]  }
 0x11c   : > { %v639_v24 = vadd.f32 %v898_v10, %v591_v5  ;;  %v648_v1 = vadd.f32 %v917_v56, %v600_v54  ;;  %v921_v4 = vunpack.c.l.bf16 %v972_v52  ;;  %v922_v7 = vunpack.c.h.bf16 %v972_v52 }
 0x11d   : > { %v935_v42 = vpack.c.bf16 %v641_v31, %v640_v30  ;;  %v647_v59 = vadd.f32 %v914_v50, %v599_v45  ;;  %v649_v6 = vadd.f32 %v918_v60, %v601_v55  ;;  %v925_v11 = vunpack.c.l.bf16 %v973_v63 }
 0x11e   : > { %v573_v21 = vld [vmem:[#allocation2 + $0x30] sm:$0xff]  ;;  %v930_v35 = vpack.c.bf16 %v639_v24, %v638_v23  ;;  %v926_v12 = vunpack.c.h.bf16 %v973_v63 }
 0x11f   : > { %v571_v14 = vld [vmem:[#allocation2 + $0x20] sm:$0xff]  ;;  %v596_v32 = vadd.f32 %v1189_v3, %v573_v21  ;;  %974 = vst [vmem:[%s1268_s4 + $0x8] sm:$0xff] %v935_v42   ;;  %v581_v57 = vld [vmem:[#allocation2 + $0x70] sm:$0xff]  ;;  %v950_v5 = vpack.c.bf16 %v647_v59, %v646_v58  ;;  %v955_v13 = vpack.c.bf16 %v649_v6, %v648_v1 }
 0x120   : > { %v594_v18 = vadd.f32 %v1189_v3, %v571_v14  ;;  %v574_v22 = vld [vmem:[#allocation2 + $0x38] sm:$0xff]  ;;  %v579_v46 = vld [vmem:[#allocation2 + $0x60] sm:$0xff]  ;;  %931 = vst [vmem:[%s1268_s4] sm:$0xff] %v930_v35   ;;  %v604_v8 = vadd.f32 %v1189_v3, %v581_v57 }
 0x121   : > { %v572_v15 = vld [vmem:[#allocation2 + $0x28] sm:$0xff]  ;;  %v597_v33 = vadd.f32 %v1189_v3, %v574_v22  ;;  %v644_v48 = vadd.f32 %v909_v38, %v596_v32  ;;  %v602_v61 = vadd.f32 %v1189_v3, %v579_v46  ;;  %v582_v62 = vld [vmem:[#allocation2 + $0x78] sm:$0xff]  ;;  %977 = vst [vmem:[%s1268_s4 + $0x20] sm:$0xff] %v950_v5   ;;  %978 = vst [vmem:[%s1268_s4 + $0x28] sm:$0xff] %v955_v13  }
 0x122   : > { %v595_v19 = vadd.f32 %v1189_v3, %v572_v15  ;;  %v642_v36 = vadd.f32 %v905_v25, %v594_v18  ;;  %v580_v51 = vld [vmem:[#allocation2 + $0x68] sm:$0xff]  ;;  %v605_v10 = vadd.f32 %v1189_v3, %v582_v62  ;;  %v652_v15 = vadd.f32 %v925_v11, %v604_v8 }
 0x123   : > { %v645_v53 = vadd.f32 %v910_v43, %v597_v33  ;;  %v603_v2 = vadd.f32 %v1189_v3, %v580_v51  ;;  %v650_v9 = vadd.f32 %v921_v4, %v602_v61 }
 0x124   : > { %v643_v37 = vadd.f32 %v906_v26, %v595_v19  ;;  %v653_v16 = vadd.f32 %v926_v12, %v605_v10 }
 0x125   : > { %v945_v0 = vpack.c.bf16 %v645_v53, %v644_v48  ;;  %v651_v14 = vadd.f32 %v922_v7, %v603_v2 }
 0x126   : > { %v940_v47 = vpack.c.bf16 %v643_v37, %v642_v36  ;;  %v965_v18 = vpack.c.bf16 %v653_v16, %v652_v15 }
 0x127   : > { %976 = vst [vmem:[%s1268_s4 + $0x18] sm:$0xff] %v945_v0   ;;  %v960_v17 = vpack.c.bf16 %v651_v14, %v650_v9 }
 0x128   : > { %975 = vst [vmem:[%s1268_s4 + $0x10] sm:$0xff] %v940_v47   ;;  %980 = vst [vmem:[%s1268_s4 + $0x38] sm:$0xff] %v965_v18  }
 0x129   : > { %979 = vst [vmem:[%s1268_s4 + $0x30] sm:$0xff] %v960_v17  }
 0x12a PF: > { %s14_s17 = sadd.s32 1, %s1108_s17   ;;  %s1269_s15 = smov %s1104_s16 }
 0x12b   : > { %p11_p7 = scmp.ge.s32.totalorder %s14_s17, 11   ;;  %s1270_s16 = smov %s1272_s18 }
 0x12d   :  { %13 = sbr.rel (!%p11_p7) target bundleno = 2 (0x2), region = 80 }

// kernel: _lambda_.23
= control target key start
LH: loop header
LB: loop body
LE: loop exit
PB: predicated region body
PF: predicated region fallthrough
CT: control target
= control target key end

     0   :  { %s335_s1 = inlined_call_operand.vmem [shape: bf16[1,128,128], index: 1, kind: input, shape index: {}]   ;;  %s336_s0 = inlined_call_operand.vmem [shape: bf16[1,32,128], index: 0, kind: input, shape index: {}]   ;;  %s337_s2 = inlined_call_operand.vmem [shape: f32[1,128], index: 2, kind: input, shape index: {}]   ;;  %s338_s3 = inlined_call_operand.vmem [shape: bf16[32,128], index: 3, kind: output, shape index: {}]  }
   0x1   :  { %v266_v0 = vld [vmem:[%s335_s1] sm:$0xff]   ;;  %v267_v1 = vld [vmem:[%s335_s1 + $0x8] sm:$0xff]   ;;  %v268_v2 = vld [vmem:[%s335_s1 + $0x10] sm:$0xff]  }
   0x2   :  { %246 = vmatprep.subr.bf16.mxu0 %v266_v0  ;;  %v269_v3 = vld [vmem:[%s335_s1 + $0x18] sm:$0xff]   ;;  %v274_v4 = vld [vmem:[%s336_s0] sm:$0xff]   ;;  %v271_v6 = vld [vmem:[%s335_s1 + $0x28] sm:$0xff]  }
   0x3   :  { %247 = vmatpush3.bf16.msra.mxu0 %v266_v0  ;;  %262 = vmatprep.mubr.bf16.mxu0 %v274_v4  ;;  %v270_v5 = vld [vmem:[%s335_s1 + $0x20] sm:$0xff]   ;;  %v272_v7 = vld [vmem:[%s335_s1 + $0x30] sm:$0xff]   ;;  %v273_v8 = vld [vmem:[%s335_s1 + $0x38] sm:$0xff]  }
   0x4   :  { %248 = vmatprep.subr.bf16.mxu0 %v267_v1  ;;  %v275_v9 = vld [vmem:[%s336_s0 + $0x8] sm:$0xff]   ;;  %v216_v11 = vld [vmem:[%s337_s2] ss:$0 sm:$0xff] }
   0x7   :  { %249 = vmatpush3.bf16.msra.mxu0 %v267_v1 }
   0x8   :  { %250 = vmatprep.subr.bf16.mxu0 %v268_v2 }
   0xb   :  { %251 = vmatpush3.bf16.msra.mxu0 %v268_v2 }
   0xc   :  { %252 = vmatprep.subr.bf16.mxu0 %v269_v3 }
   0xf   :  { %253 = vmatpush3.bf16.msra.mxu0 %v269_v3 }
  0x10   :  { %254 = vmatprep.subr.bf16.mxu0 %v270_v5 }
  0x13   :  { %255 = vmatpush3.bf16.msra.mxu0 %v270_v5 }
  0x14   :  { %256 = vmatprep.subr.bf16.mxu0 %v271_v6 }
  0x17   :  { %257 = vmatpush3.bf16.msra.mxu0 %v271_v6 }
  0x18   :  { %258 = vmatprep.subr.bf16.mxu0 %v272_v7 }
  0x1b   :  { %259 = vmatpush3.bf16.msra.mxu0 %v272_v7 }
  0x1c   :  { %260 = vmatprep.subr.bf16.mxu0 %v273_v8 }
  0x1f   :  { %261 = vmatpush3.bf16.msra.mxu0 %v273_v8 }
  0x22   :  { %263 = vmatmul.mubr.bf16.vlgmr.msra.gmra.mrb[0].mxu0 %v275_v9 }
  0xf5   :  { %v264_v10 = vpop.f32.mrb[0].mxu0 }
  0xf6   :  { %v141_v12 = vpop.f32.mrb[1].mxu0  ;;  %v180_v14 = vadd.f32 %v264_v10, %v216_v11 }
  0xf7   :  { %v265_v13 = vpop.f32.mrb[2].mxu0  ;;  %v178_v17 = vadd.f32 %v216_v11, %v141_v12 }
  0xf8   :  { %v181_v15 = vadd.f32 %v265_v13, %v216_v11  ;;  %v144_v16 = vpop.f32.mrb[3].mxu0 }
  0xf9   :  { %v179_v18 = vadd.f32 %v216_v11, %v144_v16 }
  0xfa   :  { %v233_v19 = vpack.c.bf16 %v181_v15, %v180_v14 }
  0xfb   :  { %v228_v20 = vpack.c.bf16 %v179_v18, %v178_v17 }
  0xfc   :  { %235 = vst [vmem:[%s338_s3 + $0x8] sm:$0xff] %v233_v19  }
  0xfd   :  { %229 = vst [vmem:[%s338_s3] sm:$0xff] %v228_v20  }

// kernel: _lambda_.21
= control target key start
LH: loop header
LB: loop body
LE: loop exit
PB: predicated region body
PF: predicated region fallthrough
CT: control target
= control target key end

     0   :  { %s422_s0 = inlined_call_operand.vmem [shape: bf16[128,128], index: 0, kind: input, shape index: {}]   ;;  %s423_s1 = inlined_call_operand.vmem [shape: f32[1,128], index: 1, kind: input, shape index: {}]   ;;  %s424_s2 = inlined_call_operand.vmem [shape: f32[1,128], index: 2, kind: input, shape index: {}]   ;;  %s425_s3 = inlined_call_operand.vmem [shape: bf16[128,128], index: 3, kind: output, shape index: {}]  }
   0x1   :  { %v227_v0 = vld [vmem:[%s422_s0] sm:$0xff]   ;;  %v298_v4 = vld [vmem:[%s422_s0 + $0x8] sm:$0xff]   ;;  %v299_v5 = vld [vmem:[%s422_s0 + $0x10] sm:$0xff]  }
   0x2   :  { %v338_v1 = vld [vmem:[%s423_s1] ss:$0 sm:$0xff]  ;;  %v228_v2 = vunpack.c.l.bf16 %v227_v0  ;;  %v229_v3 = vunpack.c.h.bf16 %v227_v0  ;;  %v300_v6 = vld [vmem:[%s422_s0 + $0x18] sm:$0xff]   ;;  %v232_v8 = vunpack.c.l.bf16 %v298_v4  ;;  %v233_v9 = vunpack.c.h.bf16 %v298_v4  ;;  %v302_v33 = vld [vmem:[%s422_s0 + $0x28] sm:$0xff]  }
   0x3   :  { %v352_v7 = vld [vmem:[%s424_s2] ss:$0 sm:$0xff]  ;;  %v236_v10 = vunpack.c.l.bf16 %v299_v5  ;;  %v237_v11 = vunpack.c.h.bf16 %v299_v5  ;;  %v240_v14 = vunpack.c.l.bf16 %v300_v6  ;;  %v241_v15 = vunpack.c.h.bf16 %v300_v6  ;;  %v303_v38 = vld [vmem:[%s422_s0 + $0x30] sm:$0xff]   ;;  %v304_v43 = vld [vmem:[%s422_s0 + $0x38] sm:$0xff]  }
   0x4   :  { %v53_v12 = vmul.f32 %v228_v2, %v338_v1  ;;  %v54_v13 = vmul.f32 %v229_v3, %v338_v1  ;;  %v55_v16 = vmul.f32 %v232_v8, %v338_v1  ;;  %v56_v17 = vmul.f32 %v233_v9, %v338_v1  ;;  %v301_v28 = vld [vmem:[%s422_s0 + $0x20] sm:$0xff]  }
   0x5   :  { %v57_v18 = vmul.f32 %v236_v10, %v338_v1  ;;  %v58_v19 = vmul.f32 %v237_v11, %v338_v1  ;;  %v59_v22 = vmul.f32 %v240_v14, %v338_v1  ;;  %v60_v23 = vmul.f32 %v241_v15, %v338_v1 }
   0x6   :  { %v76_v20 = vadd.f32 %v352_v7, %v53_v12  ;;  %v77_v21 = vadd.f32 %v352_v7, %v54_v13  ;;  %v78_v24 = vadd.f32 %v352_v7, %v55_v16  ;;  %v79_v25 = vadd.f32 %v352_v7, %v56_v17 }
   0x7   :  { %v80_v26 = vadd.f32 %v352_v7, %v57_v18  ;;  %v81_v27 = vadd.f32 %v352_v7, %v58_v19  ;;  %v82_v31 = vadd.f32 %v352_v7, %v59_v22  ;;  %v83_v32 = vadd.f32 %v352_v7, %v60_v23 }
   0x8   :  { %v92_v29 = vmax.f32 %v76_v20, 0.0  ;;  %v93_v30 = vmax.f32 %v77_v21, 0.0  ;;  %v94_v34 = vmax.f32 %v78_v24, 0.0  ;;  %v95_v35 = vmax.f32 %v79_v25, 0.0 }
   0x9   :  { %v96_v36 = vmax.f32 %v80_v26, 0.0  ;;  %v97_v37 = vmax.f32 %v81_v27, 0.0  ;;  %v98_v40 = vmax.f32 %v82_v31, 0.0  ;;  %v99_v41 = vmax.f32 %v83_v32, 0.0 }
   0xa   :  { %v261_v39 = vpack.c.bf16 %v93_v30, %v92_v29  ;;  %v244_v42 = vunpack.c.l.bf16 %v301_v28  ;;  %v266_v44 = vpack.c.bf16 %v95_v35, %v94_v34  ;;  %v245_v46 = vunpack.c.h.bf16 %v301_v28 }
   0xb   :  { %v271_v45 = vpack.c.bf16 %v97_v37, %v96_v36  ;;  %v248_v47 = vunpack.c.l.bf16 %v302_v33  ;;  %v276_v48 = vpack.c.bf16 %v99_v41, %v98_v40  ;;  %v249_v50 = vunpack.c.h.bf16 %v302_v33 }
   0xc   :  { %262 = vst [vmem:[%s425_s3] sm:$0xff] %v261_v39   ;;  %v61_v49 = vmul.f32 %v244_v42, %v338_v1  ;;  %v252_v51 = vunpack.c.l.bf16 %v303_v38  ;;  %305 = vst [vmem:[%s425_s3 + $0x8] sm:$0xff] %v266_v44   ;;  %v62_v52 = vmul.f32 %v245_v46, %v338_v1  ;;  %v253_v54 = vunpack.c.h.bf16 %v303_v38 }
   0xd   :  { %306 = vst [vmem:[%s425_s3 + $0x10] sm:$0xff] %v271_v45   ;;  %v63_v53 = vmul.f32 %v248_v47, %v338_v1  ;;  %v256_v55 = vunpack.c.l.bf16 %v304_v43  ;;  %307 = vst [vmem:[%s425_s3 + $0x18] sm:$0xff] %v276_v48   ;;  %v64_v57 = vmul.f32 %v249_v50, %v338_v1  ;;  %v257_v59 = vunpack.c.h.bf16 %v304_v43 }
   0xe   :  { %v84_v56 = vadd.f32 %v352_v7, %v61_v49  ;;  %v65_v58 = vmul.f32 %v252_v51, %v338_v1  ;;  %v85_v60 = vadd.f32 %v352_v7, %v62_v52  ;;  %v66_v62 = vmul.f32 %v253_v54, %v338_v1 }
   0xf   :  { %v86_v61 = vadd.f32 %v352_v7, %v63_v53  ;;  %v67_v63 = vmul.f32 %v256_v55, %v338_v1  ;;  %v87_v2 = vadd.f32 %v352_v7, %v64_v57  ;;  %v68_v4 = vmul.f32 %v257_v59, %v338_v1 }
  0x10   :  { %v100_v0 = vmax.f32 %v84_v56, 0.0  ;;  %v88_v3 = vadd.f32 %v352_v7, %v65_v58  ;;  %v101_v5 = vmax.f32 %v85_v60, 0.0  ;;  %v89_v8 = vadd.f32 %v352_v7, %v66_v62 }
  0x11   :  { %v102_v6 = vmax.f32 %v86_v61, 0.0  ;;  %v90_v9 = vadd.f32 %v352_v7, %v67_v63  ;;  %v103_v10 = vmax.f32 %v87_v2, 0.0  ;;  %v91_v12 = vadd.f32 %v352_v7, %v68_v4 }
  0x12   :  { %v104_v11 = vmax.f32 %v88_v3, 0.0  ;;  %v281_v13 = vpack.c.bf16 %v101_v5, %v100_v0  ;;  %v105_v14 = vmax.f32 %v89_v8, 0.0 }
  0x13   :  { %v106_v15 = vmax.f32 %v90_v9, 0.0  ;;  %v286_v16 = vpack.c.bf16 %v103_v10, %v102_v6  ;;  %v107_v17 = vmax.f32 %v91_v12, 0.0 }
  0x14   :  { %308 = vst [vmem:[%s425_s3 + $0x20] sm:$0xff] %v281_v13   ;;  %v291_v1 = vpack.c.bf16 %v105_v14, %v104_v11 }
  0x15   :  { %309 = vst [vmem:[%s425_s3 + $0x28] sm:$0xff] %v286_v16   ;;  %v296_v18 = vpack.c.bf16 %v107_v17, %v106_v15 }
  0x16   :  { %310 = vst [vmem:[%s425_s3 + $0x30] sm:$0xff] %v291_v1  }
  0x17   :  { %311 = vst [vmem:[%s425_s3 + $0x38] sm:$0xff] %v296_v18  }

// kernel: _lambda_.22
= control target key start
LH: loop header
LB: loop body
LE: loop exit
PB: predicated region body
PF: predicated region fallthrough
CT: control target
= control target key end

     0   :  { %s737_s18 = smov 0   ;;  %s739_s19 = smov 0   ;;  %s805_s0 = inlined_call_operand.vmem [shape: bf16[9,32,128], index: 0, kind: input, shape index: {}]   ;;  %s806_s1 = inlined_call_operand.vmem [shape: bf16[9,128,128], index: 1, kind: input, shape index: {}]   ;;  %s807_s2 = inlined_call_operand.vmem [shape: f32[1,128], index: 2, kind: input, shape index: {}]   ;;  %s808_s3 = inlined_call_operand.vmem [shape: f32[1,128], index: 3, kind: input, shape index: {}]   ;;  %s809_s4 = inlined_call_operand.vmem [shape: f32[1,128], index: 4, kind: input, shape index: {}]   ;;  %s810_s5 = inlined_call_operand.vmem [shape: bf16[32,128], index: 5, kind: output, shape index: {}]  }
   0x1   :  { %s741_s20 = smov 0  }
   0x2 LB: > { %s24_s21 = sadd.s32 1, %s700_s19  ;;  %p572_p0 = scmp.ge.s32.totalorder %s704_s20, 1  ;;  %s704_s20 = sphi %s741_s20, %s15_s20   ;;  %s700_s19 = sphi %s739_s19, %s812_s19   ;;  %s696_s18 = sphi %s737_s18, %s811_s18  }
   0x3   : > { %p25_p1 = scmp.ge.s32.totalorder %s24_s21, 9  ;;  %p216_p2 = scmp.lt.s32.totalorder %s704_s20, 10 }
   0x5   : > { %s814_s21 = smov (%p25_p1, %s24_s21), 0  ;;  %p217_p3 = pnand %p572_p0, %p216_p2 }
   0x6   : > { %p254_p4 = scmp.lt.s32.totalorder (!%p217_p3), %s696_s18, 8  ;;  %p577_p5 = scmp.ne.s32.totalorder (!%p217_p3), %s696_s18, 0 }
   0x7   : > { %220 = sbr.rel (%p217_p3) target bundleno = 291 (0x123), region = 40 }
   0xe   : > { %s255_s22 = scalar_select %p254_p4, %s696_s18, 8 }
   0xf   : > { %278 = sbr.rel (%p577_p5) target bundleno = 22 (0x16), region = 44  ;;  %v706_v0 = vmov (!%p577_p5), 0.0  }
  0x10   : > { %s600_s23 = sshll.u32 %s255_s22, 4  ;;  %s601_s24 = sshll.u32 %s255_s22, 6  ;;  %279 = vst [vmem:[#allocation2] sm:$0xff] (!%p577_p5), %v706_v0  ;;  %280 = vst [vmem:[#allocation2 + $0x8] sm:$0xff] (!%p577_p5), %v706_v0 }
  0x11   : > { %s762_s27 = scalar_lea.vmem %s805_s0, %s600_s23  ;;  %s767_s30 = scalar_lea.vmem %s806_s1, %s601_s24  ;;  %281 = vst [vmem:[#allocation2 + $0x10] sm:$0xff] (!%p577_p5), %v706_v0  ;;  %282 = vst [vmem:[#allocation2 + $0x18] sm:$0xff] (!%p577_p5), %v706_v0 }
  0x16 PF: > { %v672_v1 = vld [vmem:[%s767_s30] sm:$0xff]   ;;  %v673_v2 = vld [vmem:[%s767_s30 + $0x8] sm:$0xff]   ;;  %v674_v3 = vld [vmem:[%s767_s30 + $0x10] sm:$0xff]   ;;  %p588_p6 = scmp.ne.s32.totalorder %s696_s18, 8 }
  0x17   : > { %627 = vmatprep.subr.bf16.mxu0 %v672_v1  ;;  %v675_v4 = vld [vmem:[%s767_s30 + $0x18] sm:$0xff]   ;;  %v680_v5 = vld [vmem:[%s762_s27] sm:$0xff]   ;;  %v677_v7 = vld [vmem:[%s767_s30 + $0x28] sm:$0xff]  }
  0x18   : > { %628 = vmatpush3.bf16.msra.mxu0 %v672_v1  ;;  %643 = vmatprep.mubr.bf16.mxu0 %v680_v5  ;;  %v676_v6 = vld [vmem:[%s767_s30 + $0x20] sm:$0xff]   ;;  %v678_v8 = vld [vmem:[%s767_s30 + $0x30] sm:$0xff]   ;;  %v679_v9 = vld [vmem:[%s767_s30 + $0x38] sm:$0xff]  }
  0x19   : > { %629 = vmatprep.subr.bf16.mxu0 %v673_v2  ;;  %v681_v10 = vld [vmem:[%s762_s27 + $0x8] sm:$0xff]   ;;  %v285_v11 = vld [vmem:[#allocation2 + $0x10] sm:$0xff]  ;;  %v283_v12 = vld [vmem:[#allocation2] sm:$0xff] }
  0x1a   : > { %v286_v14 = vld [vmem:[#allocation2 + $0x18] sm:$0xff]  ;;  %v284_v17 = vld [vmem:[#allocation2 + $0x8] sm:$0xff]  ;;  %v589_v25 = vld [vmem:[%s807_s2] ss:$0 sm:$0xff] (!%p588_p6) }
  0x1b   : > { %v590_v28 = vld [vmem:[%s808_s3] ss:$0 sm:$0xff] (!%p588_p6) }
  0x1c   : > { %630 = vmatpush3.bf16.msra.mxu0 %v673_v2  ;;  %v591_v30 = vld [vmem:[%s809_s4] ss:$0 sm:$0xff] (!%p588_p6) }
  0x1d   : > { %631 = vmatprep.subr.bf16.mxu0 %v674_v3 }
  0x20   : > { %632 = vmatpush3.bf16.msra.mxu0 %v674_v3 }
  0x21   : > { %633 = vmatprep.subr.bf16.mxu0 %v675_v4 }
  0x24   : > { %634 = vmatpush3.bf16.msra.mxu0 %v675_v4 }
  0x25   : > { %635 = vmatprep.subr.bf16.mxu0 %v676_v6 }
  0x28   : > { %636 = vmatpush3.bf16.msra.mxu0 %v676_v6 }
  0x29   : > { %637 = vmatprep.subr.bf16.mxu0 %v677_v7 }
  0x2c   : > { %638 = vmatpush3.bf16.msra.mxu0 %v677_v7 }
  0x2d   : > { %639 = vmatprep.subr.bf16.mxu0 %v678_v8 }
  0x30   : > { %640 = vmatpush3.bf16.msra.mxu0 %v678_v8 }
  0x31   : > { %641 = vmatprep.subr.bf16.mxu0 %v679_v9 }
  0x34   : > { %642 = vmatpush3.bf16.msra.mxu0 %v679_v9 }
  0x37   : > { %644 = vmatmul.mubr.bf16.vlgmr.msra.gmra.mrb[0].mxu0 %v681_v10 }
 0x10a   : > { %v645_v13 = vpop.f32.mrb[0].mxu0  ;;  %427 = sbr.rel (%p588_p6) target bundleno = 291 (0x123), region = 48 }
 0x10b   : > { %v418_v15 = vadd.f32 %v645_v13, %v285_v11  ;;  %v401_v16 = vpop.f32.mrb[1].mxu0 }
 0x10c   : > { %v416_v18 = vadd.f32 %v401_v16, %v283_v12  ;;  %v646_v19 = vpop.f32.mrb[2].mxu0 }
 0x10d   : > { %422 = vst [vmem:[#allocation2 + $0x10] sm:$0xff] %v418_v15  ;;  %v419_v20 = vadd.f32 %v646_v19, %v286_v14  ;;  %v404_v21 = vpop.f32.mrb[3].mxu0 }
 0x10e   : > { %420 = vst [vmem:[#allocation2] sm:$0xff] %v416_v18  ;;  %v417_v22 = vadd.f32 %v404_v21, %v284_v17 }
 0x10f   : > { %423 = vst [vmem:[#allocation2 + $0x18] sm:$0xff] %v419_v20 }
 0x110   : > { %421 = vst [vmem:[#allocation2 + $0x8] sm:$0xff] %v417_v22 }
 0x114   : > { %v430_v29 = vld [vmem:[#allocation2 + $0x10] sm:$0xff] }
 0x115   : > { %v428_v23 = vld [vmem:[#allocation2] sm:$0xff]  ;;  %v441_v32 = vadd.f32 %v589_v25, %v430_v29 }
 0x116   : > { %v439_v26 = vadd.f32 %v589_v25, %v428_v23  ;;  %v431_v31 = vld [vmem:[#allocation2 + $0x18] sm:$0xff] }
 0x117   : > { %v429_v24 = vld [vmem:[#allocation2 + $0x8] sm:$0xff]  ;;  %v442_v35 = vadd.f32 %v589_v25, %v431_v31  ;;  %v452_v36 = vmul.f32 %v590_v28, %v441_v32 }
 0x118   : > { %v440_v27 = vadd.f32 %v589_v25, %v429_v24  ;;  %v450_v33 = vmul.f32 %v590_v28, %v439_v26 }
 0x119   : > { %v453_v39 = vmul.f32 %v590_v28, %v442_v35  ;;  %v463_v40 = vadd.f32 %v591_v30, %v452_v36 }
 0x11a   : > { %v451_v34 = vmul.f32 %v590_v28, %v440_v27  ;;  %v461_v37 = vadd.f32 %v591_v30, %v450_v33 }
 0x11b   : > { %v464_v43 = vadd.f32 %v591_v30, %v453_v39  ;;  %v467_v44 = vmax.f32 %v463_v40, 0.0 }
 0x11c   : > { %v462_v38 = vadd.f32 %v591_v30, %v451_v34  ;;  %v465_v41 = vmax.f32 %v461_v37, 0.0 }
 0x11d   : > { %v468_v46 = vmax.f32 %v464_v43, 0.0 }
 0x11e   : > { %v466_v42 = vmax.f32 %v462_v38, 0.0 }
 0x11f   : > { %v614_v47 = vpack.c.bf16 %v468_v46, %v467_v44 }
 0x120   : > { %v609_v45 = vpack.c.bf16 %v466_v42, %v465_v41 }
 0x121   : > { %616 = vst [vmem:[%s810_s5 + $0x8] sm:$0xff] %v614_v47  }
 0x122   : > { %610 = vst [vmem:[%s810_s5] sm:$0xff] %v609_v45  }
 0x123 PF: > { %s15_s20 = sadd.s32 1, %s704_s20   ;;  %s811_s18 = smov %s700_s19 }
 0x124   : > { %p12_p7 = scmp.ge.s32.totalorder %s15_s20, 11   ;;  %s812_s19 = smov %s814_s21 }
 0x126   :  { %14 = sbr.rel (!%p12_p7) target bundleno = 2 (0x2), region = 81 }

// kernel: _lambda_.24
= control target key start
LH: loop header
LB: loop body
LE: loop exit
PB: predicated region body
PF: predicated region fallthrough
CT: control target
= control target key end

     0   :  { %s736_s15 = smov 0   ;;  %s738_s16 = smov 0   ;;  %s804_s0 = inlined_call_operand.vmem [shape: bf16[9,32,128], index: 0, kind: input, shape index: {}]   ;;  %s805_s1 = inlined_call_operand.vmem [shape: bf16[9,128,128], index: 1, kind: input, shape index: {}]   ;;  %s806_s2 = inlined_call_operand.vmem [shape: f32[1,128], index: 2, kind: input, shape index: {}]   ;;  %s807_s3 = inlined_call_operand.vmem [shape: bf16[32,128], index: 3, kind: input, shape index: {}]   ;;  %s808_s4 = inlined_call_operand.vmem [shape: bf16[32,128], index: 4, kind: output, shape index: {}]  }
   0x1   :  { %s740_s17 = smov 0  }
   0x2 LB: > { %s23_s18 = sadd.s32 1, %s704_s16  ;;  %p569_p0 = scmp.ge.s32.totalorder %s708_s17, 1  ;;  %s708_s17 = sphi %s740_s17, %s14_s17   ;;  %s704_s16 = sphi %s738_s16, %s810_s16   ;;  %s700_s15 = sphi %s736_s15, %s809_s15  }
   0x3   : > { %p24_p1 = scmp.ge.s32.totalorder %s23_s18, 9  ;;  %p202_p2 = scmp.lt.s32.totalorder %s708_s17, 10 }
   0x5   : > { %s812_s18 = smov (%p24_p1, %s23_s18), 0  ;;  %p203_p3 = pnand %p569_p0, %p202_p2 }
   0x6   : > { %p243_p4 = scmp.lt.s32.totalorder (!%p203_p3), %s700_s15, 8  ;;  %p574_p5 = scmp.ne.s32.totalorder (!%p203_p3), %s700_s15, 0 }
   0x7   : > { %206 = sbr.rel (%p203_p3) target bundleno = 287 (0x11f), region = 36 }
   0xe   : > { %s244_s19 = scalar_select %p243_p4, %s700_s15, 8 }
   0xf   : > { %273 = sbr.rel (%p574_p5) target bundleno = 22 (0x16), region = 40  ;;  %v710_v0 = vmov (!%p574_p5), 0.0  }
  0x10   : > { %s595_s20 = sshll.u32 %s244_s19, 4  ;;  %s596_s21 = sshll.u32 %s244_s19, 6  ;;  %274 = vst [vmem:[#allocation2] sm:$0xff] (!%p574_p5), %v710_v0  ;;  %275 = vst [vmem:[#allocation2 + $0x8] sm:$0xff] (!%p574_p5), %v710_v0 }
  0x11   : > { %s761_s24 = scalar_lea.vmem %s804_s0, %s595_s20  ;;  %s766_s27 = scalar_lea.vmem %s805_s1, %s596_s21  ;;  %276 = vst [vmem:[#allocation2 + $0x10] sm:$0xff] (!%p574_p5), %v710_v0  ;;  %277 = vst [vmem:[#allocation2 + $0x18] sm:$0xff] (!%p574_p5), %v710_v0 }
  0x16 PF: > { %v676_v1 = vld [vmem:[%s766_s27] sm:$0xff]   ;;  %v677_v2 = vld [vmem:[%s766_s27 + $0x8] sm:$0xff]   ;;  %v678_v3 = vld [vmem:[%s766_s27 + $0x10] sm:$0xff]   ;;  %p585_p6 = scmp.ne.s32.totalorder %s700_s15, 8 }
  0x17   : > { %631 = vmatprep.subr.bf16.mxu0 %v676_v1  ;;  %v679_v4 = vld [vmem:[%s766_s27 + $0x18] sm:$0xff]   ;;  %v684_v5 = vld [vmem:[%s761_s24] sm:$0xff]   ;;  %v681_v7 = vld [vmem:[%s766_s27 + $0x28] sm:$0xff]  }
  0x18   : > { %632 = vmatpush3.bf16.msra.mxu0 %v676_v1  ;;  %647 = vmatprep.mubr.bf16.mxu0 %v684_v5  ;;  %v680_v6 = vld [vmem:[%s766_s27 + $0x20] sm:$0xff]   ;;  %v682_v8 = vld [vmem:[%s766_s27 + $0x30] sm:$0xff]   ;;  %v683_v9 = vld [vmem:[%s766_s27 + $0x38] sm:$0xff]  }
  0x19   : > { %633 = vmatprep.subr.bf16.mxu0 %v677_v2  ;;  %v685_v10 = vld [vmem:[%s761_s24 + $0x8] sm:$0xff]   ;;  %v280_v11 = vld [vmem:[#allocation2 + $0x10] sm:$0xff]  ;;  %v278_v12 = vld [vmem:[#allocation2] sm:$0xff] }
  0x1a   : > { %v281_v14 = vld [vmem:[#allocation2 + $0x18] sm:$0xff]  ;;  %v279_v17 = vld [vmem:[#allocation2 + $0x8] sm:$0xff]  ;;  %v586_v25 = vld [vmem:[%s806_s2] ss:$0 sm:$0xff] (!%p585_p6) }
  0x1b   : > { %v602_v28 = vld [vmem:[%s807_s3] sm:$0xff] (!%p585_p6)   ;;  %v619_v35 = vld [vmem:[%s807_s3 + $0x8] sm:$0xff] (!%p585_p6)  }
  0x1c   : > { %634 = vmatpush3.bf16.msra.mxu0 %v677_v2  ;;  %v603_v31 = vunpack.c.l.bf16 (!%p585_p6), %v602_v28  ;;  %v604_v32 = vunpack.c.h.bf16 (!%p585_p6), %v602_v28  ;;  %v607_v36 = vunpack.c.l.bf16 (!%p585_p6), %v619_v35  ;;  %v608_v37 = vunpack.c.h.bf16 (!%p585_p6), %v619_v35 }
  0x1d   : > { %635 = vmatprep.subr.bf16.mxu0 %v678_v3 }
  0x20   : > { %636 = vmatpush3.bf16.msra.mxu0 %v678_v3 }
  0x21   : > { %637 = vmatprep.subr.bf16.mxu0 %v679_v4 }
  0x24   : > { %638 = vmatpush3.bf16.msra.mxu0 %v679_v4 }
  0x25   : > { %639 = vmatprep.subr.bf16.mxu0 %v680_v6 }
  0x28   : > { %640 = vmatpush3.bf16.msra.mxu0 %v680_v6 }
  0x29   : > { %641 = vmatprep.subr.bf16.mxu0 %v681_v7 }
  0x2c   : > { %642 = vmatpush3.bf16.msra.mxu0 %v681_v7 }
  0x2d   : > { %643 = vmatprep.subr.bf16.mxu0 %v682_v8 }
  0x30   : > { %644 = vmatpush3.bf16.msra.mxu0 %v682_v8 }
  0x31   : > { %645 = vmatprep.subr.bf16.mxu0 %v683_v9 }
  0x34   : > { %646 = vmatpush3.bf16.msra.mxu0 %v683_v9 }
  0x37   : > { %648 = vmatmul.mubr.bf16.vlgmr.msra.gmra.mrb[0].mxu0 %v685_v10 }
 0x10a   : > { %v649_v13 = vpop.f32.mrb[0].mxu0  ;;  %422 = sbr.rel (%p585_p6) target bundleno = 287 (0x11f), region = 44 }
 0x10b   : > { %v413_v15 = vadd.f32 %v649_v13, %v280_v11  ;;  %v396_v16 = vpop.f32.mrb[1].mxu0 }
 0x10c   : > { %v411_v18 = vadd.f32 %v396_v16, %v278_v12  ;;  %v650_v19 = vpop.f32.mrb[2].mxu0 }
 0x10d   : > { %417 = vst [vmem:[#allocation2 + $0x10] sm:$0xff] %v413_v15  ;;  %v414_v20 = vadd.f32 %v650_v19, %v281_v14  ;;  %v399_v21 = vpop.f32.mrb[3].mxu0 }
 0x10e   : > { %415 = vst [vmem:[#allocation2] sm:$0xff] %v411_v18  ;;  %v412_v22 = vadd.f32 %v399_v21, %v279_v17 }
 0x10f   : > { %418 = vst [vmem:[#allocation2 + $0x18] sm:$0xff] %v414_v20 }
 0x110   : > { %416 = vst [vmem:[#allocation2 + $0x8] sm:$0xff] %v412_v22 }
 0x114   : > { %v425_v29 = vld [vmem:[#allocation2 + $0x10] sm:$0xff] }
 0x115   : > { %v423_v23 = vld [vmem:[#allocation2] sm:$0xff]  ;;  %v436_v33 = vadd.f32 %v586_v25, %v425_v29 }
 0x116   : > { %v434_v26 = vadd.f32 %v586_v25, %v423_v23  ;;  %v426_v30 = vld [vmem:[#allocation2 + $0x18] sm:$0xff] }
 0x117   : > { %v424_v24 = vld [vmem:[#allocation2 + $0x8] sm:$0xff]  ;;  %v437_v34 = vadd.f32 %v586_v25, %v426_v30  ;;  %v448_v40 = vadd.f32 %v607_v36, %v436_v33 }
 0x118   : > { %v435_v27 = vadd.f32 %v586_v25, %v424_v24  ;;  %v446_v38 = vadd.f32 %v603_v31, %v434_v26 }
 0x119   : > { %v449_v41 = vadd.f32 %v608_v37, %v437_v34 }
 0x11a   : > { %v447_v39 = vadd.f32 %v604_v32, %v435_v27 }
 0x11b   : > { %v617_v43 = vpack.c.bf16 %v449_v41, %v448_v40 }
 0x11c   : > { %v612_v42 = vpack.c.bf16 %v447_v39, %v446_v38 }
 0x11d   : > { %620 = vst [vmem:[%s808_s4 + $0x8] sm:$0xff] %v617_v43  }
 0x11e   : > { %613 = vst [vmem:[%s808_s4] sm:$0xff] %v612_v42  }
 0x11f PF: > { %s14_s17 = sadd.s32 1, %s708_s17   ;;  %s809_s15 = smov %s704_s16 }
 0x120   : > { %p11_p7 = scmp.ge.s32.totalorder %s14_s17, 11   ;;  %s810_s16 = smov %s812_s18 }
 0x122   :  { %13 = sbr.rel (!%p11_p7) target bundleno = 2 (0x2), region = 80 }

// kernel: _lambda_.25
= control target key start
LH: loop header
LB: loop body
LE: loop exit
PB: predicated region body
PF: predicated region fallthrough
CT: control target
= control target key end

     0   :  { %v293_v1 = vmov 0.0   ;;  %vm294_vm0 = vmmov 0   ;;  %s377_s0 = inlined_call_operand.vmem [shape: bf16[2,16,128], index: 0, kind: input, shape index: {}]   ;;  %s378_s1 = inlined_call_operand.vmem [shape: f32[1,128], index: 1, kind: input, shape index: {}]   ;;  %s379_s2 = inlined_call_operand.vmem [shape: f32[1,128], index: 2, kind: input, shape index: {}]   ;;  %s380_s3 = inlined_call_operand.vmem [shape: bf16[128,128], index: 3, kind: input, shape index: {}]   ;;  %s381_s4 = inlined_call_operand.vmem [shape: f32[1,128], index: 4, kind: input, shape index: {}]   ;;  %s382_s5 = inlined_call_operand.hbm [shape: f32[2,128], index: 5, kind: output, shape index: {}]  }
   0x1   :  { %v261_v0 = vld [vmem:[%s380_s3] sm:$0xff]   ;;  %238 = vmatprep.subr.bf16.mxu0 %v293_v1  ;;  %v262_v2 = vld [vmem:[%s380_s3 + $0x8] sm:$0xff]   ;;  %254 = vmatprep.mubr.msk.bf16.mxu0 %vm294_vm0, %v293_v1  ;;  %v263_v3 = vld [vmem:[%s380_s3 + $0x10] sm:$0xff]  }
   0x2   :  { %239 = vmatpush3.bf16.msra.mxu0 %v261_v0  ;;  %v221_v4 = vld [vmem:[%s377_s0] sm:$0xff]   ;;  %v228_v5 = vld [vmem:[%s377_s0 + $0x8] sm:$0xff]  }
   0x3   :  { %240 = vmatprep.subr.bf16.mxu0 %v293_v1  ;;  %v209_v6 = vld [vmem:[%s378_s1] ss:$0 sm:$0xff]  ;;  %v222_v7 = vunpack.c.l.bf16 %v221_v4  ;;  %v223_v8 = vunpack.c.h.bf16 %v221_v4  ;;  %v226_v9 = vunpack.c.l.bf16 %v228_v5  ;;  %v227_v10 = vunpack.c.h.bf16 %v228_v5 }
   0x6   :  { %241 = vmatpush3.bf16.msra.mxu0 %v262_v2 }
   0x7   :  { %242 = vmatprep.subr.bf16.mxu0 %v293_v1 }
   0x8   :  { %10 = vsyncpa [#allocation3], 0  ;;  %v264_v11 = vld [vmem:[%s380_s3 + $0x18] sm:$0xff]   ;;  %v210_v12 = vld [vmem:[%s379_s2] ss:$0 sm:$0xff]  ;;  %v37_v13 = vmul.f32 %v222_v7, %v209_v6  ;;  %v38_v14 = vmul.f32 %v223_v8, %v209_v6  ;;  %v39_v15 = vmul.f32 %v226_v9, %v209_v6  ;;  %v40_v16 = vmul.f32 %v227_v10, %v209_v6 }
   0x9   :  { %v265_v21 = vld [vmem:[%s380_s3 + $0x20] sm:$0xff]   ;;  %v266_v28 = vld [vmem:[%s380_s3 + $0x28] sm:$0xff]   ;;  %v267_v33 = vld [vmem:[%s380_s3 + $0x30] sm:$0xff]   ;;  %vm102_vm1 = vcmask 1041409  }
   0xa   :  { %243 = vmatpush3.bf16.msra.mxu0 %v263_v3  ;;  %v48_v17 = vadd.f32 %v210_v12, %v37_v13  ;;  %v49_v18 = vadd.f32 %v210_v12, %v38_v14  ;;  %v50_v19 = vadd.f32 %v210_v12, %v39_v15  ;;  %v51_v20 = vadd.f32 %v210_v12, %v40_v16  ;;  %v268_v38 = vld [vmem:[%s380_s3 + $0x38] sm:$0xff]   ;;  %v211_v51 = vld [vmem:[%s381_s4] ss:$0 sm:$0xff]  ;;  %s295_s3 = smov [#allocation2]  }
   0xb   :  { %244 = vmatprep.subr.bf16.mxu0 %v293_v1  ;;  %s201_s16 = sshll.u32 %s295_s3, 4  ;;  %s202_s16 = int_to_ptr.vmem [resolvable:$true] %s201_s16 }
   0xc   :  { %v52_v22 = vmax.f32 %v48_v17, 0.0  ;;  %v53_v23 = vmax.f32 %v49_v18, 0.0  ;;  %v54_v24 = vmax.f32 %v50_v19, 0.0  ;;  %v55_v25 = vmax.f32 %v51_v20, 0.0  ;;  %s269_s17 = scalar_lea.vmem %s202_s16, 32  ;;  %p274_p1 = scmp.lt.s32.totalorder %s202_s16, %s202_s16 }
   0xd   :  { %p270_p0 = scmp.ne.s32.totalorder %s202_s16, %s269_s17  ;;  %p275_p2 = scmp.lt.s32.totalorder %s269_s17, %s269_s17 }
   0xe   :  { %245 = vmatpush3.bf16.msra.mxu0 %v264_v11  ;;  %v56_v26 = vadd.f32 %v53_v23, %v52_v22  ;;  %v63_v27 = vadd.f32 %v55_v25, %v54_v24 }
   0xf   :  { %246 = vmatprep.subr.bf16.mxu0 %v293_v1  ;;  %p276_p3 = por %p275_p2, %p274_p1 }
  0x10   :  { %v57_v29 = vrot.slane %v56_v26, 4  ;;  %v64_v30 = vrot.slane %v63_v27, 4 }
  0x11   :  { %p277_p4 = pnand %p276_p3, %p270_p0 }
  0x12   :  { %247 = vmatpush3.bf16.msra.mxu0 %v265_v21  ;;  %v58_v31 = vadd.f32 %v57_v29, %v56_v26  ;;  %v65_v32 = vadd.f32 %v64_v30, %v63_v27 }
  0x13   :  { %248 = vmatprep.subr.bf16.mxu0 %v293_v1 }
  0x14   :  { %v59_v34 = vrot.slane %v58_v31, 2  ;;  %v66_v35 = vrot.slane %v65_v32, 2 }
  0x16   :  { %249 = vmatpush3.bf16.msra.mxu0 %v266_v28  ;;  %v60_v36 = vadd.f32 %v59_v34, %v58_v31  ;;  %v67_v37 = vadd.f32 %v66_v35, %v65_v32 }
  0x17   :  { %250 = vmatprep.subr.bf16.mxu0 %v293_v1 }
  0x18   :  { %v61_v39 = vrot.slane %v60_v36, 1  ;;  %v68_v40 = vrot.slane %v67_v37, 1 }
  0x1a   :  { %251 = vmatpush3.bf16.msra.mxu0 %v267_v33  ;;  %v62_v41 = vadd.f32 %v61_v39, %v60_v36  ;;  %v69_v42 = vadd.f32 %v68_v40, %v67_v37 }
  0x1b   :  { %252 = vmatprep.subr.bf16.mxu0 %v293_v1 }
  0x1c   :  { %v71_v43 = vmul.f32 0.0625, %v62_v41  ;;  %v72_v44 = vmul.f32 0.0625, %v69_v42 }
  0x1e   :  { %253 = vmatpush3.bf16.msra.mxu0 %v268_v38  ;;  %v73_v45 = vpack.c.bf16 %v71_v43, %v71_v43  ;;  %v74_v46 = vpack.c.bf16 %v72_v44, %v72_v44 }
  0x20   :  { %v100_v47 = vunpack.c.l.b16 %v73_v45  ;;  %v101_v48 = vunpack.c.l.b16 %v74_v46 }
  0x22   :  { %v103_v49 = vsel %vm102_vm1, %v101_v48, %v100_v47 }
  0x23   :  { %v104_v50 = vpack.c.b16 %v103_v49, %v103_v49 }
  0x25   :  { %255 = vmatmul.mubr.bf16.vlgmr.msra.gmra.mrb[0].mxu0 %v104_v50 }
  0xf8   :  { %v188_v52 = vpop.f32.mrb[0].mxu0 }
  0xf9   :  { %v189_v53 = vadd.f32 %v211_v51, %v188_v52  ;;  %v256_v54 = vpop.f32.mrb[1].mxu0 }
  0xfa   :  { %v191_v55 = vpop.f32.mrb[2].mxu0 }
  0xfb   :  { %194 = vst [vmem:[#allocation2] sm:$0x3] %v189_v53  ;;  %v257_v56 = vpop.f32.mrb[3].mxu0 }
  0xfc   :  { %280 = shalt.err (!%p277_p4)
}
  0xfd   :  { %s281_s4 = scalar_lea.hbm %s382_s5, 32 }
  0xfe   :  { %p282_p5 = scmp.ne.s32.totalorder %s382_s5, %s281_s4  ;;  %p285_p6 = scmp.lt.u32.totalorder %s281_s4, %s382_s5 }
 0x100   :  { %p287_p7 = pnand %p285_p6, %p282_p5 }
 0x102   :  { %290 = shalt.err (!%p287_p7)
}
 0x103   :  { %204 = dma.vmem_to_hbm [thread:$0]  %s202_s16, 32, %s382_s5, [#allocation3]  }
 0x104   :  { %291 = dma.done.wait [#allocation3], 32  }
 0x105   :  { %292 = vsyncadd [#allocation3], 4294967264 }
 0x106   :  { %208 = vsyncpa [#allocation3], 1 }

</bundles_post_ra>
